<compile_context>
chip_gen: v7x
topology: tpu7x:2x2x1
jax: 0.10.0
libtpu: 0.0.40
codegen_flags: <defaults>
</compile_context>

<pallas_src>
import numpy as np

import jax
import jax.numpy as jnp
from jax import lax
from jax.experimental import pallas as pl
from jax.experimental.pallas import tpu as pltpu


def _conv_out(size, kernel_size=5, stride=2):
    return (size - (kernel_size - 1) - 1) // stride + 1


# ----------------------------------------------------------------------------
# Single fused Pallas kernel: 3x (conv5x5/s2 + folded-BN + ReLU) + FC head
# ----------------------------------------------------------------------------
def _dqn_kernel(x_ref,
                s1_ref, b1_ref, f1_ref,
                s2_ref, b2_ref, f2_ref,
                s3_ref, b3_ref, f3_ref,
                wfc_ref, bfc_ref,
                o_ref):
    """Runs the whole network for a block of `nb` samples, fully on-chip."""
    layers = ((s1_ref, b1_ref, f1_ref),
              (s2_ref, b2_ref, f2_ref),
              (s3_ref, b3_ref, f3_ref))
    nb = x_ref.shape[0]
    for s in range(nb):                                   # static, nb <= 8
        a = x_ref[s]                                      # (H, W*C) bf16 slab
        for s_ref, b_ref, f_ref in layers:
            kh = s_ref.shape[0]                           # 5 kernel rows
            oh = s_ref.shape[1]                           # output height
            k_out = b_ref.shape[2]                        # W_out * C_out
            acc = jnp.zeros((oh, k_out), jnp.float32)
            for di in range(kh):
                # Stride-2 row gather expressed as an exact 0/1 matmul.
                rows = jnp.dot(s_ref[di], a,
                               preferred_element_type=jnp.float32)
                rows = rows.astype(jnp.bfloat16)
                # Structured weight matmul: folds kernel-column offsets,
                # stride-2 column selection, BN scale and Cin->Cout.
                acc = acc + jnp.dot(rows, b_ref[di],
                                    preferred_element_type=jnp.float32)
            a = jnp.maximum(acc + f_ref[...], 0.0).astype(jnp.bfloat16)
        # FC head: sum over the (few) remaining activation rows.
        fc = jnp.zeros((1, wfc_ref.shape[2]), jnp.float32)
        for y in range(wfc_ref.shape[0]):                 # static, = H3
            fc = fc + jnp.dot(a[y:y + 1, :], wfc_ref[y],
                              preferred_element_type=jnp.float32)
        o_ref[s] = (fc + bfc_ref[...]).astype(o_ref.dtype)


def _batch_tiling(n):
    """Samples per grid block: >=2 blocks when n >= 2 (keeps both v7x
    TensorCores busy), <=8 samples/block (bounds VMEM and kernel unroll)."""
    if n <= 1:
        return 1, 1
    nb = max(1, min(8, n // 2))
    while n % nb:
        nb -= 1
    return nb, n // nb


def dqn_forward(x_nchw, prepped):
    """Full DQNAgent forward; returns (N, outputs) Q-values in f32."""
    n, c, h, w = x_nchw.shape
    # Single layout change at the interface: NCHW -> per-sample (H, W*C) slabs.
    x = jnp.transpose(x_nchw, (0, 2, 3, 1)).reshape(n, h, w * c)
    x = x.astype(jnp.bfloat16)

    s1, b1, f1 = prepped["c1"]
    s2, b2, f2 = prepped["c2"]
    s3, b3, f3 = prepped["c3"]
    wfc, bfc = prepped["fc"]
    outputs = wfc.shape[2]

    nb, grid_n = _batch_tiling(n)

    const3 = lambda i: (0, 0, 0)
    const2 = lambda i: (0, 0)

    out = pl.pallas_call(
        _dqn_kernel,
        out_shape=jax.ShapeDtypeStruct((n, 1, outputs), jnp.float32),
        grid=(grid_n,),
        in_specs=[
            pl.BlockSpec((nb, h, w * c), lambda i: (i, 0, 0)),   # batch-tiled
            pl.BlockSpec(s1.shape, const3), pl.BlockSpec(b1.shape, const3),
            pl.BlockSpec(f1.shape, const2),
            pl.BlockSpec(s2.shape, const3), pl.BlockSpec(b2.shape, const3),
            pl.BlockSpec(f2.shape, const2),
            pl.BlockSpec(s3.shape, const3), pl.BlockSpec(b3.shape, const3),
            pl.BlockSpec(f3.shape, const2),
            pl.BlockSpec(wfc.shape, const3), pl.BlockSpec(bfc.shape, const2),
        ],
        out_specs=pl.BlockSpec((nb, 1, outputs), lambda i: (i, 0, 0)),
        compiler_params=pltpu.CompilerParams(
            dimension_semantics=("parallel",),
            vmem_limit_bytes=32 * 1024 * 1024),
    )(x, s1, b1, f1, s2, b2, f2, s3, b3, f3, wfc, bfc)
    return out.reshape(n, outputs)


# ----------------------------------------------------------------------------
# One-time parameter preparation (all weight-side work hoisted out of forward)
# ----------------------------------------------------------------------------
def _fold_bn(w, b, gamma, beta, rmean, rvar, eps):
    scale = gamma / np.sqrt(rvar + eps)
    w_folded = w * scale[:, None, None, None]
    shift = beta - rmean * scale + b * scale
    return w_folded, shift


def _structured_conv_mats(w_folded, shift, h_in, w_in, stride=2):
    """Build S_di (stride-2 row selection) and B_di (structured weights) so the
    conv becomes  out[oy, ox*Cout+co] = sum_di (S_di @ a) @ B_di  on an
    a[h, w*Cin + ci] activation slab."""
    cout, cin, kh, kw = w_folded.shape
    oh = _conv_out(h_in, kh, stride)
    ow = _conv_out(w_in, kw, stride)
    k_in = w_in * cin
    k_out = ow * cout
    s_mat = np.zeros((kh, oh, h_in), np.float32)
    b_mat = np.zeros((kh, k_in, k_out), np.float32)
    for di in range(kh):
        for k in range(oh):
            s_mat[di, k, stride * k + di] = 1.0
        for ox in range(ow):
            for dj in range(kw):
                r0 = (stride * ox + dj) * cin
                c0 = ox * cout
                b_mat[di, r0:r0 + cin, c0:c0 + cout] = w_folded[:, :, di, dj].T
    shift_full = np.tile(shift, ow).reshape(1, k_out)
    return (jnp.asarray(s_mat, jnp.bfloat16),
            jnp.asarray(b_mat, jnp.bfloat16),
            jnp.asarray(shift_full, jnp.float32),
            oh, ow)


def prepare_params(params, height, width, eps=1e-5):
    prepped = {}
    h, w = height, width
    for name in ("c1", "c2", "c3"):
        wgt, b, gamma, beta, rmean, rvar = (np.asarray(t, np.float32)
                                            for t in params[name])
        w_folded, shift = _fold_bn(wgt, b, gamma, beta, rmean, rvar, eps)
        s_mat, b_mat, shift_full, oh, ow = _structured_conv_mats(
            w_folded, shift, h, w)
        prepped[name] = (s_mat, b_mat, shift_full)
        h, w = oh, ow

    w_fc, b_fc = (np.asarray(t, np.float32) for t in params["fc"])
    outputs = w_fc.shape[0]
    c3 = 32
    # PyTorch flattens NCHW; our activation rows are (y, x*C + c), so permute
    # the FC weight once here instead of touching activations in the kernel.
    wfc_struct = (w_fc.reshape(outputs, c3, h, w)
                  .transpose(2, 3, 1, 0)
                  .reshape(h, w * c3, outputs))
    prepped["fc"] = (jnp.asarray(wfc_struct, jnp.bfloat16),
                     jnp.asarray(b_fc.reshape(1, outputs), jnp.float32))
    return prepped


# ----------------------------------------------------------------------------
# Deterministic parameter construction (matches the PyTorch module's shapes)
# ----------------------------------------------------------------------------
def init_params(key, height, width, outputs):
    conv_w = _conv_out(_conv_out(_conv_out(width)))
    conv_h = _conv_out(_conv_out(_conv_out(height)))
    linear_input_size = conv_w * conv_h * 32

    keys = iter(jax.random.split(key, 20))       # 3 conv layers * 6 + 2 for FC

    def conv_layer(cin, cout):
        w = 0.05 * jax.random.normal(next(keys), (cout, cin, 5, 5), jnp.float32)
        b = 0.05 * jax.random.normal(next(keys), (cout,), jnp.float32)
        gamma = jax.random.uniform(next(keys), (cout,), jnp.float32, 0.5, 1.5)
        beta = 0.1 * jax.random.normal(next(keys), (cout,), jnp.float32)
        rmean = 0.1 * jax.random.normal(next(keys), (cout,), jnp.float32)
        rvar = jax.random.uniform(next(keys), (cout,), jnp.float32, 0.5, 1.5)
        return (w, b, gamma, beta, rmean, rvar)

    params = {
        "c1": conv_layer(3, 16),
        "c2": conv_layer(16, 32),
        "c3": conv_layer(32, 32),
        "fc": (
            0.05 * jax.random.normal(next(keys), (outputs, linear_input_size),
                                     jnp.float32),
            0.05 * jax.random.normal(next(keys), (outputs,), jnp.float32),
        ),
    }
    return params


# ----------------------------------------------------------------------------
# Pure-JAX f32 reference (eval-mode BN), used only for the in-script check
# ----------------------------------------------------------------------------
def _reference_forward(x, params, eps=1e-5):
    def conv_bn_relu(inp, layer):
        w, b, gamma, beta, rmean, rvar = layer
        y = lax.conv_general_dilated(
            inp, w, window_strides=(2, 2), padding="VALID",
            dimension_numbers=("NCHW", "OIHW", "NCHW"))
        y = y + b[None, :, None, None]
        scale = gamma / jnp.sqrt(rvar + eps)
        y = (y - rmean[None, :, None, None]) * scale[None, :, None, None] \
            + beta[None, :, None, None]
        return jnp.maximum(y, 0.0)

    y = x
    for name in ("c1", "c2", "c3"):
        y = conv_bn_relu(y, params[name])
    w_fc, b_fc = params["fc"]
    flat = y.reshape(y.shape[0], -1)
    return flat @ w_fc.T + b_fc


if __name__ == "__main__":
    HEIGHT, WIDTH, OUTPUTS, BATCH = 40, 40, 4, 2
    key = jax.random.PRNGKey(0)
    k_x, k_p = jax.random.split(key)
    x = jax.random.normal(k_x, (BATCH, 3, HEIGHT, WIDTH), jnp.float32)   # NCHW
    params = init_params(k_p, HEIGHT, WIDTH, OUTPUTS)
    prepped = prepare_params(params, HEIGHT, WIDTH)      # one-time weight prep

    forward = jax.jit(dqn_forward)
    q_values = forward(x, prepped)
    jax.block_until_ready(q_values)

    assert q_values.shape == (BATCH, OUTPUTS)
    assert bool(jnp.all(jnp.isfinite(q_values)))
    q_ref = _reference_forward(x, params)
    max_err = float(jnp.max(jnp.abs(q_values - q_ref)))
    assert max_err < 0.1, f"kernel/reference mismatch: {max_err}"
    print("KERNEL_OK")
</pallas_src>

<mosaic_0001>
module attributes {stable_mosaic.version = 11 : i64} {
  func.func @_dqn_kernel(%arg0: i32, %arg1: memref<1x40x120xbf16, #tpu.memory_space<vmem>>, %arg2: memref<5x18x40xbf16, #tpu.memory_space<vmem>>, %arg3: memref<5x120x288xbf16, #tpu.memory_space<vmem>>, %arg4: memref<1x288xf32, #tpu.memory_space<vmem>>, %arg5: memref<5x7x18xbf16, #tpu.memory_space<vmem>>, %arg6: memref<5x288x224xbf16, #tpu.memory_space<vmem>>, %arg7: memref<1x224xf32, #tpu.memory_space<vmem>>, %arg8: memref<5x2x7xbf16, #tpu.memory_space<vmem>>, %arg9: memref<5x224x64xbf16, #tpu.memory_space<vmem>>, %arg10: memref<1x64xf32, #tpu.memory_space<vmem>>, %arg11: memref<2x64x4xbf16, #tpu.memory_space<vmem>>, %arg12: memref<1x4xf32, #tpu.memory_space<vmem>>, %arg13: memref<1x1x4xf32, #tpu.memory_space<vmem>>) attributes {dimension_semantics = [#tpu.dimension_semantics<parallel>], iteration_bounds = array<i64: 2>, scalar_prefetch = 0 : i64, scratch_operands = 0 : i64, tpu.core_type = #tpu.core_type<tc>, window_params = [{transform_indices = @transform_0, window_bounds = array<i64: 1, 40, 120>}, {pipeline_mode = #tpu.pipeline_mode<synchronous>, transform_indices = @transform_1, window_bounds = array<i64: 5, 18, 40>}, {pipeline_mode = #tpu.pipeline_mode<synchronous>, transform_indices = @transform_2, window_bounds = array<i64: 5, 120, 288>}, {pipeline_mode = #tpu.pipeline_mode<synchronous>, transform_indices = @transform_3, window_bounds = array<i64: 1, 288>}, {pipeline_mode = #tpu.pipeline_mode<synchronous>, transform_indices = @transform_4, window_bounds = array<i64: 5, 7, 18>}, {pipeline_mode = #tpu.pipeline_mode<synchronous>, transform_indices = @transform_5, window_bounds = array<i64: 5, 288, 224>}, {pipeline_mode = #tpu.pipeline_mode<synchronous>, transform_indices = @transform_6, window_bounds = array<i64: 1, 224>}, {pipeline_mode = #tpu.pipeline_mode<synchronous>, transform_indices = @transform_7, window_bounds = array<i64: 5, 2, 7>}, {pipeline_mode = #tpu.pipeline_mode<synchronous>, transform_indices = @transform_8, window_bounds = array<i64: 5, 224, 64>}, {pipeline_mode = #tpu.pipeline_mode<synchronous>, transform_indices = @transform_9, window_bounds = array<i64: 1, 64>}, {pipeline_mode = #tpu.pipeline_mode<synchronous>, transform_indices = @transform_10, window_bounds = array<i64: 2, 64, 4>}, {pipeline_mode = #tpu.pipeline_mode<synchronous>, transform_indices = @transform_11, window_bounds = array<i64: 1, 4>}, {transform_indices = @transform_12, window_bounds = array<i64: 1, 1, 4>}]} {
    %c0 = arith.constant 0 : index
    %c0_0 = arith.constant 0 : index
    %c0_1 = arith.constant 0 : index
    %0 = vector.load %arg1[%c0, %c0_0, %c0_1] : memref<1x40x120xbf16, #tpu.memory_space<vmem>>, vector<1x40x120xbf16>
    %1 = vector.shape_cast %0 : vector<1x40x120xbf16> to vector<40x120xbf16>
    %cst = arith.constant 0.000000e+00 : f32
    %2 = vector.broadcast %cst : f32 to vector<18x288xf32>
    %c0_2 = arith.constant 0 : index
    %c0_3 = arith.constant 0 : index
    %c0_4 = arith.constant 0 : index
    %3 = vector.load %arg2[%c0_2, %c0_3, %c0_4] : memref<5x18x40xbf16, #tpu.memory_space<vmem>>, vector<1x18x40xbf16>
    %4 = vector.shape_cast %3 : vector<1x18x40xbf16> to vector<18x40xbf16>
    %cst_5 = arith.constant dense<0.000000e+00> : vector<18x120xf32>
    %5 = tpu.matmul %4, %1, %cst_5 {dimension_numbers = #tpu.dot_dimension_numbers<[1], [0], [0], [1], [0, 0, 1, 1], [], []>} : vector<18x40xbf16>, vector<40x120xbf16>, vector<18x120xf32> -> vector<18x120xf32>
    %6 = arith.truncf %5 : vector<18x120xf32> to vector<18x120xbf16>
    %c0_6 = arith.constant 0 : index
    %c0_7 = arith.constant 0 : index
    %c0_8 = arith.constant 0 : index
    %7 = vector.load %arg3[%c0_6, %c0_7, %c0_8] : memref<5x120x288xbf16, #tpu.memory_space<vmem>>, vector<1x120x288xbf16>
    %8 = vector.shape_cast %7 : vector<1x120x288xbf16> to vector<120x288xbf16>
    %cst_9 = arith.constant dense<0.000000e+00> : vector<18x288xf32>
    %9 = tpu.matmul %6, %8, %cst_9 {dimension_numbers = #tpu.dot_dimension_numbers<[1], [0], [0], [1], [0, 0, 1, 1], [], []>} : vector<18x120xbf16>, vector<120x288xbf16>, vector<18x288xf32> -> vector<18x288xf32>
    %10 = arith.addf %2, %9 : vector<18x288xf32>
    %c1 = arith.constant 1 : index
    %c0_10 = arith.constant 0 : index
    %c0_11 = arith.constant 0 : index
    %11 = vector.load %arg2[%c1, %c0_10, %c0_11] : memref<5x18x40xbf16, #tpu.memory_space<vmem>>, vector<1x18x40xbf16>
    %12 = vector.shape_cast %11 : vector<1x18x40xbf16> to vector<18x40xbf16>
    %cst_12 = arith.constant dense<0.000000e+00> : vector<18x120xf32>
    %13 = tpu.matmul %12, %1, %cst_12 {dimension_numbers = #tpu.dot_dimension_numbers<[1], [0], [0], [1], [0, 0, 1, 1], [], []>} : vector<18x40xbf16>, vector<40x120xbf16>, vector<18x120xf32> -> vector<18x120xf32>
    %14 = arith.truncf %13 : vector<18x120xf32> to vector<18x120xbf16>
    %c1_13 = arith.constant 1 : index
    %c0_14 = arith.constant 0 : index
    %c0_15 = arith.constant 0 : index
    %15 = vector.load %arg3[%c1_13, %c0_14, %c0_15] : memref<5x120x288xbf16, #tpu.memory_space<vmem>>, vector<1x120x288xbf16>
    %16 = vector.shape_cast %15 : vector<1x120x288xbf16> to vector<120x288xbf16>
    %cst_16 = arith.constant dense<0.000000e+00> : vector<18x288xf32>
    %17 = tpu.matmul %14, %16, %cst_16 {dimension_numbers = #tpu.dot_dimension_numbers<[1], [0], [0], [1], [0, 0, 1, 1], [], []>} : vector<18x120xbf16>, vector<120x288xbf16>, vector<18x288xf32> -> vector<18x288xf32>
    %18 = arith.addf %10, %17 : vector<18x288xf32>
    %c2 = arith.constant 2 : index
    %c0_17 = arith.constant 0 : index
    %c0_18 = arith.constant 0 : index
    %19 = vector.load %arg2[%c2, %c0_17, %c0_18] : memref<5x18x40xbf16, #tpu.memory_space<vmem>>, vector<1x18x40xbf16>
    %20 = vector.shape_cast %19 : vector<1x18x40xbf16> to vector<18x40xbf16>
    %cst_19 = arith.constant dense<0.000000e+00> : vector<18x120xf32>
    %21 = tpu.matmul %20, %1, %cst_19 {dimension_numbers = #tpu.dot_dimension_numbers<[1], [0], [0], [1], [0, 0, 1, 1], [], []>} : vector<18x40xbf16>, vector<40x120xbf16>, vector<18x120xf32> -> vector<18x120xf32>
    %22 = arith.truncf %21 : vector<18x120xf32> to vector<18x120xbf16>
    %c2_20 = arith.constant 2 : index
    %c0_21 = arith.constant 0 : index
    %c0_22 = arith.constant 0 : index
    %23 = vector.load %arg3[%c2_20, %c0_21, %c0_22] : memref<5x120x288xbf16, #tpu.memory_space<vmem>>, vector<1x120x288xbf16>
    %24 = vector.shape_cast %23 : vector<1x120x288xbf16> to vector<120x288xbf16>
    %cst_23 = arith.constant dense<0.000000e+00> : vector<18x288xf32>
    %25 = tpu.matmul %22, %24, %cst_23 {dimension_numbers = #tpu.dot_dimension_numbers<[1], [0], [0], [1], [0, 0, 1, 1], [], []>} : vector<18x120xbf16>, vector<120x288xbf16>, vector<18x288xf32> -> vector<18x288xf32>
    %26 = arith.addf %18, %25 : vector<18x288xf32>
    %c3 = arith.constant 3 : index
    %c0_24 = arith.constant 0 : index
    %c0_25 = arith.constant 0 : index
    %27 = vector.load %arg2[%c3, %c0_24, %c0_25] : memref<5x18x40xbf16, #tpu.memory_space<vmem>>, vector<1x18x40xbf16>
    %28 = vector.shape_cast %27 : vector<1x18x40xbf16> to vector<18x40xbf16>
    %cst_26 = arith.constant dense<0.000000e+00> : vector<18x120xf32>
    %29 = tpu.matmul %28, %1, %cst_26 {dimension_numbers = #tpu.dot_dimension_numbers<[1], [0], [0], [1], [0, 0, 1, 1], [], []>} : vector<18x40xbf16>, vector<40x120xbf16>, vector<18x120xf32> -> vector<18x120xf32>
    %30 = arith.truncf %29 : vector<18x120xf32> to vector<18x120xbf16>
    %c3_27 = arith.constant 3 : index
    %c0_28 = arith.constant 0 : index
    %c0_29 = arith.constant 0 : index
    %31 = vector.load %arg3[%c3_27, %c0_28, %c0_29] : memref<5x120x288xbf16, #tpu.memory_space<vmem>>, vector<1x120x288xbf16>
    %32 = vector.shape_cast %31 : vector<1x120x288xbf16> to vector<120x288xbf16>
    %cst_30 = arith.constant dense<0.000000e+00> : vector<18x288xf32>
    %33 = tpu.matmul %30, %32, %cst_30 {dimension_numbers = #tpu.dot_dimension_numbers<[1], [0], [0], [1], [0, 0, 1, 1], [], []>} : vector<18x120xbf16>, vector<120x288xbf16>, vector<18x288xf32> -> vector<18x288xf32>
    %34 = arith.addf %26, %33 : vector<18x288xf32>
    %c4 = arith.constant 4 : index
    %c0_31 = arith.constant 0 : index
    %c0_32 = arith.constant 0 : index
    %35 = vector.load %arg2[%c4, %c0_31, %c0_32] : memref<5x18x40xbf16, #tpu.memory_space<vmem>>, vector<1x18x40xbf16>
    %36 = vector.shape_cast %35 : vector<1x18x40xbf16> to vector<18x40xbf16>
    %cst_33 = arith.constant dense<0.000000e+00> : vector<18x120xf32>
    %37 = tpu.matmul %36, %1, %cst_33 {dimension_numbers = #tpu.dot_dimension_numbers<[1], [0], [0], [1], [0, 0, 1, 1], [], []>} : vector<18x40xbf16>, vector<40x120xbf16>, vector<18x120xf32> -> vector<18x120xf32>
    %38 = arith.truncf %37 : vector<18x120xf32> to vector<18x120xbf16>
    %c4_34 = arith.constant 4 : index
    %c0_35 = arith.constant 0 : index
    %c0_36 = arith.constant 0 : index
    %39 = vector.load %arg3[%c4_34, %c0_35, %c0_36] : memref<5x120x288xbf16, #tpu.memory_space<vmem>>, vector<1x120x288xbf16>
    %40 = vector.shape_cast %39 : vector<1x120x288xbf16> to vector<120x288xbf16>
    %cst_37 = arith.constant dense<0.000000e+00> : vector<18x288xf32>
    %41 = tpu.matmul %38, %40, %cst_37 {dimension_numbers = #tpu.dot_dimension_numbers<[1], [0], [0], [1], [0, 0, 1, 1], [], []>} : vector<18x120xbf16>, vector<120x288xbf16>, vector<18x288xf32> -> vector<18x288xf32>
    %42 = arith.addf %34, %41 : vector<18x288xf32>
    %c0_38 = arith.constant 0 : index
    %c0_39 = arith.constant 0 : index
    %43 = vector.load %arg4[%c0_38, %c0_39] : memref<1x288xf32, #tpu.memory_space<vmem>>, vector<1x288xf32>
    %44 = vector.broadcast %43 : vector<1x288xf32> to vector<18x288xf32>
    %45 = arith.addf %42, %44 : vector<18x288xf32>
    %cst_40 = arith.constant 0.000000e+00 : f32
    %46 = vector.broadcast %cst_40 : f32 to vector<18x288xf32>
    %47 = arith.maximumf %45, %46 : vector<18x288xf32>
    %48 = arith.truncf %47 : vector<18x288xf32> to vector<18x288xbf16>
    %cst_41 = arith.constant 0.000000e+00 : f32
    %49 = vector.broadcast %cst_41 : f32 to vector<7x224xf32>
    %c0_42 = arith.constant 0 : index
    %c0_43 = arith.constant 0 : index
    %c0_44 = arith.constant 0 : index
    %50 = vector.load %arg5[%c0_42, %c0_43, %c0_44] : memref<5x7x18xbf16, #tpu.memory_space<vmem>>, vector<1x7x18xbf16>
    %51 = vector.shape_cast %50 : vector<1x7x18xbf16> to vector<7x18xbf16>
    %cst_45 = arith.constant dense<0.000000e+00> : vector<7x288xf32>
    %52 = tpu.matmul %51, %48, %cst_45 {dimension_numbers = #tpu.dot_dimension_numbers<[1], [0], [0], [1], [0, 0, 1, 1], [], []>} : vector<7x18xbf16>, vector<18x288xbf16>, vector<7x288xf32> -> vector<7x288xf32>
    %53 = arith.truncf %52 : vector<7x288xf32> to vector<7x288xbf16>
    %c0_46 = arith.constant 0 : index
    %c0_47 = arith.constant 0 : index
    %c0_48 = arith.constant 0 : index
    %54 = vector.load %arg6[%c0_46, %c0_47, %c0_48] : memref<5x288x224xbf16, #tpu.memory_space<vmem>>, vector<1x288x224xbf16>
    %55 = vector.shape_cast %54 : vector<1x288x224xbf16> to vector<288x224xbf16>
    %cst_49 = arith.constant dense<0.000000e+00> : vector<7x224xf32>
    %56 = tpu.matmul %53, %55, %cst_49 {dimension_numbers = #tpu.dot_dimension_numbers<[1], [0], [0], [1], [0, 0, 1, 1], [], []>} : vector<7x288xbf16>, vector<288x224xbf16>, vector<7x224xf32> -> vector<7x224xf32>
    %57 = arith.addf %49, %56 : vector<7x224xf32>
    %c1_50 = arith.constant 1 : index
    %c0_51 = arith.constant 0 : index
    %c0_52 = arith.constant 0 : index
    %58 = vector.load %arg5[%c1_50, %c0_51, %c0_52] : memref<5x7x18xbf16, #tpu.memory_space<vmem>>, vector<1x7x18xbf16>
    %59 = vector.shape_cast %58 : vector<1x7x18xbf16> to vector<7x18xbf16>
    %cst_53 = arith.constant dense<0.000000e+00> : vector<7x288xf32>
    %60 = tpu.matmul %59, %48, %cst_53 {dimension_numbers = #tpu.dot_dimension_numbers<[1], [0], [0], [1], [0, 0, 1, 1], [], []>} : vector<7x18xbf16>, vector<18x288xbf16>, vector<7x288xf32> -> vector<7x288xf32>
    %61 = arith.truncf %60 : vector<7x288xf32> to vector<7x288xbf16>
    %c1_54 = arith.constant 1 : index
    %c0_55 = arith.constant 0 : index
    %c0_56 = arith.constant 0 : index
    %62 = vector.load %arg6[%c1_54, %c0_55, %c0_56] : memref<5x288x224xbf16, #tpu.memory_space<vmem>>, vector<1x288x224xbf16>
    %63 = vector.shape_cast %62 : vector<1x288x224xbf16> to vector<288x224xbf16>
    %cst_57 = arith.constant dense<0.000000e+00> : vector<7x224xf32>
    %64 = tpu.matmul %61, %63, %cst_57 {dimension_numbers = #tpu.dot_dimension_numbers<[1], [0], [0], [1], [0, 0, 1, 1], [], []>} : vector<7x288xbf16>, vector<288x224xbf16>, vector<7x224xf32> -> vector<7x224xf32>
    %65 = arith.addf %57, %64 : vector<7x224xf32>
    %c2_58 = arith.constant 2 : index
    %c0_59 = arith.constant 0 : index
    %c0_60 = arith.constant 0 : index
    %66 = vector.load %arg5[%c2_58, %c0_59, %c0_60] : memref<5x7x18xbf16, #tpu.memory_space<vmem>>, vector<1x7x18xbf16>
    %67 = vector.shape_cast %66 : vector<1x7x18xbf16> to vector<7x18xbf16>
    %cst_61 = arith.constant dense<0.000000e+00> : vector<7x288xf32>
    %68 = tpu.matmul %67, %48, %cst_61 {dimension_numbers = #tpu.dot_dimension_numbers<[1], [0], [0], [1], [0, 0, 1, 1], [], []>} : vector<7x18xbf16>, vector<18x288xbf16>, vector<7x288xf32> -> vector<7x288xf32>
    %69 = arith.truncf %68 : vector<7x288xf32> to vector<7x288xbf16>
    %c2_62 = arith.constant 2 : index
    %c0_63 = arith.constant 0 : index
    %c0_64 = arith.constant 0 : index
    %70 = vector.load %arg6[%c2_62, %c0_63, %c0_64] : memref<5x288x224xbf16, #tpu.memory_space<vmem>>, vector<1x288x224xbf16>
    %71 = vector.shape_cast %70 : vector<1x288x224xbf16> to vector<288x224xbf16>
    %cst_65 = arith.constant dense<0.000000e+00> : vector<7x224xf32>
    %72 = tpu.matmul %69, %71, %cst_65 {dimension_numbers = #tpu.dot_dimension_numbers<[1], [0], [0], [1], [0, 0, 1, 1], [], []>} : vector<7x288xbf16>, vector<288x224xbf16>, vector<7x224xf32> -> vector<7x224xf32>
    %73 = arith.addf %65, %72 : vector<7x224xf32>
    %c3_66 = arith.constant 3 : index
    %c0_67 = arith.constant 0 : index
    %c0_68 = arith.constant 0 : index
    %74 = vector.load %arg5[%c3_66, %c0_67, %c0_68] : memref<5x7x18xbf16, #tpu.memory_space<vmem>>, vector<1x7x18xbf16>
    %75 = vector.shape_cast %74 : vector<1x7x18xbf16> to vector<7x18xbf16>
    %cst_69 = arith.constant dense<0.000000e+00> : vector<7x288xf32>
    %76 = tpu.matmul %75, %48, %cst_69 {dimension_numbers = #tpu.dot_dimension_numbers<[1], [0], [0], [1], [0, 0, 1, 1], [], []>} : vector<7x18xbf16>, vector<18x288xbf16>, vector<7x288xf32> -> vector<7x288xf32>
    %77 = arith.truncf %76 : vector<7x288xf32> to vector<7x288xbf16>
    %c3_70 = arith.constant 3 : index
    %c0_71 = arith.constant 0 : index
    %c0_72 = arith.constant 0 : index
    %78 = vector.load %arg6[%c3_70, %c0_71, %c0_72] : memref<5x288x224xbf16, #tpu.memory_space<vmem>>, vector<1x288x224xbf16>
    %79 = vector.shape_cast %78 : vector<1x288x224xbf16> to vector<288x224xbf16>
    %cst_73 = arith.constant dense<0.000000e+00> : vector<7x224xf32>
    %80 = tpu.matmul %77, %79, %cst_73 {dimension_numbers = #tpu.dot_dimension_numbers<[1], [0], [0], [1], [0, 0, 1, 1], [], []>} : vector<7x288xbf16>, vector<288x224xbf16>, vector<7x224xf32> -> vector<7x224xf32>
    %81 = arith.addf %73, %80 : vector<7x224xf32>
    %c4_74 = arith.constant 4 : index
    %c0_75 = arith.constant 0 : index
    %c0_76 = arith.constant 0 : index
    %82 = vector.load %arg5[%c4_74, %c0_75, %c0_76] : memref<5x7x18xbf16, #tpu.memory_space<vmem>>, vector<1x7x18xbf16>
    %83 = vector.shape_cast %82 : vector<1x7x18xbf16> to vector<7x18xbf16>
    %cst_77 = arith.constant dense<0.000000e+00> : vector<7x288xf32>
    %84 = tpu.matmul %83, %48, %cst_77 {dimension_numbers = #tpu.dot_dimension_numbers<[1], [0], [0], [1], [0, 0, 1, 1], [], []>} : vector<7x18xbf16>, vector<18x288xbf16>, vector<7x288xf32> -> vector<7x288xf32>
    %85 = arith.truncf %84 : vector<7x288xf32> to vector<7x288xbf16>
    %c4_78 = arith.constant 4 : index
    %c0_79 = arith.constant 0 : index
    %c0_80 = arith.constant 0 : index
    %86 = vector.load %arg6[%c4_78, %c0_79, %c0_80] : memref<5x288x224xbf16, #tpu.memory_space<vmem>>, vector<1x288x224xbf16>
    %87 = vector.shape_cast %86 : vector<1x288x224xbf16> to vector<288x224xbf16>
    %cst_81 = arith.constant dense<0.000000e+00> : vector<7x224xf32>
    %88 = tpu.matmul %85, %87, %cst_81 {dimension_numbers = #tpu.dot_dimension_numbers<[1], [0], [0], [1], [0, 0, 1, 1], [], []>} : vector<7x288xbf16>, vector<288x224xbf16>, vector<7x224xf32> -> vector<7x224xf32>
    %89 = arith.addf %81, %88 : vector<7x224xf32>
    %c0_82 = arith.constant 0 : index
    %c0_83 = arith.constant 0 : index
    %90 = vector.load %arg7[%c0_82, %c0_83] : memref<1x224xf32, #tpu.memory_space<vmem>>, vector<1x224xf32>
    %91 = vector.broadcast %90 : vector<1x224xf32> to vector<7x224xf32>
    %92 = arith.addf %89, %91 : vector<7x224xf32>
    %cst_84 = arith.constant 0.000000e+00 : f32
    %93 = vector.broadcast %cst_84 : f32 to vector<7x224xf32>
    %94 = arith.maximumf %92, %93 : vector<7x224xf32>
    %95 = arith.truncf %94 : vector<7x224xf32> to vector<7x224xbf16>
    %cst_85 = arith.constant 0.000000e+00 : f32
    %96 = vector.broadcast %cst_85 : f32 to vector<2x64xf32>
    %c0_86 = arith.constant 0 : index
    %c0_87 = arith.constant 0 : index
    %c0_88 = arith.constant 0 : index
    %97 = vector.load %arg8[%c0_86, %c0_87, %c0_88] : memref<5x2x7xbf16, #tpu.memory_space<vmem>>, vector<1x2x7xbf16>
    %98 = vector.shape_cast %97 : vector<1x2x7xbf16> to vector<2x7xbf16>
    %cst_89 = arith.constant dense<0.000000e+00> : vector<2x224xf32>
    %99 = tpu.matmul %98, %95, %cst_89 {dimension_numbers = #tpu.dot_dimension_numbers<[1], [0], [0], [1], [0, 0, 1, 1], [], []>} : vector<2x7xbf16>, vector<7x224xbf16>, vector<2x224xf32> -> vector<2x224xf32>
    %100 = arith.truncf %99 : vector<2x224xf32> to vector<2x224xbf16>
    %c0_90 = arith.constant 0 : index
    %c0_91 = arith.constant 0 : index
    %c0_92 = arith.constant 0 : index
    %101 = vector.load %arg9[%c0_90, %c0_91, %c0_92] : memref<5x224x64xbf16, #tpu.memory_space<vmem>>, vector<1x224x64xbf16>
    %102 = vector.shape_cast %101 : vector<1x224x64xbf16> to vector<224x64xbf16>
    %cst_93 = arith.constant dense<0.000000e+00> : vector<2x64xf32>
    %103 = tpu.matmul %100, %102, %cst_93 {dimension_numbers = #tpu.dot_dimension_numbers<[1], [0], [0], [1], [0, 0, 1, 1], [], []>} : vector<2x224xbf16>, vector<224x64xbf16>, vector<2x64xf32> -> vector<2x64xf32>
    %104 = arith.addf %96, %103 : vector<2x64xf32>
    %c1_94 = arith.constant 1 : index
    %c0_95 = arith.constant 0 : index
    %c0_96 = arith.constant 0 : index
    %105 = vector.load %arg8[%c1_94, %c0_95, %c0_96] : memref<5x2x7xbf16, #tpu.memory_space<vmem>>, vector<1x2x7xbf16>
    %106 = vector.shape_cast %105 : vector<1x2x7xbf16> to vector<2x7xbf16>
    %cst_97 = arith.constant dense<0.000000e+00> : vector<2x224xf32>
    %107 = tpu.matmul %106, %95, %cst_97 {dimension_numbers = #tpu.dot_dimension_numbers<[1], [0], [0], [1], [0, 0, 1, 1], [], []>} : vector<2x7xbf16>, vector<7x224xbf16>, vector<2x224xf32> -> vector<2x224xf32>
    %108 = arith.truncf %107 : vector<2x224xf32> to vector<2x224xbf16>
    %c1_98 = arith.constant 1 : index
    %c0_99 = arith.constant 0 : index
    %c0_100 = arith.constant 0 : index
    %109 = vector.load %arg9[%c1_98, %c0_99, %c0_100] : memref<5x224x64xbf16, #tpu.memory_space<vmem>>, vector<1x224x64xbf16>
    %110 = vector.shape_cast %109 : vector<1x224x64xbf16> to vector<224x64xbf16>
    %cst_101 = arith.constant dense<0.000000e+00> : vector<2x64xf32>
    %111 = tpu.matmul %108, %110, %cst_101 {dimension_numbers = #tpu.dot_dimension_numbers<[1], [0], [0], [1], [0, 0, 1, 1], [], []>} : vector<2x224xbf16>, vector<224x64xbf16>, vector<2x64xf32> -> vector<2x64xf32>
    %112 = arith.addf %104, %111 : vector<2x64xf32>
    %c2_102 = arith.constant 2 : index
    %c0_103 = arith.constant 0 : index
    %c0_104 = arith.constant 0 : index
    %113 = vector.load %arg8[%c2_102, %c0_103, %c0_104] : memref<5x2x7xbf16, #tpu.memory_space<vmem>>, vector<1x2x7xbf16>
    %114 = vector.shape_cast %113 : vector<1x2x7xbf16> to vector<2x7xbf16>
    %cst_105 = arith.constant dense<0.000000e+00> : vector<2x224xf32>
    %115 = tpu.matmul %114, %95, %cst_105 {dimension_numbers = #tpu.dot_dimension_numbers<[1], [0], [0], [1], [0, 0, 1, 1], [], []>} : vector<2x7xbf16>, vector<7x224xbf16>, vector<2x224xf32> -> vector<2x224xf32>
    %116 = arith.truncf %115 : vector<2x224xf32> to vector<2x224xbf16>
    %c2_106 = arith.constant 2 : index
    %c0_107 = arith.constant 0 : index
    %c0_108 = arith.constant 0 : index
    %117 = vector.load %arg9[%c2_106, %c0_107, %c0_108] : memref<5x224x64xbf16, #tpu.memory_space<vmem>>, vector<1x224x64xbf16>
    %118 = vector.shape_cast %117 : vector<1x224x64xbf16> to vector<224x64xbf16>
    %cst_109 = arith.constant dense<0.000000e+00> : vector<2x64xf32>
    %119 = tpu.matmul %116, %118, %cst_109 {dimension_numbers = #tpu.dot_dimension_numbers<[1], [0], [0], [1], [0, 0, 1, 1], [], []>} : vector<2x224xbf16>, vector<224x64xbf16>, vector<2x64xf32> -> vector<2x64xf32>
    %120 = arith.addf %112, %119 : vector<2x64xf32>
    %c3_110 = arith.constant 3 : index
    %c0_111 = arith.constant 0 : index
    %c0_112 = arith.constant 0 : index
    %121 = vector.load %arg8[%c3_110, %c0_111, %c0_112] : memref<5x2x7xbf16, #tpu.memory_space<vmem>>, vector<1x2x7xbf16>
    %122 = vector.shape_cast %121 : vector<1x2x7xbf16> to vector<2x7xbf16>
    %cst_113 = arith.constant dense<0.000000e+00> : vector<2x224xf32>
    %123 = tpu.matmul %122, %95, %cst_113 {dimension_numbers = #tpu.dot_dimension_numbers<[1], [0], [0], [1], [0, 0, 1, 1], [], []>} : vector<2x7xbf16>, vector<7x224xbf16>, vector<2x224xf32> -> vector<2x224xf32>
    %124 = arith.truncf %123 : vector<2x224xf32> to vector<2x224xbf16>
    %c3_114 = arith.constant 3 : index
    %c0_115 = arith.constant 0 : index
    %c0_116 = arith.constant 0 : index
    %125 = vector.load %arg9[%c3_114, %c0_115, %c0_116] : memref<5x224x64xbf16, #tpu.memory_space<vmem>>, vector<1x224x64xbf16>
    %126 = vector.shape_cast %125 : vector<1x224x64xbf16> to vector<224x64xbf16>
    %cst_117 = arith.constant dense<0.000000e+00> : vector<2x64xf32>
    %127 = tpu.matmul %124, %126, %cst_117 {dimension_numbers = #tpu.dot_dimension_numbers<[1], [0], [0], [1], [0, 0, 1, 1], [], []>} : vector<2x224xbf16>, vector<224x64xbf16>, vector<2x64xf32> -> vector<2x64xf32>
    %128 = arith.addf %120, %127 : vector<2x64xf32>
    %c4_118 = arith.constant 4 : index
    %c0_119 = arith.constant 0 : index
    %c0_120 = arith.constant 0 : index
    %129 = vector.load %arg8[%c4_118, %c0_119, %c0_120] : memref<5x2x7xbf16, #tpu.memory_space<vmem>>, vector<1x2x7xbf16>
    %130 = vector.shape_cast %129 : vector<1x2x7xbf16> to vector<2x7xbf16>
    %cst_121 = arith.constant dense<0.000000e+00> : vector<2x224xf32>
    %131 = tpu.matmul %130, %95, %cst_121 {dimension_numbers = #tpu.dot_dimension_numbers<[1], [0], [0], [1], [0, 0, 1, 1], [], []>} : vector<2x7xbf16>, vector<7x224xbf16>, vector<2x224xf32> -> vector<2x224xf32>
    %132 = arith.truncf %131 : vector<2x224xf32> to vector<2x224xbf16>
    %c4_122 = arith.constant 4 : index
    %c0_123 = arith.constant 0 : index
    %c0_124 = arith.constant 0 : index
    %133 = vector.load %arg9[%c4_122, %c0_123, %c0_124] : memref<5x224x64xbf16, #tpu.memory_space<vmem>>, vector<1x224x64xbf16>
    %134 = vector.shape_cast %133 : vector<1x224x64xbf16> to vector<224x64xbf16>
    %cst_125 = arith.constant dense<0.000000e+00> : vector<2x64xf32>
    %135 = tpu.matmul %132, %134, %cst_125 {dimension_numbers = #tpu.dot_dimension_numbers<[1], [0], [0], [1], [0, 0, 1, 1], [], []>} : vector<2x224xbf16>, vector<224x64xbf16>, vector<2x64xf32> -> vector<2x64xf32>
    %136 = arith.addf %128, %135 : vector<2x64xf32>
    %c0_126 = arith.constant 0 : index
    %c0_127 = arith.constant 0 : index
    %137 = vector.load %arg10[%c0_126, %c0_127] : memref<1x64xf32, #tpu.memory_space<vmem>>, vector<1x64xf32>
    %138 = vector.broadcast %137 : vector<1x64xf32> to vector<2x64xf32>
    %139 = arith.addf %136, %138 : vector<2x64xf32>
    %cst_128 = arith.constant 0.000000e+00 : f32
    %140 = vector.broadcast %cst_128 : f32 to vector<2x64xf32>
    %141 = arith.maximumf %139, %140 : vector<2x64xf32>
    %142 = arith.truncf %141 : vector<2x64xf32> to vector<2x64xbf16>
    %cst_129 = arith.constant 0.000000e+00 : f32
    %143 = vector.broadcast %cst_129 : f32 to vector<1x4xf32>
    %144 = vector.extract_strided_slice %142 {offsets = [0, 0], sizes = [1, 64], strides = [1, 1]} : vector<2x64xbf16> to vector<1x64xbf16>
    %c0_130 = arith.constant 0 : index
    %c0_131 = arith.constant 0 : index
    %c0_132 = arith.constant 0 : index
    %145 = vector.load %arg11[%c0_130, %c0_131, %c0_132] : memref<2x64x4xbf16, #tpu.memory_space<vmem>>, vector<1x64x4xbf16>
    %146 = vector.shape_cast %145 : vector<1x64x4xbf16> to vector<64x4xbf16>
    %cst_133 = arith.constant dense<0.000000e+00> : vector<1x4xf32>
    %147 = tpu.matmul %144, %146, %cst_133 {dimension_numbers = #tpu.dot_dimension_numbers<[1], [0], [0], [1], [0, 0, 1, 1], [], []>} : vector<1x64xbf16>, vector<64x4xbf16>, vector<1x4xf32> -> vector<1x4xf32>
    %148 = arith.addf %143, %147 : vector<1x4xf32>
    %149 = vector.extract_strided_slice %142 {offsets = [1, 0], sizes = [1, 64], strides = [1, 1]} : vector<2x64xbf16> to vector<1x64xbf16>
    %c1_134 = arith.constant 1 : index
    %c0_135 = arith.constant 0 : index
    %c0_136 = arith.constant 0 : index
    %150 = vector.load %arg11[%c1_134, %c0_135, %c0_136] : memref<2x64x4xbf16, #tpu.memory_space<vmem>>, vector<1x64x4xbf16>
    %151 = vector.shape_cast %150 : vector<1x64x4xbf16> to vector<64x4xbf16>
    %cst_137 = arith.constant dense<0.000000e+00> : vector<1x4xf32>
    %152 = tpu.matmul %149, %151, %cst_137 {dimension_numbers = #tpu.dot_dimension_numbers<[1], [0], [0], [1], [0, 0, 1, 1], [], []>} : vector<1x64xbf16>, vector<64x4xbf16>, vector<1x4xf32> -> vector<1x4xf32>
    %153 = arith.addf %148, %152 : vector<1x4xf32>
    %c0_138 = arith.constant 0 : index
    %c0_139 = arith.constant 0 : index
    %154 = vector.load %arg12[%c0_138, %c0_139] : memref<1x4xf32, #tpu.memory_space<vmem>>, vector<1x4xf32>
    %155 = arith.addf %153, %154 : vector<1x4xf32>
    %c0_140 = arith.constant 0 : index
    %c0_141 = arith.constant 0 : index
    %c0_142 = arith.constant 0 : index
    %156 = vector.load %arg13[%c0_140, %c0_141, %c0_142] : memref<1x1x4xf32, #tpu.memory_space<vmem>>, vector<1x1x4xf32>
    %157 = vector.shape_cast %156 : vector<1x1x4xf32> to vector<1x4xf32>
    %158 = vector.shape_cast %155 : vector<1x4xf32> to vector<1x1x4xf32>
    tpu.vector_store %arg13[%c0_140, %c0_141, %c0_142], %158 {strides = array<i32>} : memref<1x1x4xf32, #tpu.memory_space<vmem>>, vector<1x1x4xf32>,
    return
  }
  func.func @transform_0(%arg0: i32) -> (i32, i32, i32) {
    %c0_i32 = arith.constant 0 : i32
    %c0_i32_0 = arith.constant 0 : i32
    %c0_i32_1 = arith.constant 0 : i32
    return %arg0, %c0_i32, %c0_i32_0 : i32, i32, i32
  }
  func.func @transform_1(%arg0: i32) -> (i32, i32, i32) {
    %c0_i32 = arith.constant 0 : i32
    %c0_i32_0 = arith.constant 0 : i32
    %c0_i32_1 = arith.constant 0 : i32
    %c0_i32_2 = arith.constant 0 : i32
    return %c0_i32, %c0_i32_0, %c0_i32_1 : i32, i32, i32
  }
  func.func @transform_2(%arg0: i32) -> (i32, i32, i32) {
    %c0_i32 = arith.constant 0 : i32
    %c0_i32_0 = arith.constant 0 : i32
    %c0_i32_1 = arith.constant 0 : i32
    %c0_i32_2 = arith.constant 0 : i32
    return %c0_i32, %c0_i32_0, %c0_i32_1 : i32, i32, i32
  }
  func.func @transform_3(%arg0: i32) -> (i32, i32) {
    %c0_i32 = arith.constant 0 : i32
    %c0_i32_0 = arith.constant 0 : i32
    %c0_i32_1 = arith.constant 0 : i32
    return %c0_i32, %c0_i32_0 : i32, i32
  }
  func.func @transform_4(%arg0: i32) -> (i32, i32, i32) {
    %c0_i32 = arith.constant 0 : i32
    %c0_i32_0 = arith.constant 0 : i32
    %c0_i32_1 = arith.constant 0 : i32
    %c0_i32_2 = arith.constant 0 : i32
    return %c0_i32, %c0_i32_0, %c0_i32_1 : i32, i32, i32
  }
  func.func @transform_5(%arg0: i32) -> (i32, i32, i32) {
    %c0_i32 = arith.constant 0 : i32
    %c0_i32_0 = arith.constant 0 : i32
    %c0_i32_1 = arith.constant 0 : i32
    %c0_i32_2 = arith.constant 0 : i32
    return %c0_i32, %c0_i32_0, %c0_i32_1 : i32, i32, i32
  }
  func.func @transform_6(%arg0: i32) -> (i32, i32) {
    %c0_i32 = arith.constant 0 : i32
    %c0_i32_0 = arith.constant 0 : i32
    %c0_i32_1 = arith.constant 0 : i32
    return %c0_i32, %c0_i32_0 : i32, i32
  }
  func.func @transform_7(%arg0: i32) -> (i32, i32, i32) {
    %c0_i32 = arith.constant 0 : i32
    %c0_i32_0 = arith.constant 0 : i32
    %c0_i32_1 = arith.constant 0 : i32
    %c0_i32_2 = arith.constant 0 : i32
    return %c0_i32, %c0_i32_0, %c0_i32_1 : i32, i32, i32
  }
  func.func @transform_8(%arg0: i32) -> (i32, i32, i32) {
    %c0_i32 = arith.constant 0 : i32
    %c0_i32_0 = arith.constant 0 : i32
    %c0_i32_1 = arith.constant 0 : i32
    %c0_i32_2 = arith.constant 0 : i32
    return %c0_i32, %c0_i32_0, %c0_i32_1 : i32, i32, i32
  }
  func.func @transform_9(%arg0: i32) -> (i32, i32) {
    %c0_i32 = arith.constant 0 : i32
    %c0_i32_0 = arith.constant 0 : i32
    %c0_i32_1 = arith.constant 0 : i32
    return %c0_i32, %c0_i32_0 : i32, i32
  }
  func.func @transform_10(%arg0: i32) -> (i32, i32, i32) {
    %c0_i32 = arith.constant 0 : i32
    %c0_i32_0 = arith.constant 0 : i32
    %c0_i32_1 = arith.constant 0 : i32
    %c0_i32_2 = arith.constant 0 : i32
    return %c0_i32, %c0_i32_0, %c0_i32_1 : i32, i32, i32
  }
  func.func @transform_11(%arg0: i32) -> (i32, i32) {
    %c0_i32 = arith.constant 0 : i32
    %c0_i32_0 = arith.constant 0 : i32
    %c0_i32_1 = arith.constant 0 : i32
    return %c0_i32, %c0_i32_0 : i32, i32
  }
  func.func @transform_12(%arg0: i32) -> (i32, i32, i32) {
    %c0_i32 = arith.constant 0 : i32
    %c0_i32_0 = arith.constant 0 : i32
    %c0_i32_1 = arith.constant 0 : i32
    return %arg0, %c0_i32, %c0_i32_0 : i32, i32, i32
  }
}

</mosaic_0001>

<bundles_post_ra>
// kernel: dqn_forward.1
= control target key start
LH: loop header
LB: loop body
LE: loop exit
PB: predicated region body
PF: predicated region fallthrough
CT: control target
= control target key end

     0   :  { %s9013_s0 = inlined_call_operand.vmem [shape: bf16[2,40,120], index: 0, kind: input, shape index: {}]   ;;  %s9014_s1 = inlined_call_operand.vmem [shape: bf16[5,18,40], index: 1, kind: input, shape index: {}]   ;;  %s9015_s2 = inlined_call_operand.vmem [shape: bf16[5,120,288], index: 2, kind: input, shape index: {}]   ;;  %s9016_s3 = inlined_call_operand.vmem [shape: f32[1,288], index: 3, kind: input, shape index: {}]   ;;  %s9017_s4 = inlined_call_operand.vmem [shape: bf16[5,7,18], index: 4, kind: input, shape index: {}]   ;;  %s9018_s5 = inlined_call_operand.vmem [shape: bf16[5,288,224], index: 5, kind: input, shape index: {}]   ;;  %s9019_s6 = inlined_call_operand.vmem [shape: f32[1,224], index: 6, kind: input, shape index: {}]   ;;  %s9020_s7 = inlined_call_operand.vmem [shape: bf16[5,2,7], index: 7, kind: input, shape index: {}]   ;;  %s9021_s8 = inlined_call_operand.vmem [shape: bf16[5,224,64], index: 8, kind: input, shape index: {}]   ;;  %s9022_s9 = inlined_call_operand.vmem [shape: f32[1,64], index: 9, kind: input, shape index: {}]   ;;  %s9023_s10 = inlined_call_operand.vmem [shape: bf16[2,64,4], index: 10, kind: input, shape index: {}]   ;;  %s9024_s11 = inlined_call_operand.vmem [shape: f32[1,4], index: 11, kind: input, shape index: {}]   ;;  %s9025_s12 = inlined_call_operand.hbm [shape: f32[2,1,4], index: 12, kind: output, shape index: {}]  }
   0x1   :  { %9026 = sst [smem:[#allocation6_spill]] %s9013_s0 }
   0x2   :  { %17 = vsyncpa [#allocation3], 0 }
   0x3   :  { %19 = vsyncpa [#allocation3 + $0x1], 0  ;;  %s7334_s21 = smov 0   ;;  %s7336_s22 = smov 0  }
   0x4   :  { %s7338_s23 = smov 0   ;;  %s7340_s24 = smov 0  }
   0x5 LB: > { %s7355_s25 = sadd.s32 4294967295, %s7262_s24   ;;  %s5426_s26 = sadd.s32 4294967294, %s7262_s24   ;;  %s7262_s24 = sphi %s7340_s24, %s9035_s24   ;;  %s7258_s23 = sphi %s7338_s23, %s9034_s23   ;;  %s7254_s22 = sphi %s7336_s22, %s9033_s22   ;;  %s7250_s21 = sphi %s7334_s21, %s9032_s21  }
   0x6   : > { %s7359_s27 = sadd.s32 1, %s7262_s24   ;;  %s289_s28 = sadd.s32 1, %s7258_s23 }
   0x7   : > { %s286_s29 = ssub.s32 %s7262_s24, %s7359_s27  ;;  %p299_p0 = scmp.ne.s32.totalorder %s7258_s23, %s7254_s22 }
   0x8   : > { %p287_p1 = scmp.eq.s32.totalorder %s286_s29, 0  ;;  %p300_p2 = scmp.eq.s32.totalorder %s7355_s25, 1 }
   0x9   : > { %p305_p3 = scmp.ne.s32.totalorder %s7254_s22, %s7250_s21  ;;  %p306_p4 = scmp.eq.s32.totalorder %s5426_s26, 1 }
   0xa   : > { %s7370_s30 = scalar_select %p287_p1, %s7258_s23, %s289_s28  }
   0xb   : > { %p7372_p5 = por %p300_p2, %p299_p0  ;;  %p7376_p6 = por %p306_p4, %p305_p3 }
   0xc   : > { %9027 = sst [smem:[#allocation5_spill]] %s7370_s30  ;;  %p5429_p7 = scmp.ge.s32.totalorder %s7262_s24, 1 }
   0xd   : > { %p365_p8 = scmp.lt.s32.totalorder %s7262_s24, 3 }
   0xf   : > { %p366_p9 = pnand %p5429_p7, %p365_p8 }
  0x10   : > { %p406_p10 = scmp.lt.s32.totalorder (!%p366_p9), %s7355_s25, 1  ;;  %vm443_vm0 = vcmask (!%p366_p9), 326656   ;;  %v6684_v0 = vld [vmem:[%s9014_s1 + $0xc] sm:$0xff] (!%p366_p9)   ;;  %v6686_v1 = vld [vmem:[%s9014_s1] sm:$0xff] (!%p366_p9)   ;;  %s9030_s0 = sld [smem:[#allocation6_spill]] (!%p366_p9)  ;;  %vm450_vm1 = vcmask (!%p366_p9), 1043456  }
  0x11   : > { %369 = sbr.rel (%p366_p9) target bundleno = 3552 (0xde0), region = 68  ;;  %6413 = vmatprep.mubr.msk.bf16.mxu1 (!%p366_p9), %vm443_vm0, %v6684_v0  ;;  %6403 = vmatprep.mubr.msk.bf16.mxu0 (!%p366_p9), %vm443_vm0, %v6686_v1  ;;  %v6690_v5 = vld [vmem:[%s9015_s2 + $0xb8] ss:$12 sps:$4 sm:$0xff] (!%p366_p9)   ;;  %v6691_v6 = vld [vmem:[%s9015_s2 + $0xbc] ss:$12 sps:$4 sm:$0xff] (!%p366_p9)   ;;  %v7264_v36 = vmov (!%p366_p9), 0  }
  0x12   : > { %v6685_v8 = vld [vmem:[%s9014_s1 + $0x14] ss:$0 sps:$4 sm:$0x11] (!%p366_p9)   ;;  %v6687_v9 = vld [vmem:[%s9014_s1 + $0x8] ss:$0 sps:$4 sm:$0x11] (!%p366_p9)  }
  0x13   : > { %v6688_v10 = vld [vmem:[%s9015_s2 + $0xb4] ss:$12 sps:$4 sm:$0xff] (!%p366_p9)   ;;  %v6694_v11 = vld [vmem:[%s9015_s2 + $0xd0] ss:$12 sps:$4 sm:$0xff] (!%p366_p9)   ;;  %v6692_v13 = vld [vmem:[%s9015_s2 + $0xcc] ss:$12 sps:$4 sm:$0xff] (!%p366_p9)  }
  0x14   : > { %v6695_v12 = vld [vmem:[%s9015_s2 + $0xd4] ss:$12 sps:$4 sm:$0xff] (!%p366_p9)   ;;  %v6699_v15 = vld [vmem:[%s9015_s2 + $0xec] ss:$12 sps:$4 sm:$0xff] (!%p366_p9)   ;;  %v6696_v16 = vld [vmem:[%s9015_s2 + $0xe4] ss:$12 sps:$4 sm:$0xff] (!%p366_p9)  }
  0x15   : > { %v6698_v14 = vld [vmem:[%s9015_s2 + $0xe8] ss:$12 sps:$4 sm:$0xff] (!%p366_p9)   ;;  %v6702_v17 = vld [vmem:[%s9015_s2 + $0x100] ss:$12 sps:$4 sm:$0xff] (!%p366_p9)   ;;  %v6703_v18 = vld [vmem:[%s9015_s2 + $0x104] ss:$12 sps:$4 sm:$0xff] (!%p366_p9)  }
  0x16   : > { %v6700_v19 = vld [vmem:[%s9015_s2 + $0xfc] ss:$12 sps:$4 sm:$0xff] (!%p366_p9)   ;;  %v6706_v20 = vld [vmem:[%s9015_s2 + $0x118] ss:$12 sps:$4 sm:$0xff] (!%p366_p9)   ;;  %v6704_v22 = vld [vmem:[%s9015_s2 + $0x114] ss:$12 sps:$4 sm:$0xff] (!%p366_p9)  }
  0x17   : > { %v6707_v21 = vld [vmem:[%s9015_s2 + $0x11c] ss:$12 sps:$4 sm:$0xff] (!%p366_p9)   ;;  %v6711_v24 = vld [vmem:[%s9015_s2 + $0x134] ss:$12 sps:$4 sm:$0xff] (!%p366_p9)   ;;  %v6708_v25 = vld [vmem:[%s9015_s2 + $0x12c] ss:$12 sps:$4 sm:$0xff] (!%p366_p9)  }
  0x18   : > { %s407_s17 = scalar_select %p406_p10, %s7355_s25, 1  ;;  %v6710_v23 = vld [vmem:[%s9015_s2 + $0x130] ss:$12 sps:$4 sm:$0xff]   ;;  %v6714_v26 = vld [vmem:[%s9015_s2 + $0x148] ss:$12 sps:$4 sm:$0xff]   ;;  %vm753_vm2 = vcmask 982016  }
  0x19   : > { %v6715_v27 = vld [vmem:[%s9015_s2 + $0x14c] ss:$12 sps:$4 sm:$0xff]   ;;  %v6712_v28 = vld [vmem:[%s9015_s2 + $0x144] ss:$12 sps:$4 sm:$0xff]   ;;  %v5473_v29 = vld [vmem:[%s9015_s2 + $0x15c] sm:$0xff]  ;;  %vm7266_vm3 = vmmov 0  }
  0x1a   : > { %s6637_s20 = smul.u32 20, %s407_s17  ;;  %v5497_v30 = vcombine.high %v5473_v29, %v5473_v29  ;;  %v5496_v31 = vcombine.low %v5473_v29, %v5473_v29  ;;  %v6718_v32 = vld [vmem:[%s9015_s2 + $0x164] ss:$0 sps:$4 sm:$0xff]   ;;  %v6722_v37 = vld [vmem:[%s9015_s2 + $0x8] ss:$12 sps:$4 sm:$0xff]   ;;  %vm2174_vm4 = vcmask 1040384  }
  0x1b   : > { %v767_v34 = vsel %vm450_vm1, %v6718_v32, 0  ;;  %v6721_v35 = vld [vmem:[%s9015_s2 + $0x4] ss:$12 sps:$4 sm:$0xff]   ;;  %v6719_v45 = vld [vmem:[%s9015_s2] ss:$12 sps:$4 sm:$0xff]   ;;  %vm2170_vm5 = vcmask 146432  }
  0x1c   : > { %s7395_s29 = scalar_lea.vmem %s9030_s0, %s6637_s20  ;;  %v761_v33 = vsel %vm450_vm1, %v5496_v31, 0  ;;  %v6725_v48 = vld [vmem:[%s9015_s2 + $0x1c] ss:$12 sps:$4 sm:$0xff]   ;;  %v6726_v51 = vld [vmem:[%s9015_s2 + $0x20] ss:$12 sps:$4 sm:$0xff]   ;;  %vm2610_vm6 = vcmask 261120  }
  0x1d   : > { %v6681_v2 = vld [vmem:[%s7395_s29] sm:$0xff]   ;;  %v6682_v3 = vld [vmem:[%s7395_s29 + $0x8] sm:$0xff]   ;;  %v6683_v4 = vld [vmem:[%s7395_s29 + $0x10] ss:$0 sps:$4 sm:$0xff]   ;;  %vm4163_vm7 = vcmask 1042432   ;;  %vm4159_vm8 = vcmask 56320  }
  0x1e   : > { %6407 = vmatprep.subr.bf16.mxu1 %v6681_v2  ;;  %6397 = vmatprep.subr.bf16.mxu0 %v6681_v2  ;;  %v7408_v7 = vsel %vm450_vm1, %v6683_v4, 0  ;;  %v6723_v52 = vld [vmem:[%s9015_s2 + $0x18] ss:$12 sps:$4 sm:$0xff]   ;;  %v6729_v53 = vld [vmem:[%s9015_s2 + $0x34] ss:$12 sps:$4 sm:$0xff]   ;;  %vm4404_vm9 = vcmask 785408  }
  0x1f   : > { %6408 = vmatpush3.bf16.msra.mxu1 %v6681_v2  ;;  %6398 = vmatpush3.bf16.msra.mxu0 %v6681_v2  ;;  %v6730_v54 = vld [vmem:[%s9015_s2 + $0x38] ss:$12 sps:$4 sm:$0xff]   ;;  %v6727_v55 = vld [vmem:[%s9015_s2 + $0x30] ss:$12 sps:$4 sm:$0xff]   ;;  %v6731_v58 = vld [vmem:[%s9015_s2 + $0x48] ss:$12 sps:$4 sm:$0xff]  }
  0x20   : > { %6409 = vmatprep.subr.bf16.mxu1 %v6682_v3  ;;  %6399 = vmatprep.subr.bf16.mxu0 %v6682_v3  ;;  %v6733_v56 = vld [vmem:[%s9015_s2 + $0x4c] ss:$12 sps:$4 sm:$0xff]   ;;  %v6734_v57 = vld [vmem:[%s9015_s2 + $0x50] ss:$12 sps:$4 sm:$0xff]   ;;  %v6738_v60 = vld [vmem:[%s9015_s2 + $0x68] ss:$12 sps:$4 sm:$0xff]  }
  0x21   : > { %v6737_v59 = vld [vmem:[%s9015_s2 + $0x64] ss:$12 sps:$4 sm:$0xff]   ;;  %v6735_v61 = vld [vmem:[%s9015_s2 + $0x60] ss:$12 sps:$4 sm:$0xff]   ;;  %v6741_v62 = vld [vmem:[%s9015_s2 + $0x7c] ss:$12 sps:$4 sm:$0xff]  }
  0x22   : > { %v6742_v63 = vld [vmem:[%s9015_s2 + $0x80] ss:$12 sps:$4 sm:$0xff]   ;;  %v6739_v0 = vld [vmem:[%s9015_s2 + $0x78] ss:$12 sps:$4 sm:$0xff]   ;;  %v6771_v31 = vld [vmem:[%s9015_s2 + $0x1d0] ss:$12 sps:$4 sm:$0xff]  }
  0x23   : > { %6410 = vmatpush3.bf16.msra.mxu1 %v6682_v3  ;;  %6400 = vmatpush3.bf16.msra.mxu0 %v6682_v3  ;;  %v6745_v1 = vld [vmem:[%s9015_s2 + $0x94] ss:$12 sps:$4 sm:$0xff]   ;;  %v6746_v2 = vld [vmem:[%s9015_s2 + $0x98] ss:$12 sps:$4 sm:$0xff]   ;;  %v532_v3 = vld [vmem:[%s9015_s2 + $0xa8] sm:$0xff]  ;;  %vm5244_vm10 = vcmask 523264  }
  0x24   : > { %6628 = vmatprep.subr.msk.bf16.mxu1 %vm450_vm1, %v6683_v4  ;;  %6627 = vmatprep.subr.msk.bf16.mxu0 %vm450_vm1, %v6683_v4  ;;  %v6743_v4 = vld [vmem:[%s9015_s2 + $0x90] ss:$12 sps:$4 sm:$0xff]   ;;  %v6770_v29 = vld [vmem:[%s9015_s2 + $0x1cc] ss:$12 sps:$4 sm:$0xff]   ;;  %s404_s28 = sand.u32 1, %s7254_s22   ;;  %s6294_s17 = sshll.u32 %s7355_s25, 4 }
  0x25   : > { %s405_s18 = scalar_lea.vmem [#allocation2], %s404_s28  ;;  %vm5356_vm11 = vcmask 24576   ;;  %s8971_s0 = scalar_lea.hbm %s9025_s12, %s6294_s17 }
  0x26   : > { %s5371_s19 = sshll.u32 %s405_s18, 4  ;;  %s5359_s25 = scalar_lea.sflag [#allocation3], %s404_s28  ;;  %s8973_s19 = int_to_ptr.vmem [resolvable:$true] %s5371_s19 }
  0x27   : > { %6412 = vmatpush3.bf16.msra.mxu1 %v7408_v7  ;;  %6402 = vmatpush3.bf16.msra.mxu0 %v7408_v7  ;;  %s7200_s30 = scalar_lea.vmem %s8973_s19, 16  ;;  %s7268_s26 = smov [#allocation2]  }
  0x28   : > { %769 = vmatprep.subr.bf16.mxu0 %v6690_v5  ;;  %6417 = vmatprep.subr.bf16.mxu1 %v6691_v6  ;;  %v5526_v5 = vcombine.high %v532_v3, %v532_v3  ;;  %p7201_p11 = scmp.ne.s32.totalorder %s8973_s19, %s7200_s30  ;;  %s7204_s15 = sshll.u32 %s7268_s26, 4  ;;  %s7205_s15 = int_to_ptr.vmem [resolvable:$false] %s7204_s15 }
  0x29   : > { %s7206_s16 = scalar_lea.vmem %s7205_s15, 32  ;;  %p7207_p0 = scmp.lt.s32.totalorder %s8973_s19, %s7205_s15 }
  0x2a   : > { %6414 = vmatmul.mubr.msk.bf16.vlgmr.msra.gmra.mrb[0].mxu1 %vm443_vm0, %v6685_v8  ;;  %6404 = vmatmul.mubr.msk.bf16.vlgmr.msra.gmra.mrb[0].mxu0 %vm443_vm0, %v6687_v9  ;;  %v6749_v8 = vld [vmem:[%s9015_s2 + $0xb0] ss:$0 sps:$4 sm:$0xff]   ;;  %p7202_p12 = pnand %p7201_p11, %p7372_p5  ;;  %p7208_p1 = scmp.lt.s32.totalorder %s7206_s16, %s7200_s30 }
  0x2b   : > { %770 = vmatpush1.bf16.msra.mxu0 %v6688_v10  ;;  %6418 = vmatpush3.bf16.msra.mxu1 %v6691_v6  ;;  %v5525_v6 = vcombine.low %v532_v3, %v532_v3  ;;  %v1001_v10 = vsel %vm450_vm1, %v6749_v8, 0 }
  0x2c   : > { %771 = vmatprep.subr.bf16.mxu0 %v6694_v11  ;;  %6419 = vmatprep.subr.bf16.mxu1 %v6695_v12  ;;  %v6750_v11 = vld [vmem:[%s9014_s1 + $0x18] sm:$0xff]   ;;  %p7203_p13 = pneg %p7202_p12  ;;  %p7209_p2 = por %p7208_p1, %p7207_p0 }
  0x2d   : > { %801 = vmatprep.mubr.bf16.mxu0 %v7264_v36  ;;  %v995_v9 = vsel %vm450_vm1, %v5525_v6, 0 }
  0x2e   : > { %p7210_p3 = pnand %p7209_p2, %p7203_p13 }
  0x2f   : > { %772 = vmatpush1.bf16.msra.mxu0 %v6692_v13  ;;  %6420 = vmatpush3.bf16.msra.mxu1 %v6695_v12  ;;  %v7580_v13 = vld [vmem:[%s7395_s29] sm:$0xff]  }
  0x30   : > { %773 = vmatprep.subr.bf16.mxu0 %v6698_v14  ;;  %6421 = vmatprep.subr.bf16.mxu1 %v6699_v15  ;;  %v7590_v14 = vld [vmem:[%s7395_s29 + $0x8] sm:$0xff]  }
  0x33   : > { %774 = vmatpush1.bf16.msra.mxu0 %v6696_v16  ;;  %6422 = vmatpush3.bf16.msra.mxu1 %v6699_v15  ;;  %v7595_v15 = vld [vmem:[%s7395_s29 + $0x10] ss:$0 sps:$4 sm:$0xff]   ;;  %v6751_v16 = vld [vmem:[%s9014_s1 + $0x20] ss:$0 sps:$4 sm:$0x11]  }
  0x34   : > { %775 = vmatprep.subr.bf16.mxu0 %v6702_v17  ;;  %6423 = vmatprep.subr.bf16.mxu1 %v6703_v18  ;;  %v6752_v17 = vld [vmem:[%s9015_s2 + $0x168] ss:$12 sps:$4 sm:$0xff]  }
  0x37   : > { %776 = vmatpush1.bf16.msra.mxu0 %v6700_v19  ;;  %6424 = vmatpush3.bf16.msra.mxu1 %v6703_v18  ;;  %v6754_v18 = vld [vmem:[%s9015_s2 + $0x16c] ss:$12 sps:$4 sm:$0xff]   ;;  %v6755_v19 = vld [vmem:[%s9015_s2 + $0x170] ss:$12 sps:$4 sm:$0xff]  }
  0x38   : > { %777 = vmatprep.subr.bf16.mxu0 %v6706_v20  ;;  %6425 = vmatprep.subr.bf16.mxu1 %v6707_v21  ;;  %v6758_v20 = vld [vmem:[%s9015_s2 + $0x184] ss:$12 sps:$4 sm:$0xff]  }
  0x3b   : > { %778 = vmatpush1.bf16.msra.mxu0 %v6704_v22  ;;  %6426 = vmatpush3.bf16.msra.mxu1 %v6707_v21  ;;  %v6759_v21 = vld [vmem:[%s9015_s2 + $0x188] ss:$12 sps:$4 sm:$0xff]   ;;  %v6756_v22 = vld [vmem:[%s9015_s2 + $0x180] ss:$12 sps:$4 sm:$0xff]  }
  0x3c   : > { %779 = vmatprep.subr.bf16.mxu0 %v6710_v23  ;;  %6427 = vmatprep.subr.bf16.mxu1 %v6711_v24  ;;  %v6762_v23 = vld [vmem:[%s9015_s2 + $0x19c] ss:$12 sps:$4 sm:$0xff]  }
  0x3f   : > { %780 = vmatpush1.bf16.msra.mxu0 %v6708_v25  ;;  %6428 = vmatpush3.bf16.msra.mxu1 %v6711_v24  ;;  %v6763_v24 = vld [vmem:[%s9015_s2 + $0x1a0] ss:$12 sps:$4 sm:$0xff]   ;;  %v6760_v25 = vld [vmem:[%s9015_s2 + $0x198] ss:$12 sps:$4 sm:$0xff]  }
  0x40   : > { %781 = vmatprep.subr.bf16.mxu0 %v6714_v26  ;;  %6429 = vmatprep.subr.bf16.mxu1 %v6715_v27  ;;  %v6766_v26 = vld [vmem:[%s9015_s2 + $0x1b4] ss:$12 sps:$4 sm:$0xff]  }
  0x43   : > { %782 = vmatpush1.bf16.msra.mxu0 %v6712_v28  ;;  %6430 = vmatpush3.bf16.msra.mxu1 %v6715_v27  ;;  %v6767_v27 = vld [vmem:[%s9015_s2 + $0x1b8] ss:$12 sps:$4 sm:$0xff]   ;;  %v6764_v28 = vld [vmem:[%s9015_s2 + $0x1b0] ss:$12 sps:$4 sm:$0xff]  }
  0x44   : > { %5499 = vmatprep.subr.msk.bf16.mxu0 %vm450_vm1, %v5497_v30  ;;  %6629 = vmatprep.subr.msk.bf16.mxu1 %vm450_vm1, %v6718_v32  ;;  %v6768_v30 = vld [vmem:[%s9015_s2 + $0x1c8] ss:$12 sps:$4 sm:$0xff]   ;;  %v6772_v32 = vld [vmem:[%s9015_s2 + $0x1e0] ss:$12 sps:$4 sm:$0xff]  }
  0x47   : > { %784 = vmatpush1.bf16.msra.mxu0 %v761_v33  ;;  %6432 = vmatpush3.bf16.msra.mxu1 %v767_v34  ;;  %v6774_v33 = vld [vmem:[%s9015_s2 + $0x1e4] ss:$12 sps:$4 sm:$0xff]   ;;  %v6775_v34 = vld [vmem:[%s9015_s2 + $0x1e8] ss:$12 sps:$4 sm:$0xff]  }
  0x48   : > { %1003 = vmatprep.subr.bf16.mxu0 %v6721_v35  ;;  %6437 = vmatprep.subr.bf16.mxu1 %v6722_v37  ;;  %v6778_v35 = vld [vmem:[%s9015_s2 + $0x1fc] ss:$12 sps:$4 sm:$0xff]  }
  0xfd   : > { %v6415_v38 = vpop.f32.mrb[0].mxu1  ;;  %v7495_v39 = vpop.f32.mrb[0].mxu0 }
  0xfe   : > { %v586_v40 = vpop.f32.mrb[1].mxu1  ;;  %v488_v41 = vpop.f32.mrb[1].mxu0  ;;  %v601_v50 = vpack.c.bf16 %v6415_v38, %v6415_v38  ;;  %v503_v12 = vpack.c.bf16 %v7495_v39, %v7495_v39  ;;  %v6779_v38 = vld [vmem:[%s9015_s2 + $0x200] ss:$12 sps:$4 sm:$0xff]   ;;  %v5568_v39 = vld [vmem:[%s9015_s2 + $0x210] sm:$0xff] }
  0xff   : > { %v6416_v42 = vpop.f32.mrb[2].mxu1  ;;  %v6406_v43 = vpop.f32.mrb[2].mxu0 }
 0x100   : > { %v589_v44 = vpop.f32.mrb[3].mxu1  ;;  %v491_v46 = vpop.f32.mrb[3].mxu0  ;;  %v6782_v42 = vld [vmem:[%s9015_s2 + $0x218] ss:$0 sps:$4 sm:$0xff]  }
 0x101   : > { %v600_v47 = vpack.c.bf16 %v589_v44, %v586_v40  ;;  %v7503_v49 = vpack.c.bf16 %v491_v46, %v488_v41  ;;  %v5592_v40 = vcombine.high %v5568_v39, %v5568_v39  ;;  %v5591_v41 = vcombine.low %v5568_v39, %v5568_v39 }
 0x102   : > { %v1334_v44 = vsel %vm450_vm1, %v6782_v42, 0 }
 0x103   : > { %5500 = vmatmul.mubr.msk.bf16.vlgmr.msra.gmra.mrb[4].mxu0 %vm753_vm2, %v600_v47  ;;  %6433 = vmatprep.mubr.msk.bf16.mxu1 %vm753_vm2, %v600_v47  ;;  %v1328_v43 = vsel %vm450_vm1, %v5591_v41, 0 }
 0x104   : > { %1004 = vmatpush1.bf16.msra.mxu0 %v6719_v45  ;;  %6434 = vmatmul.mubr.msk.bf16.vlgmr.msra.gmra.mrb[4].mxu1 %vm753_vm2, %v601_v50  ;;  %v6788_v45 = vld [vmem:[%s9015_s2 + $0x224] ss:$12 sps:$4 sm:$0xff]  }
 0x105   : > { %6438 = vmatpush3.bf16.msra.mxu1 %v6722_v37  ;;  %1005 = vmatprep.subr.bf16.mxu0 %v6725_v48  ;;  %v6776_v37 = vld [vmem:[%s9015_s2 + $0x1f8] ss:$12 sps:$4 sm:$0xff]  }
 0x106   : > { %6439 = vmatprep.subr.bf16.mxu1 %v6726_v51  ;;  %811 = vmatprep.mubr.bf16.mxu0 %v7264_v36 }
 0x107   : > { %6453 = vmatprep.mubr.msk.bf16.mxu1 %vm753_vm2, %v7503_v49 }
 0x108   : > { %1006 = vmatpush1.bf16.msra.mxu0 %v6723_v52 }
 0x109   : > { %6440 = vmatpush3.bf16.msra.mxu1 %v6726_v51  ;;  %1007 = vmatprep.subr.bf16.mxu0 %v6729_v53 }
 0x10a   : > { %6441 = vmatprep.subr.bf16.mxu1 %v6730_v54 }
 0x10b   : > { %5501 = vmatmul.mubr.msk.bf16.gmra.mrb[8].mxu0 %vm753_vm2, %v601_v50 }
 0x10c   : > { %1008 = vmatpush1.bf16.msra.mxu0 %v6727_v55  ;;  %1035 = vmatprep.mubr.bf16.mxu0 %v7264_v36 }
 0x10d   : > { %6442 = vmatpush3.bf16.msra.mxu1 %v6730_v54  ;;  %1009 = vmatprep.subr.bf16.mxu0 %v6733_v56 }
 0x10e   : > { %6443 = vmatprep.subr.bf16.mxu1 %v6734_v57 }
 0x110   : > { %1010 = vmatpush1.bf16.msra.mxu0 %v6731_v58 }
 0x111   : > { %6444 = vmatpush3.bf16.msra.mxu1 %v6734_v57  ;;  %1011 = vmatprep.subr.bf16.mxu0 %v6737_v59 }
 0x112   : > { %6445 = vmatprep.subr.bf16.mxu1 %v6738_v60 }
 0x114   : > { %1012 = vmatpush1.bf16.msra.mxu0 %v6735_v61 }
 0x115   : > { %6446 = vmatpush3.bf16.msra.mxu1 %v6738_v60  ;;  %1013 = vmatprep.subr.bf16.mxu0 %v6741_v62 }
 0x116   : > { %6447 = vmatprep.subr.bf16.mxu1 %v6742_v63 }
 0x118   : > { %1014 = vmatpush1.bf16.msra.mxu0 %v6739_v0 }
 0x119   : > { %6448 = vmatpush3.bf16.msra.mxu1 %v6742_v63  ;;  %1015 = vmatprep.subr.bf16.mxu0 %v6745_v1 }
 0x11a   : > { %6449 = vmatprep.subr.bf16.mxu1 %v6746_v2 }
 0x11c   : > { %1016 = vmatpush1.bf16.msra.mxu0 %v6743_v4 }
 0x11d   : > { %6450 = vmatpush3.bf16.msra.mxu1 %v6746_v2  ;;  %5528 = vmatprep.subr.msk.bf16.mxu0 %vm450_vm1, %v5526_v5 }
 0x11e   : > { %6630 = vmatprep.subr.msk.bf16.mxu1 %vm450_vm1, %v6749_v8 }
 0x120   : > { %1018 = vmatpush1.bf16.msra.mxu0 %v995_v9 }
 0x121   : > { %6452 = vmatpush3.bf16.msra.mxu1 %v1001_v10  ;;  %1336 = vmatprep.subr.bf16.mxu0 %v6754_v18  ;;  %v6792_v10 = vld [vmem:[%s9015_s2 + $0x23c] ss:$12 sps:$4 sm:$0xff]  }
 0x122   : > { %6457 = vmatprep.subr.bf16.mxu1 %v7580_v13  ;;  %v6785_v18 = vld [vmem:[%s9015_s2 + $0x21c] ss:$12 sps:$4 sm:$0xff]  }
 0x123   : > { %5529 = vmatmul.mubr.msk.bf16.vlgmr.msra.gmra.mrb[4].mxu0 %vm753_vm2, %v7503_v49 }
 0x124   : > { %6454 = vmatmul.mubr.msk.bf16.vlgmr.msra.gmra.mrb[8].mxu1 %vm753_vm2, %v503_v12  ;;  %1045 = vmatprep.mubr.bf16.mxu0 %v7264_v36 }
 0x125   : > { %6458 = vmatpush3.bf16.msra.mxu1 %v7580_v13  ;;  %6463 = vmatprep.mubr.msk.bf16.mxu1 %vm443_vm0, %v6750_v11  ;;  %v6796_v11 = vld [vmem:[%s9015_s2 + $0x254] ss:$12 sps:$4 sm:$0xff]  }
 0x126   : > { %6459 = vmatprep.subr.bf16.mxu1 %v7590_v14  ;;  %1337 = vmatpush1.bf16.msra.mxu0 %v6752_v17  ;;  %v6784_v17 = vld [vmem:[%s9014_s1 + $0x2c] ss:$0 sps:$4 sm:$0x11]  }
 0x127   : > { %1338 = vmatprep.subr.bf16.mxu0 %v6758_v20  ;;  %v6789_v20 = vld [vmem:[%s9015_s2 + $0x234] ss:$12 sps:$4 sm:$0xff]  }
 0x129   : > { %6460 = vmatpush3.bf16.msra.mxu1 %v7590_v14 }
 0x12a   : > { %6631 = vmatprep.subr.msk.bf16.mxu1 %vm450_vm1, %v7595_v15  ;;  %1339 = vmatpush1.bf16.msra.mxu0 %v6756_v22  ;;  %v6793_v22 = vld [vmem:[%s9015_s2 + $0x24c] ss:$12 sps:$4 sm:$0xff]  }
 0x12b   : > { %5530 = vmatmul.mubr.msk.bf16.gmra.mrb[12].mxu0 %vm753_vm2, %v503_v12  ;;  %1340 = vmatprep.subr.bf16.mxu0 %v6762_v23  ;;  %v6783_v12 = vld [vmem:[%s9014_s1 + $0x24] sm:$0xff]  }
 0x12c   : > { %1368 = vmatprep.mubr.bf16.mxu0 %v7264_v36  ;;  %v6799_v23 = vld [vmem:[%s9015_s2 + $0x268] ss:$12 sps:$4 sm:$0xff]  }
 0x12d   : > { %6462 = vmatpush3.bf16.msra.mxu1 %v7408_v7 }
 0x12e   : > { %6467 = vmatprep.subr.bf16.mxu1 %v6755_v19  ;;  %1341 = vmatpush1.bf16.msra.mxu0 %v6760_v25  ;;  %v6797_v25 = vld [vmem:[%s9015_s2 + $0x264] ss:$12 sps:$4 sm:$0xff]  }
 0x12f   : > { %1342 = vmatprep.subr.bf16.mxu0 %v6766_v26  ;;  %v6803_v26 = vld [vmem:[%s9015_s2 + $0x280] ss:$12 sps:$4 sm:$0xff]  }
 0x130   : > { %6464 = vmatmul.mubr.msk.bf16.vlgmr.msra.gmra.mrb[12].mxu1 %vm443_vm0, %v6751_v16  ;;  %v6787_v16 = vld [vmem:[%s9015_s2 + $0x220] ss:$12 sps:$4 sm:$0xff]  }
 0x131   : > { %6468 = vmatpush3.bf16.msra.mxu1 %v6755_v19  ;;  %v6791_v19 = vld [vmem:[%s9015_s2 + $0x238] ss:$12 sps:$4 sm:$0xff]  }
 0x132   : > { %6469 = vmatprep.subr.bf16.mxu1 %v6759_v21  ;;  %1343 = vmatpush1.bf16.msra.mxu0 %v6764_v28  ;;  %v6801_v28 = vld [vmem:[%s9015_s2 + $0x27c] ss:$12 sps:$4 sm:$0xff]  }
 0x133   : > { %1344 = vmatprep.subr.bf16.mxu0 %v6770_v29  ;;  %v6807_v29 = vld [vmem:[%s9015_s2 + $0x298] ss:$12 sps:$4 sm:$0xff]  }
 0x135   : > { %6470 = vmatpush3.bf16.msra.mxu1 %v6759_v21  ;;  %v6795_v21 = vld [vmem:[%s9015_s2 + $0x250] ss:$12 sps:$4 sm:$0xff]  }
 0x136   : > { %6471 = vmatprep.subr.bf16.mxu1 %v6763_v24  ;;  %1345 = vmatpush1.bf16.msra.mxu0 %v6768_v30  ;;  %v6808_v30 = vld [vmem:[%s9015_s2 + $0x29c] ss:$12 sps:$4 sm:$0xff]  }
 0x137   : > { %1346 = vmatprep.subr.bf16.mxu0 %v6774_v33  ;;  %v6811_v33 = vld [vmem:[%s9015_s2 + $0x2b0] ss:$12 sps:$4 sm:$0xff]  }
 0x139   : > { %6472 = vmatpush3.bf16.msra.mxu1 %v6763_v24  ;;  %v6800_v24 = vld [vmem:[%s9015_s2 + $0x26c] ss:$12 sps:$4 sm:$0xff]  }
 0x13a   : > { %6473 = vmatprep.subr.bf16.mxu1 %v6767_v27  ;;  %1347 = vmatpush1.bf16.msra.mxu0 %v6772_v32  ;;  %v6809_v32 = vld [vmem:[%s9015_s2 + $0x2ac] ss:$12 sps:$4 sm:$0xff]  }
 0x13b   : > { %1348 = vmatprep.subr.bf16.mxu0 %v6778_v35  ;;  %v5634_v35 = vld [vmem:[%s9015_s2 + $0x2c4] sm:$0xff] }
 0x13c   : > { %v5657_v39 = vcombine.low %v5634_v35, %v5634_v35 }
 0x13d   : > { %6474 = vmatpush3.bf16.msra.mxu1 %v6767_v27  ;;  %v6804_v27 = vld [vmem:[%s9015_s2 + $0x284] ss:$12 sps:$4 sm:$0xff]  }
 0x13e   : > { %6475 = vmatprep.subr.bf16.mxu1 %v6771_v31  ;;  %1349 = vmatpush1.bf16.msra.mxu0 %v6776_v37  ;;  %v5658_v37 = vcombine.high %v5634_v35, %v5634_v35 }
 0x13f   : > { %5594 = vmatprep.subr.msk.bf16.mxu0 %vm450_vm1, %v5592_v40  ;;  %v1670_v40 = vsel %vm450_vm1, %v5657_v39, 0 }
 0x141   : > { %6476 = vmatpush3.bf16.msra.mxu1 %v6771_v31  ;;  %v6805_v31 = vld [vmem:[%s9015_s2 + $0x294] ss:$12 sps:$4 sm:$0xff]  }
 0x142   : > { %6477 = vmatprep.subr.bf16.mxu1 %v6775_v34  ;;  %1351 = vmatpush1.bf16.msra.mxu0 %v1328_v43 }
 0x143   : > { %6487 = vmatprep.subr.bf16.mxu0 %v7580_v13 }
 0x145   : > { %6478 = vmatpush3.bf16.msra.mxu1 %v6775_v34  ;;  %v6812_v34 = vld [vmem:[%s9015_s2 + $0x2b4] ss:$12 sps:$4 sm:$0xff]  }
 0x146   : > { %6479 = vmatprep.subr.bf16.mxu1 %v6779_v38 }
 0x149   : > { %6480 = vmatpush3.bf16.msra.mxu1 %v6779_v38  ;;  %v6814_v38 = vld [vmem:[%s9015_s2 + $0x2cc] ss:$0 sps:$4 sm:$0xff]  }
 0x14a   : > { %6632 = vmatprep.subr.msk.bf16.mxu1 %vm450_vm1, %v6782_v42  ;;  %v1676_v41 = vsel %vm450_vm1, %v6814_v38, 0  ;;  %v6820_v42 = vld [vmem:[%s9015_s2 + $0x2d4] ss:$12 sps:$4 sm:$0xff]  }
 0x14d   : > { %6482 = vmatpush3.bf16.msra.mxu1 %v1334_v44 }
 0x14e   : > { %6497 = vmatprep.subr.bf16.mxu1 %v6788_v45 }
 0x1d7   : > { %v6435_v46 = vpop.f32.mrb[4].mxu1 }
 0x1d8   : > { %v854_v47 = vpop.f32.mrb[5].mxu1 }
 0x1d9   : > { %v6436_v48 = vpop.f32.mrb[6].mxu1 }
 0x1da   : > { %v857_v49 = vpop.f32.mrb[7].mxu1 }
 0x1de   : > { %v813_v50 = vpop.f32.mrb[8].mxu0 }
 0x1df   : > { %v815_v51 = vpop.f32.mrb[9].mxu0 }
 0x1e0   : > { %v817_v52 = vpop.f32.mrb[10].mxu0 }
 0x1e1   : > { %v818_v53 = vpop.f32.mrb[11].mxu0 }
 0x1f7   : > { %v6455_v54 = vpop.f32.mrb[8].mxu1 }
 0x1f8   : > { %v7683_v55 = vadd.f32 %v6455_v54, %v6435_v46  ;;  %v1088_v56 = vpop.f32.mrb[9].mxu1 }
 0x1f9   : > { %v7685_v57 = vadd.f32 %v1088_v56, %v854_v47  ;;  %v6456_v58 = vpop.f32.mrb[10].mxu1 }
 0x1fa   : > { %v1091_v59 = vpop.f32.mrb[11].mxu1 }
 0x1fb   : > { %v7687_v60 = vadd.f32 %v1091_v59, %v857_v49 }
 0x1fe   : > { %v1047_v61 = vpop.f32.mrb[12].mxu0 }
 0x1ff   : > { %v7689_v62 = vadd.f32 %v1047_v61, %v813_v50  ;;  %v1049_v63 = vpop.f32.mrb[13].mxu0 }
 0x200   : > { %v7691_v0 = vadd.f32 %v1049_v63, %v815_v51  ;;  %v1051_v1 = vpop.f32.mrb[14].mxu0 }
 0x201   : > { %v1052_v2 = vpop.f32.mrb[15].mxu0  ;;  %v6822_v1 = vld [vmem:[%s9015_s2 + $0x2e8] ss:$12 sps:$4 sm:$0xff]  }
 0x202   : > { %v6828_v2 = vld [vmem:[%s9015_s2 + $0x304] ss:$12 sps:$4 sm:$0xff]  }
 0x203   : > { %v6465_v3 = vpop.f32.mrb[12].mxu1 }
 0x204   : > { %v1154_v4 = vpop.f32.mrb[13].mxu1  ;;  %v1169_v9 = vpack.c.bf16 %v6465_v3, %v6465_v3  ;;  %v6826_v3 = vld [vmem:[%s9015_s2 + $0x300] ss:$12 sps:$4 sm:$0xff]  }
 0x205   : > { %v6466_v5 = vpop.f32.mrb[14].mxu1 }
 0x206   : > { %v1157_v6 = vpop.f32.mrb[15].mxu1  ;;  %v6830_v5 = vld [vmem:[%s9015_s2 + $0x318] ss:$12 sps:$4 sm:$0xff]  }
 0x207   : > { %v1168_v8 = vpack.c.bf16 %v1157_v6, %v1154_v4  ;;  %v6832_v4 = vld [vmem:[%s9015_s2 + $0x31c] ss:$12 sps:$4 sm:$0xff]  }
 0x208   : > { %v6829_v6 = vld [vmem:[%s9015_s2 + $0x308] ss:$12 sps:$4 sm:$0xff]  }
 0x209   : > { %5595 = vmatmul.mubr.msk.bf16.vlgmr.msra.gmra.mrb[4].mxu0 %vm753_vm2, %v1168_v8  ;;  %6483 = vmatprep.mubr.msk.bf16.mxu1 %vm753_vm2, %v1168_v8  ;;  %v6836_v8 = vld [vmem:[%s9015_s2 + $0x334] ss:$12 sps:$4 sm:$0xff]  }
 0x20a   : > { %6484 = vmatmul.mubr.msk.bf16.vlgmr.msra.gmra.mrb[16].mxu1 %vm753_vm2, %v1169_v9  ;;  %6488 = vmatpush3.bf16.msra.mxu0 %v7580_v13 }
 0x20b   : > { %1378 = vmatprep.mubr.bf16.mxu0 %v7264_v36  ;;  %6489 = vmatprep.subr.bf16.mxu0 %v7590_v14 }
 0x20c   : > { %6498 = vmatpush3.bf16.msra.mxu1 %v6788_v45 }
 0x20d   : > { %6499 = vmatprep.subr.bf16.mxu1 %v6792_v10 }
 0x20e   : > { %6490 = vmatpush3.bf16.msra.mxu0 %v7590_v14 }
 0x20f   : > { %6633 = vmatprep.subr.msk.bf16.mxu0 %vm450_vm1, %v7595_v15 }
 0x210   : > { %6500 = vmatpush3.bf16.msra.mxu1 %v6792_v10  ;;  %v6837_v10 = vld [vmem:[%s9015_s2 + $0x338] ss:$12 sps:$4 sm:$0xff]  }
 0x211   : > { %5596 = vmatmul.mubr.msk.bf16.gmra.mrb[16].mxu0 %vm753_vm2, %v1169_v9  ;;  %6501 = vmatprep.subr.bf16.mxu1 %v6796_v11  ;;  %v6834_v9 = vld [vmem:[%s9015_s2 + $0x330] ss:$12 sps:$4 sm:$0xff]  }
 0x212   : > { %6492 = vmatpush3.bf16.msra.mxu0 %v7408_v7  ;;  %6493 = vmatprep.mubr.msk.bf16.mxu0 %vm443_vm0, %v6783_v12  ;;  %v6840_v12 = vld [vmem:[%s9015_s2 + $0x34c] ss:$12 sps:$4 sm:$0xff]  }
 0x213   : > { %1678 = vmatprep.subr.bf16.mxu0 %v6787_v16  ;;  %v6841_v16 = vld [vmem:[%s9015_s2 + $0x350] ss:$12 sps:$4 sm:$0xff]  }
 0x214   : > { %6502 = vmatpush3.bf16.msra.mxu1 %v6796_v11  ;;  %v6838_v11 = vld [vmem:[%s9015_s2 + $0x348] ss:$12 sps:$4 sm:$0xff]  }
 0x215   : > { %6503 = vmatprep.subr.bf16.mxu1 %v6800_v24 }
 0x218   : > { %6504 = vmatpush3.bf16.msra.mxu1 %v6800_v24 }
 0x219   : > { %6494 = vmatmul.mubr.msk.bf16.vlgmr.msra.gmra.mrb[20].mxu0 %vm443_vm0, %v6784_v17  ;;  %6505 = vmatprep.subr.bf16.mxu1 %v6804_v27  ;;  %v6844_v17 = vld [vmem:[%s9015_s2 + $0x364] ss:$12 sps:$4 sm:$0xff]  }
 0x21a   : > { %1679 = vmatpush1.bf16.msra.mxu0 %v6785_v18  ;;  %1710 = vmatprep.mubr.bf16.mxu0 %v7264_v36  ;;  %v6842_v18 = vld [vmem:[%s9015_s2 + $0x360] ss:$12 sps:$4 sm:$0xff]  }
 0x21b   : > { %1680 = vmatprep.subr.bf16.mxu0 %v6791_v19  ;;  %v6845_v19 = vld [vmem:[%s9015_s2 + $0x368] ss:$12 sps:$4 sm:$0xff]  }
 0x21c   : > { %6506 = vmatpush3.bf16.msra.mxu1 %v6804_v27 }
 0x21d   : > { %6507 = vmatprep.subr.bf16.mxu1 %v6808_v30 }
 0x21e   : > { %1681 = vmatpush1.bf16.msra.mxu0 %v6789_v20  ;;  %v5700_v20 = vld [vmem:[%s9015_s2 + $0x378] sm:$0xff] }
 0x21f   : > { %1682 = vmatprep.subr.bf16.mxu0 %v6795_v21  ;;  %v5724_v21 = vcombine.high %v5700_v20, %v5700_v20 }
 0x220   : > { %6508 = vmatpush3.bf16.msra.mxu1 %v6808_v30 }
 0x221   : > { %6509 = vmatprep.subr.bf16.mxu1 %v6812_v34 }
 0x222   : > { %1683 = vmatpush1.bf16.msra.mxu0 %v6793_v22  ;;  %v5723_v22 = vcombine.low %v5700_v20, %v5700_v20 }
 0x223   : > { %1684 = vmatprep.subr.bf16.mxu0 %v6799_v23  ;;  %v6848_v23 = vld [vmem:[%s9015_s2 + $0x380] ss:$0 sps:$4 sm:$0xff]  }
 0x224   : > { %6510 = vmatpush3.bf16.msra.mxu1 %v6812_v34  ;;  %v2012_v24 = vsel %vm450_vm1, %v5723_v22, 0 }
 0x225   : > { %6634 = vmatprep.subr.msk.bf16.mxu1 %vm450_vm1, %v6814_v38 }
 0x226   : > { %1685 = vmatpush1.bf16.msra.mxu0 %v6797_v25  ;;  %v2018_v25 = vsel %vm450_vm1, %v6848_v23, 0 }
 0x227   : > { %1686 = vmatprep.subr.bf16.mxu0 %v6803_v26 }
 0x228   : > { %6512 = vmatpush3.bf16.msra.mxu1 %v1676_v41 }
 0x229   : > { %6517 = vmatprep.subr.bf16.mxu1 %v7580_v13 }
 0x22a   : > { %1687 = vmatpush1.bf16.msra.mxu0 %v6801_v28 }
 0x22b   : > { %1688 = vmatprep.subr.bf16.mxu0 %v6807_v29 }
 0x22e   : > { %1689 = vmatpush1.bf16.msra.mxu0 %v6805_v31 }
 0x22f   : > { %1690 = vmatprep.subr.bf16.mxu0 %v6811_v33 }
 0x232   : > { %1691 = vmatpush1.bf16.msra.mxu0 %v6809_v32 }
 0x233   : > { %5660 = vmatprep.subr.msk.bf16.mxu0 %vm450_vm1, %v5658_v37 }
 0x236   : > { %1693 = vmatpush1.bf16.msra.mxu0 %v1670_v40 }
 0x237   : > { %2020 = vmatprep.subr.bf16.mxu0 %v6820_v42 }
 0x2dd   : > { %v6485_v43 = vpop.f32.mrb[16].mxu1 }
 0x2de   : > { %v7788_v44 = vadd.f32 %v6485_v43, %v7683_v55  ;;  %v1421_v45 = vpop.f32.mrb[17].mxu1 }
 0x2df   : > { %v7791_v46 = vadd.f32 %v1421_v45, %v7685_v57  ;;  %v6486_v47 = vpop.f32.mrb[18].mxu1 }
 0x2e0   : > { %v1424_v48 = vpop.f32.mrb[19].mxu1  ;;  %v2130_v47 = vlaneseq }
 0x2e1   : > { %v7794_v49 = vadd.f32 %v1424_v48, %v7687_v60  ;;  %v6816_v60 = vld [vmem:[%s9014_s1 + $0x30] sm:$0xff]  }
 0x2e2   : > { %v7906_v48 = vshrl.u32 %v2130_v47, 7  ;;  %v6863_v47 = vld [vmem:[%s9018_s5 + $0x164] ss:$8 sps:$4 sm:$0xff]  }
 0x2e4   : > { %v1380_v50 = vpop.f32.mrb[16].mxu0 }
 0x2e5   : > { %v7797_v51 = vadd.f32 %v1380_v50, %v7689_v62  ;;  %v1382_v52 = vpop.f32.mrb[17].mxu0  ;;  %v6818_v62 = vld [vmem:[%s9015_s2 + $0x2d0] ss:$12 sps:$4 sm:$0xff]   ;;  %v2128_v50 = vld [vmem:[%s9016_s3] sm:$0x7] }
 0x2e6   : > { %v7800_v53 = vadd.f32 %v1382_v52, %v7691_v0  ;;  %v1384_v54 = vpop.f32.mrb[18].mxu0  ;;  %v6824_v0 = vld [vmem:[%s9015_s2 + $0x2ec] ss:$12 sps:$4 sm:$0xff]   ;;  %v2140_v52 = vsub.s32 2, %v7906_v48 }
 0x2e7   : > { %v1385_v55 = vpop.f32.mrb[19].mxu0 }
 0x2ec   : > { %v6495_v56 = vpop.f32.mrb[20].mxu0 }
 0x2ed   : > { %v1496_v58 = vpop.f32.mrb[21].mxu0  ;;  %v1511_v63 = vpack.c.bf16 %v6495_v56, %v6495_v56  ;;  %v2141_v56 = vrot.slane %v2128_v50, %v2140_v52  ;;  %v6866_v52 = vld [vmem:[%s9018_s5 + $0x174] ss:$8 sps:$4 sm:$0xff]  }
 0x2ee   : > { %v6496_v59 = vpop.f32.mrb[22].mxu0 }
 0x2ef   : > { %v1499_v57 = vpop.f32.mrb[23].mxu0 }
 0x2f0   : > { %v1510_v61 = vpack.c.bf16 %v1499_v57, %v1496_v58 }
 0x2f2   : > { %5661 = vmatmul.mubr.msk.bf16.vlgmr.msra.gmra.mrb[4].mxu0 %vm753_vm2, %v1510_v61  ;;  %6513 = vmatprep.mubr.msk.bf16.mxu1 %vm753_vm2, %v1510_v61 }
 0x2f3   : > { %6514 = vmatmul.mubr.msk.bf16.vlgmr.msra.gmra.mrb[20].mxu1 %vm753_vm2, %v1511_v63  ;;  %1720 = vmatprep.mubr.bf16.mxu0 %v7264_v36 }
 0x2f4   : > { %6518 = vmatpush3.bf16.msra.mxu1 %v7580_v13  ;;  %6523 = vmatprep.mubr.msk.bf16.mxu1 %vm443_vm0, %v6816_v60  ;;  %v6821_v13 = vld [vmem:[%s9015_s2 + $0x2d8] ss:$12 sps:$4 sm:$0xff]  }
 0x2f5   : > { %6519 = vmatprep.subr.bf16.mxu1 %v7590_v14  ;;  %2021 = vmatpush1.bf16.msra.mxu0 %v6818_v62 }
 0x2f6   : > { %2022 = vmatprep.subr.bf16.mxu0 %v6824_v0 }
 0x2f8   : > { %6520 = vmatpush3.bf16.msra.mxu1 %v7590_v14  ;;  %v6817_v14 = vld [vmem:[%s9014_s1 + $0x38] ss:$0 sps:$4 sm:$0x11]  }
 0x2f9   : > { %6635 = vmatprep.subr.msk.bf16.mxu1 %vm450_vm1, %v7595_v15  ;;  %2023 = vmatpush1.bf16.msra.mxu0 %v6822_v1  ;;  %v6825_v15 = vld [vmem:[%s9015_s2 + $0x2f0] ss:$12 sps:$4 sm:$0xff]  }
 0x2fa   : > { %5662 = vmatmul.mubr.msk.bf16.gmra.mrb[24].mxu0 %vm753_vm2, %v1511_v63  ;;  %2024 = vmatprep.subr.bf16.mxu0 %v6828_v2 }
 0x2fb   : > { %2052 = vmatprep.mubr.bf16.mxu0 %v7264_v36 }
 0x2fc   : > { %6522 = vmatpush3.bf16.msra.mxu1 %v7408_v7  ;;  %v6833_v7 = vld [vmem:[%s9015_s2 + $0x320] ss:$12 sps:$4 sm:$0xff]  }
 0x2fd   : > { %6527 = vmatprep.subr.bf16.mxu1 %v6821_v13  ;;  %2025 = vmatpush1.bf16.msra.mxu0 %v6826_v3 }
 0x2fe   : > { %2026 = vmatprep.subr.bf16.mxu0 %v6832_v4 }
 0x2ff   : > { %6524 = vmatmul.mubr.msk.bf16.vlgmr.msra.gmra.mrb[24].mxu1 %vm443_vm0, %v6817_v14 }
 0x300   : > { %6528 = vmatpush3.bf16.msra.mxu1 %v6821_v13 }
 0x301   : > { %6529 = vmatprep.subr.bf16.mxu1 %v6825_v15  ;;  %2027 = vmatpush1.bf16.msra.mxu0 %v6830_v5 }
 0x302   : > { %2028 = vmatprep.subr.bf16.mxu0 %v6836_v8 }
 0x304   : > { %6530 = vmatpush3.bf16.msra.mxu1 %v6825_v15 }
 0x305   : > { %6531 = vmatprep.subr.bf16.mxu1 %v6829_v6  ;;  %2029 = vmatpush1.bf16.msra.mxu0 %v6834_v9 }
 0x306   : > { %2030 = vmatprep.subr.bf16.mxu0 %v6840_v12 }
 0x308   : > { %6532 = vmatpush3.bf16.msra.mxu1 %v6829_v6 }
 0x309   : > { %6533 = vmatprep.subr.bf16.mxu1 %v6833_v7  ;;  %2031 = vmatpush1.bf16.msra.mxu0 %v6838_v11 }
 0x30a   : > { %2032 = vmatprep.subr.bf16.mxu0 %v6844_v17 }
 0x30c   : > { %6534 = vmatpush3.bf16.msra.mxu1 %v6833_v7 }
 0x30d   : > { %6535 = vmatprep.subr.bf16.mxu1 %v6837_v10  ;;  %2033 = vmatpush1.bf16.msra.mxu0 %v6842_v18 }
 0x30e   : > { %5726 = vmatprep.subr.msk.bf16.mxu0 %vm450_vm1, %v5724_v21 }
 0x310   : > { %6536 = vmatpush3.bf16.msra.mxu1 %v6837_v10 }
 0x311   : > { %6537 = vmatprep.subr.bf16.mxu1 %v6841_v16  ;;  %2035 = vmatpush1.bf16.msra.mxu0 %v2012_v24 }
 0x314   : > { %6538 = vmatpush3.bf16.msra.mxu1 %v6841_v16 }
 0x315   : > { %6539 = vmatprep.subr.bf16.mxu1 %v6845_v19 }
 0x318   : > { %6540 = vmatpush3.bf16.msra.mxu1 %v6845_v19 }
 0x319   : > { %6636 = vmatprep.subr.msk.bf16.mxu1 %vm450_vm1, %v6848_v23 }
 0x31c   : > { %6542 = vmatpush3.bf16.msra.mxu1 %v2018_v25 }
 0x3c6   : > { %v6515_v26 = vpop.f32.mrb[20].mxu1 }
 0x3c7   : > { %v1785_v27 = vadd.f32 %v6515_v26, %v7788_v44  ;;  %v1763_v28 = vpop.f32.mrb[21].mxu1 }
 0x3c8   : > { %v1779_v29 = vadd.f32 %v1763_v28, %v7791_v46  ;;  %v6516_v30 = vpop.f32.mrb[22].mxu1  ;;  %v7265_v46 = vmov 0.0  }
 0x3c9   : > { %v1766_v31 = vpop.f32.mrb[23].mxu1  ;;  %6547 = vmatprep.subr.bf16.mxu1 %v7265_v46 }
 0x3ca   : > { %v1782_v32 = vadd.f32 %v1766_v31, %v7794_v49  ;;  %v2132_v49 = vsub.s32 0, %v7906_v48 }
 0x3cd   : > { %v1722_v33 = vpop.f32.mrb[24].mxu0 }
 0x3ce   : > { %v1783_v34 = vadd.f32 %v1722_v33, %v7797_v51  ;;  %v1724_v35 = vpop.f32.mrb[25].mxu0  ;;  %v2136_v51 = vsub.s32 1, %v7906_v48 }
 0x3cf   : > { %v1784_v37 = vadd.f32 %v1724_v35, %v7800_v53  ;;  %v1726_v38 = vpop.f32.mrb[26].mxu0  ;;  %v2133_v53 = vrot.slane %v2128_v50, %v2132_v49  ;;  %v2169_v35 = vld [vmem:[%s9017_s4] sm:$0xf] }
 0x3d0   : > { %v1727_v39 = vpop.f32.mrb[27].mxu0  ;;  %v2137_v54 = vrot.slane %v2128_v50, %v2136_v51  ;;  %v5734_v38 = vld [vmem:[%s9017_s4 + $0x4] sm:$0xf]  ;;  %v6861_v50 = vld [vmem:[%s9018_s5 + $0x160] ss:$8 sps:$4 sm:$0xff]  }
 0x3d1   : > { %v6849_v39 = vld [vmem:[%s9018_s5 + $0x120] ss:$8 sps:$4 sm:$0xff]  }
 0x3d2   : > { %v6525_v40 = vpop.f32.mrb[24].mxu1 }
 0x3d3   : > { %v1838_v41 = vpop.f32.mrb[25].mxu1  ;;  %v1853_v45 = vpack.c.bf16 %v6525_v40, %v6525_v40  ;;  %v6854_v40 = vld [vmem:[%s9018_s5 + $0x134] ss:$8 sps:$4 sm:$0xff]  }
 0x3d4   : > { %v6526_v42 = vpop.f32.mrb[26].mxu1 }
 0x3d5   : > { %v1841_v43 = vpop.f32.mrb[27].mxu1  ;;  %v6857_v42 = vld [vmem:[%s9018_s5 + $0x144] ss:$8 sps:$4 sm:$0xff]  }
 0x3d6   : > { %v1852_v44 = vpack.c.bf16 %v1841_v43, %v1838_v41  ;;  %v6852_v41 = vld [vmem:[%s9018_s5 + $0x130] ss:$8 sps:$4 sm:$0xff]   ;;  %v6855_v43 = vld [vmem:[%s9018_s5 + $0x140] ss:$8 sps:$4 sm:$0xff]  }
 0x3d8   : > { %5727 = vmatmul.mubr.msk.bf16.vlgmr.msra.gmra.mrb[4].mxu0 %vm753_vm2, %v1852_v44  ;;  %6543 = vmatprep.mubr.msk.bf16.mxu1 %vm753_vm2, %v1852_v44  ;;  %v6860_v44 = vld [vmem:[%s9018_s5 + $0x154] ss:$8 sps:$4 sm:$0xff]  }
 0x3d9   : > { %6544 = vmatmul.mubr.msk.bf16.vlgmr.msra.gmra.mrb[28].mxu1 %vm753_vm2, %v1853_v45  ;;  %2062 = vmatprep.mubr.bf16.mxu0 %v7264_v36 }
 0x3da   : > { %6551 = vmatprep.mubr.msk.bf16.mxu1 %vm7266_vm3, %v7265_v46 }
 0x3e0   : > { %5728 = vmatmul.mubr.msk.bf16.gmra.mrb[28].mxu0 %vm753_vm2, %v1853_v45  ;;  %v6858_v45 = vld [vmem:[%s9018_s5 + $0x150] ss:$8 sps:$4 sm:$0xff]  }
 0x3e1   : > { %2216 = vmatprep.mubr.bf16.mxu0 %v7264_v36 }
 0x4ab   : > { %v2054_v55 = vpop.f32.mrb[4].mxu0 }
 0x4ac   : > { %v2145_v58 = vadd.f32 %v2133_v53, %v2054_v55  ;;  %v2056_v59 = vpop.f32.mrb[5].mxu0  ;;  %v6545_v57 = vpop.f32.mrb[28].mxu1  ;;  %v6867_v55 = vld [vmem:[%s9018_s5 + $0x180] ss:$8 sps:$4 sm:$0xff]  }
 0x4ad   : > { %v2146_v61 = vadd.f32 %v2137_v54, %v2056_v59  ;;  %v2127_v60 = vadd.f32 %v6545_v57, %v1785_v27  ;;  %v2058_v63 = vpop.f32.mrb[6].mxu0  ;;  %v2105_v62 = vpop.f32.mrb[29].mxu1  ;;  %v6875_v59 = vld [vmem:[%s9018_s5 + $0x1a4] ss:$8 sps:$4 sm:$0xff]   ;;  %v6873_v57 = vld [vmem:[%s9018_s5 + $0x1a0] ss:$8 sps:$4 sm:$0xff]  }
 0x4ae   : > { %v2148_v0 = vadd.f32 %v2133_v53, %v2058_v63  ;;  %v2121_v1 = vadd.f32 %v2105_v62, %v1779_v29  ;;  %v2060_v2 = vpop.f32.mrb[7].mxu0  ;;  %v6546_v13 = vpop.f32.mrb[30].mxu1  ;;  %v2154_v15 = vmax.f32 %v2145_v58, 0.0  ;;  %v6870_v58 = vld [vmem:[%s9018_s5 + $0x190] ss:$8 sps:$4 sm:$0xff]  }
 0x4af   : > { %v2153_v3 = vadd.f32 %v2141_v56, %v2127_v60  ;;  %v2149_v4 = vadd.f32 %v2137_v54, %v2060_v2  ;;  %v2108_v14 = vpop.f32.mrb[31].mxu1  ;;  %v2155_v8 = vmax.f32 %v2146_v61, 0.0  ;;  %v6878_v61 = vld [vmem:[%s9018_s5 + $0x1b4] ss:$8 sps:$4 sm:$0xff]   ;;  %v6876_v60 = vld [vmem:[%s9018_s5 + $0x1b0] ss:$8 sps:$4 sm:$0xff]  }
 0x4b0   : > { %v2157_v5 = vmax.f32 %v2148_v0, 0.0  ;;  %v2147_v6 = vadd.f32 %v2141_v56, %v2121_v1  ;;  %v2124_v7 = vadd.f32 %v2108_v14, %v1782_v32  ;;  %v6881_v63 = vld [vmem:[%s9018_s5 + $0x1c4] ss:$8 sps:$4 sm:$0xff]   ;;  %v6879_v62 = vld [vmem:[%s9018_s5 + $0x1c0] ss:$8 sps:$4 sm:$0xff]  }
 0x4b1   : > { %v2158_v9 = vmax.f32 %v2149_v4, 0.0  ;;  %v2162_v12 = vmax.f32 %v2153_v3, 0.0  ;;  %v6884_v0 = vld [vmem:[%s9018_s5 + $0x1d4] ss:$8 sps:$4 sm:$0xff]   ;;  %v6882_v1 = vld [vmem:[%s9018_s5 + $0x1d0] ss:$8 sps:$4 sm:$0xff]  }
 0x4b2   : > { %v7918_v10 = vpack.c.bf16 %v2157_v5, %v2154_v15  ;;  %v2150_v11 = vadd.f32 %v2141_v56, %v2124_v7  ;;  %v2156_v18 = vmax.f32 %v2147_v6, 0.0  ;;  %v6872_v56 = vld [vmem:[%s9018_s5 + $0x194] ss:$8 sps:$4 sm:$0xff]   ;;  %v6887_v2 = vld [vmem:[%s9018_s5 + $0x1e4] ss:$8 sps:$4 sm:$0xff]  }
 0x4b3   : > { %v7920_v16 = vpack.c.bf16 %v2158_v9, %v2155_v8  ;;  %v2064_v17 = vpop.f32.mrb[28].mxu0  ;;  %v2168_v27 = vpack.c.bf16 %v2162_v12, %v2162_v12  ;;  %v6885_v13 = vld [vmem:[%s9018_s5 + $0x1e0] ss:$8 sps:$4 sm:$0xff]   ;;  %v6890_v3 = vld [vmem:[%s9018_s5 + $0x1f4] ss:$8 sps:$4 sm:$0xff]  }
 0x4b4   : > { %v2159_v19 = vmax.f32 %v2150_v11, 0.0  ;;  %v2125_v20 = vadd.f32 %v2064_v17, %v1783_v34  ;;  %v2066_v21 = vpop.f32.mrb[29].mxu0  ;;  %v6893_v4 = vld [vmem:[%s9018_s5 + $0x224] ss:$8 sps:$4 sm:$0xff]   ;;  %v6888_v14 = vld [vmem:[%s9018_s5 + $0x1f0] ss:$8 sps:$4 sm:$0xff]  }
 0x4b5   : > { %v2126_v22 = vadd.f32 %v2066_v21, %v1784_v37  ;;  %v2068_v23 = vpop.f32.mrb[30].mxu0  ;;  %2184 = vmatprep.subr.bf16.mxu0 %v7920_v16  ;;  %v7929_v32 = vsel %vm2174_vm4, %v2168_v27, 0  ;;  %v6851_v37 = vld [vmem:[%s9018_s5 + $0x124] ss:$8 sps:$4 sm:$0xff]   ;;  %v6891_v15 = vld [vmem:[%s9018_s5 + $0x220] ss:$8 sps:$4 sm:$0xff]  }
 0x4b6   : > { %v7923_v24 = vpack.c.bf16 %v2159_v19, %v2156_v18  ;;  %v2151_v25 = vadd.f32 %v2133_v53, %v2125_v20  ;;  %v2069_v26 = vpop.f32.mrb[31].mxu0  ;;  %2185 = vmatpush1.bf16.msra.mxu0 %v7918_v10  ;;  %v6864_v53 = vld [vmem:[%s9018_s5 + $0x170] ss:$8 sps:$4 sm:$0xff]   ;;  %v6894_v5 = vld [vmem:[%s9018_s5 + $0x200] ss:$8 sps:$4 sm:$0xff]  }
 0x4b7   : > { %v2152_v28 = vadd.f32 %v2137_v54, %v2126_v22  ;;  %v6869_v54 = vld [vmem:[%s9018_s5 + $0x184] ss:$8 sps:$4 sm:$0xff]   ;;  %v6897_v7 = vld [vmem:[%s9018_s5 + $0x230] ss:$8 sps:$4 sm:$0xff]   ;;  %v6899_v8 = vld [vmem:[%s9018_s5 + $0x234] ss:$8 sps:$4 sm:$0xff]  }
 0x4b8   : > { %v2160_v29 = vmax.f32 %v2151_v25, 0.0  ;;  %6548 = vmatpush3.bf16.msra.mxu1 %v7923_v24  ;;  %v6896_v6 = vld [vmem:[%s9018_s5 + $0x204] ss:$8 sps:$4 sm:$0xff]   ;;  %v6902_v9 = vld [vmem:[%s9018_s5 + $0x214] ss:$8 sps:$4 sm:$0xff]  }
 0x4b9   : > { %v2161_v30 = vmax.f32 %v2152_v28, 0.0  ;;  %6549 = vmatprep.subr.bf16.mxu1 %v7265_v46  ;;  %v6905_v11 = vld [vmem:[%s9018_s5 + $0x4] ss:$8 sps:$4 sm:$0xff]   ;;  %v6900_v12 = vld [vmem:[%s9018_s5 + $0x210] ss:$8 sps:$4 sm:$0xff]  }
 0x4ba   : > { %v2166_v31 = vpack.c.bf16 %v2160_v29, %v2160_v29  ;;  %v6911_v17 = vld [vmem:[%s9018_s5 + $0x104] ss:$8 sps:$4 sm:$0xff]   ;;  %v6903_v29 = vld [vmem:[%s9018_s5] ss:$8 sps:$4 sm:$0xff]  }
 0x4bb   : > { %v7931_v33 = vpack.c.bf16 %v2161_v30, %v2161_v30 }
 0x4bc   : > { %v7934_v34 = vsel %vm2174_vm4, %v2166_v31, 0  ;;  %6550 = vmatpush3.bf16.msra.mxu1 %v7929_v32 }
 0x4bd   : > { %5731 = vmatprep.subr.msk.bf16.mxu0 %vm2174_vm4, %v7931_v33  ;;  %6555 = vmatprep.subr.bf16.mxu1 %v7265_v46 }
 0x4be   : > { %2187 = vmatpush1.bf16.msra.mxu0 %v7934_v34 }
 0x4bf   : > { %6552 = vmatmul.mubr.msk.bf16.vlgmr.msra.gmra.mrb[32].mxu1 %vm2170_vm5, %v2169_v35  ;;  %2309 = vmatprep.subr.bf16.mxu0 %v7920_v16 }
 0x4c0   : > { %6556 = vmatpush3.bf16.msra.mxu1 %v7923_v24  ;;  %6559 = vmatprep.mubr.msk.bf16.mxu1 %vm7266_vm3, %v7265_v46 }
 0x4c1   : > { %5732 = vmatmul.mubr.msk.bf16.vlgmr.msra.gmra.mrb[32].mxu0 %vm2170_vm5, %v2169_v35  ;;  %6557 = vmatprep.subr.bf16.mxu1 %v7265_v46  ;;  %v6908_v35 = vld [vmem:[%s9018_s5 + $0x14] ss:$8 sps:$4 sm:$0xff]  }
 0x4c2   : > { %2310 = vmatpush1.bf16.msra.mxu0 %v7918_v10  ;;  %2341 = vmatprep.mubr.bf16.mxu0 %v7264_v36 }
 0x4c3   : > { %5735 = vmatprep.subr.msk.bf16.mxu0 %vm2174_vm4, %v7931_v33 }
 0x4c4   : > { %6558 = vmatpush3.bf16.msra.mxu1 %v7929_v32 }
 0x4c5   : > { %2655 = vmatprep.subr.bf16.mxu1 %v6893_v4  ;;  %v6932_v4 = vld [vmem:[%s9018_s5 + $0x74] ss:$8 sps:$4 sm:$0xff]  }
 0x4c6   : > { %2312 = vmatpush1.bf16.msra.mxu0 %v7934_v34 }
 0x4c7   : > { %6560 = vmatmul.mubr.msk.bf16.vlgmr.msra.gmra.mrb[36].mxu1 %vm2170_vm5, %v5734_v38  ;;  %2614 = vmatprep.subr.bf16.mxu0 %v6851_v37 }
 0x4c8   : > { %2687 = vmatprep.mubr.bf16.mxu1 %v7264_v36  ;;  %2656 = vmatpush1.bf16.msra.mxu1 %v6891_v15  ;;  %v6930_v15 = vld [vmem:[%s9018_s5 + $0x70] ss:$8 sps:$4 sm:$0xff]  }
 0x4c9   : > { %5736 = vmatmul.mubr.msk.bf16.vlgmr.msra.gmra.mrb[36].mxu0 %vm2170_vm5, %v5734_v38  ;;  %2657 = vmatprep.subr.bf16.mxu1 %v6899_v8  ;;  %v6933_v8 = vld [vmem:[%s9018_s5 + $0x80] ss:$8 sps:$4 sm:$0xff]  }
 0x4ca   : > { %2615 = vmatpush1.bf16.msra.mxu0 %v6849_v39 }
 0x4cb   : > { %2616 = vmatprep.subr.bf16.mxu0 %v6854_v40 }
 0x4cc   : > { %2658 = vmatpush1.bf16.msra.mxu1 %v6897_v7  ;;  %v6974_v7 = vld [vmem:[%s9018_s5 + $0x274] ss:$8 sps:$4 sm:$0xff]  }
 0x4cd   : > { %2879 = vmatprep.subr.bf16.mxu1 %v6905_v11  ;;  %v6938_v11 = vld [vmem:[%s9018_s5 + $0x94] ss:$8 sps:$4 sm:$0xff]  }
 0x4ce   : > { %2617 = vmatpush1.bf16.msra.mxu0 %v6852_v41 }
 0x4cf   : > { %2618 = vmatprep.subr.bf16.mxu0 %v6857_v42 }
 0x4d2   : > { %2619 = vmatpush1.bf16.msra.mxu0 %v6855_v43  ;;  %v6906_v43 = vld [vmem:[%s9018_s5 + $0x10] ss:$8 sps:$4 sm:$0xff]  }
 0x4d3   : > { %2620 = vmatprep.subr.bf16.mxu0 %v6860_v44  ;;  %v6909_v44 = vld [vmem:[%s9018_s5 + $0x100] ss:$8 sps:$4 sm:$0xff]  }
 0x4d6   : > { %2621 = vmatpush1.bf16.msra.mxu0 %v6858_v45 }
 0x4d7   : > { %2622 = vmatprep.subr.bf16.mxu0 %v6863_v47  ;;  %v6914_v47 = vld [vmem:[%s9018_s5 + $0x24] ss:$8 sps:$4 sm:$0xff]  }
 0x4da   : > { %2623 = vmatpush1.bf16.msra.mxu0 %v6861_v50  ;;  %v6917_v50 = vld [vmem:[%s9018_s5 + $0x114] ss:$8 sps:$4 sm:$0xff]  }
 0x4db   : > { %2624 = vmatprep.subr.bf16.mxu0 %v6866_v52 }
 0x4de   : > { %2625 = vmatpush1.bf16.msra.mxu0 %v6864_v53  ;;  %v6912_v53 = vld [vmem:[%s9018_s5 + $0x20] ss:$8 sps:$4 sm:$0xff]  }
 0x4df   : > { %2626 = vmatprep.subr.bf16.mxu0 %v6869_v54  ;;  %v6915_v54 = vld [vmem:[%s9018_s5 + $0x110] ss:$8 sps:$4 sm:$0xff]  }
 0x4e2   : > { %2627 = vmatpush1.bf16.msra.mxu0 %v6867_v55  ;;  %v6920_v55 = vld [vmem:[%s9018_s5 + $0x34] ss:$8 sps:$4 sm:$0xff]  }
 0x4e3   : > { %2628 = vmatprep.subr.bf16.mxu0 %v6872_v56  ;;  %v6918_v56 = vld [vmem:[%s9018_s5 + $0x30] ss:$8 sps:$4 sm:$0xff]  }
 0x4e6   : > { %2629 = vmatpush1.bf16.msra.mxu0 %v6870_v58 }
 0x4e7   : > { %2630 = vmatprep.subr.bf16.mxu0 %v6875_v59  ;;  %v6923_v59 = vld [vmem:[%s9018_s5 + $0x44] ss:$8 sps:$4 sm:$0xff]  }
 0x4ea   : > { %2631 = vmatpush1.bf16.msra.mxu0 %v6873_v57  ;;  %v6921_v57 = vld [vmem:[%s9018_s5 + $0x40] ss:$8 sps:$4 sm:$0xff]  }
 0x4eb   : > { %2632 = vmatprep.subr.bf16.mxu0 %v6878_v61  ;;  %v6926_v61 = vld [vmem:[%s9018_s5 + $0x54] ss:$8 sps:$4 sm:$0xff]  }
 0x4ee   : > { %2633 = vmatpush1.bf16.msra.mxu0 %v6876_v60  ;;  %v6965_v60 = vld [vmem:[%s9018_s5 + $0x244] ss:$8 sps:$4 sm:$0xff]  }
 0x4ef   : > { %2634 = vmatprep.subr.bf16.mxu0 %v6881_v63  ;;  %v6924_v63 = vld [vmem:[%s9018_s5 + $0x50] ss:$8 sps:$4 sm:$0xff]  }
 0x4f2   : > { %2635 = vmatpush1.bf16.msra.mxu0 %v6879_v62  ;;  %v8136_v62 = vld [vmem:[%s9017_s4 + $0x8] sm:$0xf] }
 0x4f3   : > { %2636 = vmatprep.subr.bf16.mxu0 %v6884_v0  ;;  %v6963_v0 = vld [vmem:[%s9018_s5 + $0x240] ss:$8 sps:$4 sm:$0xff]  }
 0x4f6   : > { %2637 = vmatpush1.bf16.msra.mxu0 %v6882_v1  ;;  %v6929_v1 = vld [vmem:[%s9018_s5 + $0x64] ss:$8 sps:$4 sm:$0xff]  }
 0x4f7   : > { %2638 = vmatprep.subr.bf16.mxu0 %v6887_v2  ;;  %v6968_v2 = vld [vmem:[%s9018_s5 + $0x254] ss:$8 sps:$4 sm:$0xff]  }
 0x4fa   : > { %2639 = vmatpush1.bf16.msra.mxu0 %v6885_v13  ;;  %v6927_v13 = vld [vmem:[%s9018_s5 + $0x60] ss:$8 sps:$4 sm:$0xff]  }
 0x4fb   : > { %2640 = vmatprep.subr.bf16.mxu0 %v6890_v3  ;;  %v6966_v3 = vld [vmem:[%s9018_s5 + $0x250] ss:$8 sps:$4 sm:$0xff]  }
 0x4fe   : > { %2641 = vmatpush1.bf16.msra.mxu0 %v6888_v14  ;;  %v6971_v14 = vld [vmem:[%s9018_s5 + $0x264] ss:$8 sps:$4 sm:$0xff]  }
 0x4ff   : > { %2642 = vmatprep.subr.bf16.mxu0 %v6896_v6  ;;  %v6935_v6 = vld [vmem:[%s9018_s5 + $0x84] ss:$8 sps:$4 sm:$0xff]  }
 0x502   : > { %2643 = vmatpush1.bf16.msra.mxu0 %v6894_v5  ;;  %v6969_v5 = vld [vmem:[%s9018_s5 + $0x260] ss:$8 sps:$4 sm:$0xff]  }
 0x503   : > { %2644 = vmatprep.subr.bf16.mxu0 %v6902_v9  ;;  %v6972_v9 = vld [vmem:[%s9018_s5 + $0x270] ss:$8 sps:$4 sm:$0xff]  }
 0x506   : > { %2645 = vmatpush1.bf16.msra.mxu0 %v6900_v12  ;;  %v6977_v12 = vld [vmem:[%s9018_s5 + $0x284] ss:$8 sps:$4 sm:$0xff]  }
 0x507   : > { %2920 = vmatprep.subr.bf16.mxu0 %v6911_v17  ;;  %v6936_v17 = vld [vmem:[%s9018_s5 + $0x90] ss:$8 sps:$4 sm:$0xff]  }
 0x592   : > { %v2259_v18 = vpop.f32.mrb[32].mxu1 }
 0x593   : > { %v6553_v19 = vpop.f32.mrb[33].mxu1  ;;  %v2267_v58 = vpack.c.bf16 %v2259_v18, %v2259_v18  ;;  %v6975_v18 = vld [vmem:[%s9018_s5 + $0x280] ss:$8 sps:$4 sm:$0xff]  }
 0x594   : > { %v2262_v20 = vpop.f32.mrb[34].mxu1  ;;  %v8077_v21 = vpop.f32.mrb[32].mxu0  ;;  %v6941_v19 = vld [vmem:[%s9018_s5 + $0xa4] ss:$8 sps:$4 sm:$0xff]  }
 0x595   : > { %v6554_v22 = vpop.f32.mrb[35].mxu1  ;;  %v2220_v23 = vpop.f32.mrb[33].mxu0  ;;  %v6980_v20 = vld [vmem:[%s9018_s5 + $0x294] ss:$8 sps:$4 sm:$0xff]  }
 0x596   : > { %v2222_v25 = vpop.f32.mrb[34].mxu0  ;;  %v2266_v27 = vpack.c.bf16 %v2220_v23, %v2220_v23  ;;  %v6939_v22 = vld [vmem:[%s9018_s5 + $0xa0] ss:$8 sps:$4 sm:$0xff]   ;;  %v6978_v23 = vld [vmem:[%s9018_s5 + $0x290] ss:$8 sps:$4 sm:$0xff]  }
 0x597   : > { %v2223_v26 = vpop.f32.mrb[35].mxu0  ;;  %v6944_v25 = vld [vmem:[%s9018_s5 + $0xb4] ss:$8 sps:$4 sm:$0xff]  }
 0x598   : > { %v6983_v26 = vld [vmem:[%s9018_s5 + $0x2a4] ss:$8 sps:$4 sm:$0xff]  }
 0x59a   : > { %v2384_v28 = vpop.f32.mrb[36].mxu1 }
 0x59b   : > { %v2392_v30 = vpack.c.bf16 %v2384_v28, %v2384_v28  ;;  %v6561_v31 = vpop.f32.mrb[37].mxu1  ;;  %v6981_v28 = vld [vmem:[%s9018_s5 + $0x2a0] ss:$8 sps:$4 sm:$0xff]  }
 0x59c   : > { %v2343_v37 = vpop.f32.mrb[36].mxu0  ;;  %v2387_v38 = vpop.f32.mrb[38].mxu1  ;;  %v6945_v31 = vld [vmem:[%s9018_s5 + $0xc0] ss:$8 sps:$4 sm:$0xff]  }
 0x59d   : > { %v2390_v39 = vpack.c.bf16 %v2343_v37, %v2343_v37  ;;  %v2345_v40 = vpop.f32.mrb[37].mxu0  ;;  %v6562_v41 = vpop.f32.mrb[39].mxu1  ;;  %5810 = vmatmul.mubr.msk.bf16.vlgmr.msra.gmra.mrb[40].mxu1 %vm2610_vm6, %v2392_v30  ;;  %v6986_v30 = vld [vmem:[%s9018_s5 + $0x2b4] ss:$8 sps:$4 sm:$0xff]   ;;  %v6989_v38 = vld [vmem:[%s9018_s5 + $0x2c4] ss:$8 sps:$4 sm:$0xff]  }
 0x59e   : > { %v2391_v42 = vpack.c.bf16 %v2345_v40, %v2345_v40  ;;  %2880 = vmatpush1.bf16.msra.mxu1 %v6903_v29  ;;  %2911 = vmatprep.mubr.bf16.mxu1 %v2266_v27  ;;  %v2347_v45 = vpop.f32.mrb[38].mxu0  ;;  %v6942_v27 = vld [vmem:[%s9018_s5 + $0xb0] ss:$8 sps:$4 sm:$0xff]   ;;  %v6947_v29 = vld [vmem:[%s9018_s5 + $0xc4] ss:$8 sps:$4 sm:$0xff]  }
 0x59f   : > { %2881 = vmatprep.subr.bf16.mxu1 %v6908_v35  ;;  %v2348_v52 = vpop.f32.mrb[39].mxu0  ;;  %v6984_v35 = vld [vmem:[%s9018_s5 + $0x2b0] ss:$8 sps:$4 sm:$0xff]   ;;  %v6950_v37 = vld [vmem:[%s9018_s5 + $0xd4] ss:$8 sps:$4 sm:$0xff]  }
 0x5a0   : > { %2646 = vmatprep.mubr.bf16.mxu0 %v2391_v42  ;;  %v6987_v40 = vld [vmem:[%s9018_s5 + $0x2c0] ss:$8 sps:$4 sm:$0xff]   ;;  %v6953_v41 = vld [vmem:[%s9018_s5 + $0xe4] ss:$8 sps:$4 sm:$0xff]   ;;  %v6992_v42 = vld [vmem:[%s9018_s5 + $0x2d4] ss:$8 sps:$4 sm:$0xff]  }
 0x5a1   : > { %2647 = vmatmul.mubr.bf16.vlgmr.msra.gmra.mrb[40].mxu0 %v2390_v39  ;;  %v6948_v39 = vld [vmem:[%s9018_s5 + $0xd0] ss:$8 sps:$4 sm:$0xff]   ;;  %v6956_v45 = vld [vmem:[%s9018_s5 + $0xf4] ss:$8 sps:$4 sm:$0xff]   ;;  %v6959_v52 = vld [vmem:[%s9018_s5 + $0x344] ss:$8 sps:$4 sm:$0xff]  }
 0x5a2   : > { %2882 = vmatpush1.bf16.msra.mxu1 %v6906_v43  ;;  %2921 = vmatpush1.bf16.msra.mxu0 %v6909_v44  ;;  %v6951_v43 = vld [vmem:[%s9018_s5 + $0xe0] ss:$8 sps:$4 sm:$0xff]   ;;  %v6990_v44 = vld [vmem:[%s9018_s5 + $0x2d0] ss:$8 sps:$4 sm:$0xff]  }
 0x5a3   : > { %2883 = vmatprep.subr.bf16.mxu1 %v6914_v47  ;;  %2922 = vmatprep.subr.bf16.mxu0 %v6917_v50  ;;  %v6954_v47 = vld [vmem:[%s9018_s5 + $0xf0] ss:$8 sps:$4 sm:$0xff]   ;;  %v2265_v50 = vpack.c.bf16 %v8077_v21, %v8077_v21  ;;  %v6957_v21 = vld [vmem:[%s9018_s5 + $0x340] ss:$8 sps:$4 sm:$0xff]  }
 0x5a4   : > { %2952 = vmatprep.mubr.bf16.mxu0 %v7264_v36 }
 0x5a6   : > { %2884 = vmatpush1.bf16.msra.mxu1 %v6912_v53  ;;  %2923 = vmatpush1.bf16.msra.mxu0 %v6915_v54  ;;  %v6962_v53 = vld [vmem:[%s9018_s5 + $0x354] ss:$8 sps:$4 sm:$0xff]   ;;  %v6960_v54 = vld [vmem:[%s9018_s5 + $0x350] ss:$8 sps:$4 sm:$0xff]  }
 0x5a7   : > { %2966 = vmatprep.subr.bf16.mxu0 %v7920_v16  ;;  %2885 = vmatprep.subr.bf16.mxu1 %v6920_v55  ;;  %v6995_v55 = vld [vmem:[%s9018_s5 + $0x2e4] ss:$8 sps:$4 sm:$0xff]  }
 0x5a9   : > { %5847 = vmatmul.mubr.msk.bf16.vlgmr.msra.gmra.mrb[44].mxu0 %vm2610_vm6, %v2267_v58  ;;  %v6998_v58 = vld [vmem:[%s9018_s5 + $0x2f4] ss:$8 sps:$4 sm:$0xff]  }
 0x5aa   : > { %2886 = vmatpush1.bf16.msra.mxu1 %v6918_v56  ;;  %2967 = vmatpush1.bf16.msra.mxu0 %v7918_v10  ;;  %v6993_v56 = vld [vmem:[%s9018_s5 + $0x2e0] ss:$8 sps:$4 sm:$0xff]  }
 0x5ab   : > { %5849 = vmatprep.subr.msk.bf16.mxu0 %vm2174_vm4, %v7931_v33  ;;  %2887 = vmatprep.subr.bf16.mxu1 %v6923_v59  ;;  %v6996_v59 = vld [vmem:[%s9018_s5 + $0x2f0] ss:$8 sps:$4 sm:$0xff]  }
 0x5ac   : > { %2998 = vmatprep.mubr.bf16.mxu0 %v7264_v36 }
 0x5ae   : > { %2888 = vmatpush1.bf16.msra.mxu1 %v6921_v57  ;;  %2969 = vmatpush1.bf16.msra.mxu0 %v7934_v34  ;;  %v6999_v57 = vld [vmem:[%s9018_s5 + $0x300] ss:$8 sps:$4 sm:$0xff]  }
 0x5af   : > { %2889 = vmatprep.subr.bf16.mxu1 %v6926_v61  ;;  %3270 = vmatprep.subr.bf16.mxu0 %v6965_v60  ;;  %v7001_v61 = vld [vmem:[%s9018_s5 + $0x304] ss:$8 sps:$4 sm:$0xff]   ;;  %v7004_v60 = vld [vmem:[%s9018_s5 + $0x314] ss:$8 sps:$4 sm:$0xff]  }
 0x5b1   : > { %5850 = vmatmul.mubr.msk.bf16.vlgmr.msra.gmra.mrb[48].mxu0 %vm2170_vm5, %v8136_v62 }
 0x5b2   : > { %2890 = vmatpush1.bf16.msra.mxu1 %v6924_v63  ;;  %3271 = vmatpush1.bf16.msra.mxu0 %v6963_v0  ;;  %v7002_v63 = vld [vmem:[%s9018_s5 + $0x310] ss:$8 sps:$4 sm:$0xff]   ;;  %v7007_v0 = vld [vmem:[%s9018_s5 + $0x324] ss:$8 sps:$4 sm:$0xff]  }
 0x5b3   : > { %2891 = vmatprep.subr.bf16.mxu1 %v6929_v1  ;;  %3272 = vmatprep.subr.bf16.mxu0 %v6968_v2  ;;  %v7010_v1 = vld [vmem:[%s9018_s5 + $0x334] ss:$8 sps:$4 sm:$0xff]   ;;  %v7008_v2 = vld [vmem:[%s9018_s5 + $0x330] ss:$8 sps:$4 sm:$0xff]  }
 0x5b6   : > { %2892 = vmatpush1.bf16.msra.mxu1 %v6927_v13  ;;  %3273 = vmatpush1.bf16.msra.mxu0 %v6966_v3  ;;  %v7013_v13 = vld [vmem:[%s9018_s5 + $0x464] ss:$8 sps:$4 sm:$0xff]  }
 0x5b7   : > { %2893 = vmatprep.subr.bf16.mxu1 %v6932_v4  ;;  %3274 = vmatprep.subr.bf16.mxu0 %v6971_v14 }
 0x5ba   : > { %2894 = vmatpush1.bf16.msra.mxu1 %v6930_v15  ;;  %3275 = vmatpush1.bf16.msra.mxu0 %v6969_v5 }
 0x5bb   : > { %2895 = vmatprep.subr.bf16.mxu1 %v6935_v6  ;;  %3276 = vmatprep.subr.bf16.mxu0 %v6974_v7 }
 0x5be   : > { %2896 = vmatpush1.bf16.msra.mxu1 %v6933_v8  ;;  %3277 = vmatpush1.bf16.msra.mxu0 %v6972_v9 }
 0x5bf   : > { %2897 = vmatprep.subr.bf16.mxu1 %v6938_v11  ;;  %3278 = vmatprep.subr.bf16.mxu0 %v6977_v12 }
 0x5c2   : > { %2898 = vmatpush1.bf16.msra.mxu1 %v6936_v17  ;;  %3279 = vmatpush1.bf16.msra.mxu0 %v6975_v18 }
 0x5c3   : > { %2899 = vmatprep.subr.bf16.mxu1 %v6941_v19  ;;  %3280 = vmatprep.subr.bf16.mxu0 %v6980_v20 }
 0x5c6   : > { %2900 = vmatpush1.bf16.msra.mxu1 %v6939_v22  ;;  %3281 = vmatpush1.bf16.msra.mxu0 %v6978_v23 }
 0x5c7   : > { %2901 = vmatprep.subr.bf16.mxu1 %v6944_v25  ;;  %3282 = vmatprep.subr.bf16.mxu0 %v6983_v26  ;;  %v7011_v26 = vld [vmem:[%s9018_s5 + $0x460] ss:$8 sps:$4 sm:$0xff]  }
 0x5ca   : > { %2902 = vmatpush1.bf16.msra.mxu1 %v6942_v27  ;;  %3283 = vmatpush1.bf16.msra.mxu0 %v6981_v28  ;;  %v7016_v28 = vld [vmem:[%s9018_s5 + $0x474] ss:$8 sps:$4 sm:$0xff]  }
 0x5cb   : > { %2903 = vmatprep.subr.bf16.mxu1 %v6947_v29  ;;  %3284 = vmatprep.subr.bf16.mxu0 %v6986_v30  ;;  %v7014_v30 = vld [vmem:[%s9018_s5 + $0x470] ss:$8 sps:$4 sm:$0xff]  }
 0x5ce   : > { %2904 = vmatpush1.bf16.msra.mxu1 %v6945_v31  ;;  %3285 = vmatpush1.bf16.msra.mxu0 %v6984_v35 }
 0x5cf   : > { %2905 = vmatprep.subr.bf16.mxu1 %v6950_v37  ;;  %3286 = vmatprep.subr.bf16.mxu0 %v6989_v38 }
 0x5d2   : > { %2906 = vmatpush1.bf16.msra.mxu1 %v6948_v39  ;;  %3287 = vmatpush1.bf16.msra.mxu0 %v6987_v40 }
 0x5d3   : > { %2907 = vmatprep.subr.bf16.mxu1 %v6953_v41  ;;  %3288 = vmatprep.subr.bf16.mxu0 %v6992_v42 }
 0x5d6   : > { %2908 = vmatpush1.bf16.msra.mxu1 %v6951_v43  ;;  %3289 = vmatpush1.bf16.msra.mxu0 %v6990_v44 }
 0x5d7   : > { %2909 = vmatprep.subr.bf16.mxu1 %v6956_v45  ;;  %3290 = vmatprep.subr.bf16.mxu0 %v6995_v55  ;;  %v7025_v55 = vld [vmem:[%s9018_s5 + $0x384] ss:$8 sps:$4 sm:$0xff]  }
 0x5da   : > { %2910 = vmatpush1.bf16.msra.mxu1 %v6954_v47  ;;  %3291 = vmatpush1.bf16.msra.mxu0 %v6993_v56  ;;  %v7023_v56 = vld [vmem:[%s9018_s5 + $0x380] ss:$8 sps:$4 sm:$0xff]  }
 0x5db   : > { %6563 = vmatprep.subr.bf16.mxu1 %v7265_v46  ;;  %3292 = vmatprep.subr.bf16.mxu0 %v6998_v58  ;;  %v7028_v58 = vld [vmem:[%s9018_s5 + $0x394] ss:$8 sps:$4 sm:$0xff]  }
 0x5dd   : > { %2912 = vmatmul.mubr.bf16.vlgmr.msra.gmra.mrb[44].mxu1 %v2265_v50 }
 0x5de   : > { %6564 = vmatpush3.bf16.msra.mxu1 %v7923_v24  ;;  %6567 = vmatprep.mubr.msk.bf16.mxu1 %vm7266_vm3, %v7265_v46 }
 0x5df   : > { %6565 = vmatprep.subr.bf16.mxu1 %v7265_v46  ;;  %3293 = vmatpush1.bf16.msra.mxu0 %v6996_v59  ;;  %v7026_v59 = vld [vmem:[%s9018_s5 + $0x390] ss:$8 sps:$4 sm:$0xff]  }
 0x5e0   : > { %3294 = vmatprep.subr.bf16.mxu0 %v7001_v61  ;;  %v7029_v61 = vld [vmem:[%s9018_s5 + $0x3a0] ss:$8 sps:$4 sm:$0xff]  }
 0x5e2   : > { %6566 = vmatpush3.bf16.msra.mxu1 %v7929_v32 }
 0x5e3   : > { %3311 = vmatprep.subr.bf16.mxu1 %v6959_v52  ;;  %3295 = vmatpush1.bf16.msra.mxu0 %v6999_v57  ;;  %v7019_v52 = vld [vmem:[%s9018_s5 + $0x364] ss:$8 sps:$4 sm:$0xff]  }
 0x5e4   : > { %3296 = vmatprep.subr.bf16.mxu0 %v7004_v60  ;;  %v7031_v57 = vld [vmem:[%s9018_s5 + $0x3a4] ss:$8 sps:$4 sm:$0xff]   ;;  %v7034_v60 = vld [vmem:[%s9018_s5 + $0x3b4] ss:$8 sps:$4 sm:$0xff]  }
 0x5e5   : > { %6568 = vmatmul.mubr.msk.bf16.vlgmr.msra.gmra.mrb[48].mxu1 %vm2170_vm5, %v8136_v62  ;;  %v7005_v62 = vld [vmem:[%s9018_s5 + $0x320] ss:$8 sps:$4 sm:$0xff]  }
 0x5e6   : > { %3312 = vmatpush1.bf16.msra.mxu1 %v6957_v21  ;;  %3343 = vmatprep.mubr.bf16.mxu1 %v7264_v36  ;;  %v7017_v21 = vld [vmem:[%s9018_s5 + $0x360] ss:$8 sps:$4 sm:$0xff]  }
 0x5e7   : > { %3313 = vmatprep.subr.bf16.mxu1 %v6962_v53  ;;  %3297 = vmatpush1.bf16.msra.mxu0 %v7002_v63  ;;  %v7022_v53 = vld [vmem:[%s9018_s5 + $0x374] ss:$8 sps:$4 sm:$0xff]   ;;  %v7032_v63 = vld [vmem:[%s9018_s5 + $0x3b0] ss:$8 sps:$4 sm:$0xff]  }
 0x5e8   : > { %3298 = vmatprep.subr.bf16.mxu0 %v7007_v0  ;;  %v7035_v0 = vld [vmem:[%s9018_s5 + $0x3c0] ss:$8 sps:$4 sm:$0xff]  }
 0x5ea   : > { %3314 = vmatpush1.bf16.msra.mxu1 %v6960_v54  ;;  %v7020_v54 = vld [vmem:[%s9018_s5 + $0x370] ss:$8 sps:$4 sm:$0xff]  }
 0x5eb   : > { %3359 = vmatprep.subr.bf16.mxu1 %v7920_v16  ;;  %3299 = vmatpush1.bf16.msra.mxu0 %v7005_v62  ;;  %v7037_v62 = vld [vmem:[%s9018_s5 + $0x3c4] ss:$8 sps:$4 sm:$0xff]  }
 0x5ec   : > { %3300 = vmatprep.subr.bf16.mxu0 %v7010_v1  ;;  %v7040_v1 = vld [vmem:[%s9018_s5 + $0x3d4] ss:$8 sps:$4 sm:$0xff]  }
 0x5ef   : > { %3301 = vmatpush1.bf16.msra.mxu0 %v7008_v2  ;;  %v7038_v2 = vld [vmem:[%s9018_s5 + $0x3d0] ss:$8 sps:$4 sm:$0xff]  }
 0x5f0   : > { %3704 = vmatprep.subr.bf16.mxu0 %v7013_v13  ;;  %v7043_v13 = vld [vmem:[%s9018_s5 + $0x3e4] ss:$8 sps:$4 sm:$0xff]  }
 0x670   : > { %v2689_v3 = vpop.f32.mrb[40].mxu1 }
 0x671   : > { %v2691_v4 = vpop.f32.mrb[41].mxu1 }
 0x672   : > { %v2693_v14 = vpop.f32.mrb[42].mxu1 }
 0x673   : > { %v2694_v15 = vpop.f32.mrb[43].mxu1  ;;  %v7044_v14 = vld [vmem:[%s9018_s5 + $0x3f0] ss:$8 sps:$4 sm:$0xff]  }
 0x674   : > { %v2648_v5 = vpop.f32.mrb[40].mxu0  ;;  %v7049_v15 = vld [vmem:[%s9018_s5 + $0x404] ss:$8 sps:$4 sm:$0xff]  }
 0x675   : > { %v2690_v6 = vadd.f32 %v2689_v3, %v2648_v5  ;;  %v2650_v7 = vpop.f32.mrb[41].mxu0  ;;  %v7041_v3 = vld [vmem:[%s9018_s5 + $0x3e0] ss:$8 sps:$4 sm:$0xff]  }
 0x676   : > { %v2692_v8 = vadd.f32 %v2691_v4, %v2650_v7  ;;  %v2652_v9 = vpop.f32.mrb[42].mxu0  ;;  %v7046_v4 = vld [vmem:[%s9018_s5 + $0x3f4] ss:$8 sps:$4 sm:$0xff]   ;;  %v7047_v5 = vld [vmem:[%s9018_s5 + $0x400] ss:$8 sps:$4 sm:$0xff]  }
 0x677   : > { %v2653_v11 = vpop.f32.mrb[43].mxu0  ;;  %v7050_v7 = vld [vmem:[%s9018_s5 + $0x410] ss:$8 sps:$4 sm:$0xff]   ;;  %v7053_v9 = vld [vmem:[%s9018_s5 + $0x420] ss:$8 sps:$4 sm:$0xff]  }
 0x678   : > { %v7058_v11 = vld [vmem:[%s9018_s5 + $0x434] ss:$8 sps:$4 sm:$0xff]  }
 0x67c   : > { %v2954_v12 = vpop.f32.mrb[44].mxu0 }
 0x67d   : > { %v2956_v17 = vpop.f32.mrb[45].mxu0 }
 0x67e   : > { %v2958_v18 = vpop.f32.mrb[46].mxu0 }
 0x67f   : > { %v2959_v19 = vpop.f32.mrb[47].mxu0  ;;  %v7061_v18 = vld [vmem:[%s9018_s5 + $0x444] ss:$8 sps:$4 sm:$0xff]  }
 0x680   : > { %v7064_v19 = vld [vmem:[%s9018_s5 + $0x454] ss:$8 sps:$4 sm:$0xff]  }
 0x684   : > { %v3000_v20 = vpop.f32.mrb[48].mxu0 }
 0x685   : > { %v3047_v22 = vpack.c.bf16 %v3000_v20, %v3000_v20  ;;  %v3002_v23 = vpop.f32.mrb[49].mxu0  ;;  %v7062_v20 = vld [vmem:[%s9018_s5 + $0x450] ss:$8 sps:$4 sm:$0xff]  }
 0x686   : > { %v3048_v25 = vpack.c.bf16 %v3002_v23, %v3002_v23  ;;  %v3004_v27 = vpop.f32.mrb[50].mxu0 }
 0x687   : > { %v3005_v29 = vpop.f32.mrb[51].mxu0 }
 0x688   : > { %3302 = vmatprep.mubr.bf16.mxu0 %v3048_v25 }
 0x689   : > { %3303 = vmatmul.mubr.bf16.vlgmr.msra.gmra.mrb[52].mxu0 %v3047_v22 }
 0x68a   : > { %3705 = vmatpush1.bf16.msra.mxu0 %v7011_v26  ;;  %3736 = vmatprep.mubr.bf16.mxu0 %v7264_v36 }
 0x68b   : > { %3706 = vmatprep.subr.bf16.mxu0 %v7016_v28 }
 0x68e   : > { %3707 = vmatpush1.bf16.msra.mxu0 %v7014_v30 }
 0x68f   : > { %3752 = vmatprep.subr.bf16.mxu0 %v7920_v16  ;;  %v5925_v16 = vld [vmem:[%s9017_s4 + $0xc] sm:$0xf] }
 0x6b0   : > { %v2913_v31 = vpop.f32.mrb[44].mxu1 }
 0x6b1   : > { %v2914_v35 = vadd.f32 %v2913_v31, %v2690_v6  ;;  %v2915_v37 = vpop.f32.mrb[45].mxu1  ;;  %v7052_v6 = vld [vmem:[%s9018_s5 + $0x414] ss:$8 sps:$4 sm:$0xff]  }
 0x6b2   : > { %v2916_v38 = vadd.f32 %v2915_v37, %v2692_v8  ;;  %v2917_v39 = vpop.f32.mrb[46].mxu1  ;;  %v7055_v8 = vld [vmem:[%s9018_s5 + $0x424] ss:$8 sps:$4 sm:$0xff]  }
 0x6b3   : > { %v8331_v40 = vadd.f32 %v2954_v12, %v2914_v35  ;;  %v2918_v41 = vpop.f32.mrb[47].mxu1  ;;  %v7056_v12 = vld [vmem:[%s9018_s5 + $0x430] ss:$8 sps:$4 sm:$0xff]  }
 0x6b4   : > { %v8333_v42 = vadd.f32 %v2956_v17, %v2916_v38  ;;  %v7059_v17 = vld [vmem:[%s9018_s5 + $0x440] ss:$8 sps:$4 sm:$0xff]  }
 0x6b8   : > { %v3041_v43 = vpop.f32.mrb[48].mxu1 }
 0x6b9   : > { %v3049_v44 = vpack.c.bf16 %v3041_v43, %v3041_v43  ;;  %v6569_v45 = vpop.f32.mrb[49].mxu1 }
 0x6ba   : > { %v3044_v47 = vpop.f32.mrb[50].mxu1 }
 0x6bb   : > { %v6570_v50 = vpop.f32.mrb[51].mxu1  ;;  %5924 = vmatmul.mubr.msk.bf16.vlgmr.msra.gmra.mrb[52].mxu1 %vm2610_vm6, %v3049_v44 }
 0x6bc   : > { %3360 = vmatpush1.bf16.msra.mxu1 %v7918_v10  ;;  %3391 = vmatprep.mubr.bf16.mxu1 %v7264_v36 }
 0x6bd   : > { %5926 = vmatprep.subr.msk.bf16.mxu1 %vm2174_vm4, %v7931_v33 }
 0x6c0   : > { %3362 = vmatpush1.bf16.msra.mxu1 %v7934_v34 }
 0x6c1   : > { %6571 = vmatprep.subr.bf16.mxu1 %v7265_v46 }
 0x6c3   : > { %5927 = vmatmul.mubr.msk.bf16.vlgmr.msra.gmra.mrb[56].mxu1 %vm2170_vm5, %v5925_v16 }
 0x6c4   : > { %6572 = vmatpush3.bf16.msra.mxu1 %v7923_v24  ;;  %6575 = vmatprep.mubr.msk.bf16.mxu1 %vm7266_vm3, %v7265_v46 }
 0x6c5   : > { %6573 = vmatprep.subr.bf16.mxu1 %v7265_v46 }
 0x6c8   : > { %6574 = vmatpush3.bf16.msra.mxu1 %v7929_v32 }
 0x6c9   : > { %3663 = vmatprep.subr.bf16.mxu1 %v7019_v52 }
 0x6cb   : > { %6576 = vmatmul.mubr.msk.bf16.vlgmr.msra.gmra.mrb[60].mxu1 %vm2170_vm5, %v5925_v16 }
 0x6cc   : > { %3664 = vmatpush1.bf16.msra.mxu1 %v7017_v21 }
 0x6cd   : > { %3665 = vmatprep.subr.bf16.mxu1 %v7022_v53  ;;  %v7071_v53 = vld [vmem:[%s9018_s5 + $0x4a0] ss:$8 sps:$4 sm:$0xff]  }
 0x6d0   : > { %3666 = vmatpush1.bf16.msra.mxu1 %v7020_v54  ;;  %v7076_v54 = vld [vmem:[%s9018_s5 + $0x4b4] ss:$8 sps:$4 sm:$0xff]  }
 0x6d1   : > { %3667 = vmatprep.subr.bf16.mxu1 %v7025_v55  ;;  %v7074_v55 = vld [vmem:[%s9018_s5 + $0x4b0] ss:$8 sps:$4 sm:$0xff]  }
 0x6d4   : > { %3668 = vmatpush1.bf16.msra.mxu1 %v7023_v56  ;;  %v7079_v56 = vld [vmem:[%s9018_s5 + $0x4c4] ss:$8 sps:$4 sm:$0xff]  }
 0x6d5   : > { %3669 = vmatprep.subr.bf16.mxu1 %v7028_v58  ;;  %v7077_v58 = vld [vmem:[%s9018_s5 + $0x4c0] ss:$8 sps:$4 sm:$0xff]  }
 0x6d8   : > { %3670 = vmatpush1.bf16.msra.mxu1 %v7026_v59  ;;  %v7082_v59 = vld [vmem:[%s9018_s5 + $0x4d4] ss:$8 sps:$4 sm:$0xff]  }
 0x6d9   : > { %3671 = vmatprep.subr.bf16.mxu1 %v7031_v57  ;;  %v7080_v57 = vld [vmem:[%s9018_s5 + $0x4d0] ss:$8 sps:$4 sm:$0xff]  }
 0x6dc   : > { %3672 = vmatpush1.bf16.msra.mxu1 %v7029_v61  ;;  %v7085_v61 = vld [vmem:[%s9018_s5 + $0x4e4] ss:$8 sps:$4 sm:$0xff]  }
 0x6dd   : > { %3673 = vmatprep.subr.bf16.mxu1 %v7034_v60  ;;  %v7083_v60 = vld [vmem:[%s9018_s5 + $0x4e0] ss:$8 sps:$4 sm:$0xff]  }
 0x6e0   : > { %3674 = vmatpush1.bf16.msra.mxu1 %v7032_v63  ;;  %v7088_v63 = vld [vmem:[%s9018_s5 + $0x4f4] ss:$8 sps:$4 sm:$0xff]  }
 0x6e1   : > { %3675 = vmatprep.subr.bf16.mxu1 %v7037_v62  ;;  %v7086_v62 = vld [vmem:[%s9018_s5 + $0x4f0] ss:$8 sps:$4 sm:$0xff]  }
 0x6e4   : > { %3676 = vmatpush1.bf16.msra.mxu1 %v7035_v0  ;;  %v7091_v0 = vld [vmem:[%s9018_s5 + $0x504] ss:$8 sps:$4 sm:$0xff]  }
 0x6e5   : > { %3677 = vmatprep.subr.bf16.mxu1 %v7040_v1  ;;  %v7089_v1 = vld [vmem:[%s9018_s5 + $0x500] ss:$8 sps:$4 sm:$0xff]  }
 0x6e8   : > { %3678 = vmatpush1.bf16.msra.mxu1 %v7038_v2  ;;  %v7094_v2 = vld [vmem:[%s9018_s5 + $0x514] ss:$8 sps:$4 sm:$0xff]  }
 0x6e9   : > { %3679 = vmatprep.subr.bf16.mxu1 %v7043_v13  ;;  %v7092_v13 = vld [vmem:[%s9018_s5 + $0x510] ss:$8 sps:$4 sm:$0xff]  }
 0x6ec   : > { %3680 = vmatpush1.bf16.msra.mxu1 %v7041_v3  ;;  %v7097_v3 = vld [vmem:[%s9018_s5 + $0x524] ss:$8 sps:$4 sm:$0xff]  }
 0x6ed   : > { %3681 = vmatprep.subr.bf16.mxu1 %v7046_v4  ;;  %v7095_v4 = vld [vmem:[%s9018_s5 + $0x520] ss:$8 sps:$4 sm:$0xff]  }
 0x6f0   : > { %3682 = vmatpush1.bf16.msra.mxu1 %v7044_v14  ;;  %v7100_v14 = vld [vmem:[%s9018_s5 + $0x534] ss:$8 sps:$4 sm:$0xff]  }
 0x6f1   : > { %3683 = vmatprep.subr.bf16.mxu1 %v7049_v15  ;;  %v7098_v15 = vld [vmem:[%s9018_s5 + $0x530] ss:$8 sps:$4 sm:$0xff]  }
 0x6f4   : > { %3684 = vmatpush1.bf16.msra.mxu1 %v7047_v5  ;;  %v7103_v5 = vld [vmem:[%s9018_s5 + $0x544] ss:$8 sps:$4 sm:$0xff]  }
 0x6f5   : > { %3685 = vmatprep.subr.bf16.mxu1 %v7052_v6  ;;  %v7101_v6 = vld [vmem:[%s9018_s5 + $0x540] ss:$8 sps:$4 sm:$0xff]  }
 0x6f8   : > { %3686 = vmatpush1.bf16.msra.mxu1 %v7050_v7  ;;  %v7106_v7 = vld [vmem:[%s9018_s5 + $0x554] ss:$8 sps:$4 sm:$0xff]  }
 0x6f9   : > { %3687 = vmatprep.subr.bf16.mxu1 %v7055_v8  ;;  %v7104_v8 = vld [vmem:[%s9018_s5 + $0x550] ss:$8 sps:$4 sm:$0xff]  }
 0x6fc   : > { %3688 = vmatpush1.bf16.msra.mxu1 %v7053_v9  ;;  %v7107_v9 = vld [vmem:[%s9018_s5 + $0x560] ss:$8 sps:$4 sm:$0xff]  }
 0x6fd   : > { %3689 = vmatprep.subr.bf16.mxu1 %v7058_v11  ;;  %v7109_v11 = vld [vmem:[%s9018_s5 + $0x564] ss:$8 sps:$4 sm:$0xff]  }
 0x700   : > { %3690 = vmatpush1.bf16.msra.mxu1 %v7056_v12  ;;  %v7112_v12 = vld [vmem:[%s9018_s5 + $0x574] ss:$8 sps:$4 sm:$0xff]  }
 0x701   : > { %3691 = vmatprep.subr.bf16.mxu1 %v7061_v18  ;;  %v7115_v18 = vld [vmem:[%s9018_s5 + $0x584] ss:$8 sps:$4 sm:$0xff]  }
 0x704   : > { %3692 = vmatpush1.bf16.msra.mxu1 %v7059_v17  ;;  %v7110_v17 = vld [vmem:[%s9018_s5 + $0x570] ss:$8 sps:$4 sm:$0xff]  }
 0x705   : > { %3693 = vmatprep.subr.bf16.mxu1 %v7064_v19  ;;  %v7113_v19 = vld [vmem:[%s9018_s5 + $0x580] ss:$8 sps:$4 sm:$0xff]  }
 0x708   : > { %3694 = vmatpush1.bf16.msra.mxu1 %v7062_v20  ;;  %v7116_v20 = vld [vmem:[%s9018_s5 + $0x590] ss:$8 sps:$4 sm:$0xff]  }
 0x709   : > { %4097 = vmatprep.subr.bf16.mxu1 %v7115_v18 }
 0x75c   : > { %v3304_v22 = vpop.f32.mrb[52].mxu0 }
 0x75d   : > { %v3306_v23 = vpop.f32.mrb[53].mxu0 }
 0x75e   : > { %v3308_v25 = vpop.f32.mrb[54].mxu0 }
 0x75f   : > { %v3309_v26 = vpop.f32.mrb[55].mxu0 }
 0x78e   : > { %v3345_v27 = vpop.f32.mrb[52].mxu1 }
 0x78f   : > { %v3346_v28 = vadd.f32 %v3345_v27, %v3304_v22  ;;  %v3347_v29 = vpop.f32.mrb[53].mxu1  ;;  %v7118_v22 = vld [vmem:[%s9018_s5 + $0x594] ss:$8 sps:$4 sm:$0xff]  }
 0x790   : > { %v3348_v30 = vadd.f32 %v3347_v29, %v3306_v23  ;;  %v3349_v31 = vpop.f32.mrb[54].mxu1 }
 0x791   : > { %v8449_v35 = vadd.f32 %v3346_v28, %v8331_v40  ;;  %v3350_v37 = vpop.f32.mrb[55].mxu1 }
 0x792   : > { %v8452_v38 = vadd.f32 %v3348_v30, %v8333_v42  ;;  %v6002_v42 = vld [vmem:[%s9017_s4 + $0x10] sm:$0xf] }
 0x796   : > { %v3393_v39 = vpop.f32.mrb[56].mxu1 }
 0x797   : > { %v3395_v41 = vpop.f32.mrb[57].mxu1  ;;  %v3440_v45 = vpack.c.bf16 %v3393_v39, %v3393_v39 }
 0x798   : > { %v3441_v43 = vpack.c.bf16 %v3395_v41, %v3395_v41  ;;  %v3397_v44 = vpop.f32.mrb[58].mxu1 }
 0x799   : > { %v3398_v47 = vpop.f32.mrb[59].mxu1 }
 0x79a   : > { %3695 = vmatprep.mubr.bf16.mxu1 %v3441_v43 }
 0x79b   : > { %3696 = vmatmul.mubr.bf16.vlgmr.msra.gmra.mrb[64].mxu1 %v3440_v45 }
 0x79c   : > { %4129 = vmatprep.mubr.bf16.mxu1 %v7264_v36  ;;  %4098 = vmatpush1.bf16.msra.mxu1 %v7113_v19 }
 0x79d   : > { %4099 = vmatprep.subr.bf16.mxu1 %v7118_v22 }
 0x79e   : > { %v3434_v50 = vpop.f32.mrb[60].mxu1 }
 0x79f   : > { %v3442_v16 = vpack.c.bf16 %v3434_v50, %v3434_v50  ;;  %v6577_v52 = vpop.f32.mrb[61].mxu1 }
 0x7a0   : > { %v3437_v21 = vpop.f32.mrb[62].mxu1  ;;  %4100 = vmatpush1.bf16.msra.mxu1 %v7116_v20 }
 0x7a1   : > { %v6578_v40 = vpop.f32.mrb[63].mxu1  ;;  %6001 = vmatmul.mubr.msk.bf16.vlgmr.msra.gmra.mrb[56].mxu0 %vm2610_vm6, %v3442_v16  ;;  %v7119_v16 = vld [vmem:[%s9021_s8] sm:$0xff]  }
 0x7a2   : > { %3753 = vmatpush1.bf16.msra.mxu0 %v7918_v10  ;;  %3784 = vmatprep.mubr.bf16.mxu0 %v7264_v36  ;;  %v7067_v10 = vld [vmem:[%s9018_s5 + $0x484] ss:$8 sps:$4 sm:$0xff]  }
 0x7a3   : > { %6003 = vmatprep.subr.msk.bf16.mxu0 %vm2174_vm4, %v7931_v33  ;;  %v7065_v33 = vld [vmem:[%s9018_s5 + $0x480] ss:$8 sps:$4 sm:$0xff]  }
 0x7a6   : > { %3755 = vmatpush1.bf16.msra.mxu0 %v7934_v34  ;;  %v7068_v34 = vld [vmem:[%s9018_s5 + $0x490] ss:$8 sps:$4 sm:$0xff]  }
 0x7a7   : > { %6579 = vmatprep.subr.bf16.mxu0 %v7265_v46 }
 0x7a9   : > { %6004 = vmatmul.mubr.msk.bf16.vlgmr.msra.gmra.mrb[60].mxu0 %vm2170_vm5, %v6002_v42 }
 0x7aa   : > { %6580 = vmatpush3.bf16.msra.mxu0 %v7923_v24  ;;  %6583 = vmatprep.mubr.msk.bf16.mxu0 %vm7266_vm3, %v7265_v46  ;;  %v7070_v24 = vld [vmem:[%s9018_s5 + $0x494] ss:$8 sps:$4 sm:$0xff]  }
 0x7ab   : > { %6581 = vmatprep.subr.bf16.mxu0 %v7265_v46 }
 0x7ae   : > { %6582 = vmatpush3.bf16.msra.mxu0 %v7929_v32  ;;  %v7073_v32 = vld [vmem:[%s9018_s5 + $0x4a4] ss:$8 sps:$4 sm:$0xff]  }
 0x7af   : > { %4056 = vmatprep.subr.bf16.mxu0 %v7067_v10 }
 0x7b1   : > { %6584 = vmatmul.mubr.msk.bf16.vlgmr.msra.gmra.mrb[64].mxu0 %vm2170_vm5, %v6002_v42 }
 0x7b2   : > { %4057 = vmatpush1.bf16.msra.mxu0 %v7065_v33  ;;  %v7121_v33 = vld [vmem:[%s9021_s8 + $0x10] sm:$0xff]  }
 0x7b3   : > { %4058 = vmatprep.subr.bf16.mxu0 %v7070_v24 }
 0x7b6   : > { %4059 = vmatpush1.bf16.msra.mxu0 %v7068_v34  ;;  %v7122_v34 = vld [vmem:[%s9021_s8 + $0x18] sm:$0xff]  }
 0x7b7   : > { %4060 = vmatprep.subr.bf16.mxu0 %v7073_v32  ;;  %v7123_v32 = vld [vmem:[%s9021_s8 + $0x20] sm:$0xff]  }
 0x7ba   : > { %4061 = vmatpush1.bf16.msra.mxu0 %v7071_v53  ;;  %v7124_v53 = vld [vmem:[%s9021_s8 + $0x28] sm:$0xff]  }
 0x7bb   : > { %4062 = vmatprep.subr.bf16.mxu0 %v7076_v54  ;;  %v7125_v54 = vld [vmem:[%s9021_s8 + $0x30] sm:$0xff]  }
 0x7be   : > { %4063 = vmatpush1.bf16.msra.mxu0 %v7074_v55  ;;  %v7126_v55 = vld [vmem:[%s9021_s8 + $0x38] sm:$0xff]  }
 0x7bf   : > { %4064 = vmatprep.subr.bf16.mxu0 %v7079_v56  ;;  %v7127_v56 = vld [vmem:[%s9021_s8 + $0x40] sm:$0xff]  }
 0x7c2   : > { %4065 = vmatpush1.bf16.msra.mxu0 %v7077_v58  ;;  %v7128_v58 = vld [vmem:[%s9021_s8 + $0x48] sm:$0xff]  }
 0x7c3   : > { %4066 = vmatprep.subr.bf16.mxu0 %v7082_v59  ;;  %v7129_v59 = vld [vmem:[%s9021_s8 + $0x50] sm:$0xff]  }
 0x7c6   : > { %4067 = vmatpush1.bf16.msra.mxu0 %v7080_v57  ;;  %v7130_v57 = vld [vmem:[%s9021_s8 + $0x58] sm:$0xff]  }
 0x7c7   : > { %4068 = vmatprep.subr.bf16.mxu0 %v7085_v61  ;;  %v7131_v61 = vld [vmem:[%s9021_s8 + $0x60] sm:$0xff]  }
 0x7ca   : > { %4069 = vmatpush1.bf16.msra.mxu0 %v7083_v60  ;;  %v7132_v60 = vld [vmem:[%s9021_s8 + $0x68] sm:$0xff]  }
 0x7cb   : > { %4070 = vmatprep.subr.bf16.mxu0 %v7088_v63 }
 0x7ce   : > { %4071 = vmatpush1.bf16.msra.mxu0 %v7086_v62 }
 0x7cf   : > { %4072 = vmatprep.subr.bf16.mxu0 %v7091_v0 }
 0x7d2   : > { %4073 = vmatpush1.bf16.msra.mxu0 %v7089_v1 }
 0x7d3   : > { %4074 = vmatprep.subr.bf16.mxu0 %v7094_v2  ;;  %v4140_v2 = vld [vmem:[%s9019_s6] sm:$0x3] }
 0x7d6   : > { %4075 = vmatpush1.bf16.msra.mxu0 %v7092_v13 }
 0x7d7   : > { %4076 = vmatprep.subr.bf16.mxu0 %v7097_v3 }
 0x7da   : > { %4077 = vmatpush1.bf16.msra.mxu0 %v7095_v4  ;;  %v4145_v4 = vrot.slane %v4140_v2, %v2132_v49 }
 0x7db   : > { %4078 = vmatprep.subr.bf16.mxu0 %v7100_v14 }
 0x7de   : > { %4079 = vmatpush1.bf16.msra.mxu0 %v7098_v15 }
 0x7df   : > { %4080 = vmatprep.subr.bf16.mxu0 %v7103_v5  ;;  %v4149_v5 = vrot.slane %v4140_v2, %v2136_v51  ;;  %v4158_v51 = vld [vmem:[%s9020_s7] sm:$0x1] }
 0x7e0   : > { %v7151_v2 = vld [vmem:[%s9021_s8 + $0x100] sm:$0xff]  }
 0x7e2   : > { %4081 = vmatpush1.bf16.msra.mxu0 %v7101_v6 }
 0x7e3   : > { %4082 = vmatprep.subr.bf16.mxu0 %v7106_v7 }
 0x7e6   : > { %4083 = vmatpush1.bf16.msra.mxu0 %v7104_v8 }
 0x7e7   : > { %4084 = vmatprep.subr.bf16.mxu0 %v7109_v11 }
 0x7ea   : > { %4085 = vmatpush1.bf16.msra.mxu0 %v7107_v9 }
 0x7eb   : > { %4086 = vmatprep.subr.bf16.mxu0 %v7112_v12  ;;  %v7267_v12 = vmov 65535  }
 0x7ee   : > { %4087 = vmatpush1.bf16.msra.mxu0 %v7110_v17  ;;  %v4164_v17 = vsel %vm4163_vm7, 4294967295, %v7267_v12  ;;  %v7169_v12 = vld [vmem:[%s9021_s8 + $0x190] sm:$0xff]  }
 0x7ef   : > { %4535 = vmatprep.subr.bf16.mxu0 %v7264_v36  ;;  %v4165_v49 = vsel %vm450_vm1, %v4164_v17, 0  ;;  %v7170_v17 = vld [vmem:[%s9021_s8 + $0x198] sm:$0xff]  }
 0x86e   : > { %v3697_v23 = vpop.f32.mrb[64].mxu1 }
 0x86f   : > { %v3699_v25 = vpop.f32.mrb[65].mxu1 }
 0x870   : > { %v3701_v26 = vpop.f32.mrb[66].mxu1 }
 0x871   : > { %v3702_v27 = vpop.f32.mrb[67].mxu1  ;;  %v6080_v26 = vld [vmem:[%s9020_s7 + $0x1] sm:$0x1] }
 0x872   : > { %v7133_v27 = vld [vmem:[%s9021_s8 + $0x70] sm:$0xff]  }
 0x874   : > { %v3738_v28 = vpop.f32.mrb[56].mxu0 }
 0x875   : > { %v3739_v29 = vadd.f32 %v3738_v28, %v3697_v23  ;;  %v3740_v30 = vpop.f32.mrb[57].mxu0  ;;  %v7134_v28 = vld [vmem:[%s9021_s8 + $0x78] sm:$0xff]  }
 0x876   : > { %v3741_v31 = vadd.f32 %v3740_v30, %v3699_v25  ;;  %v3742_v37 = vpop.f32.mrb[58].mxu0  ;;  %v7136_v30 = vld [vmem:[%s9021_s8 + $0x88] sm:$0xff]  }
 0x877   : > { %v8582_v39 = vadd.f32 %v3739_v29, %v8449_v35  ;;  %v3743_v41 = vpop.f32.mrb[59].mxu0  ;;  %v7120_v35 = vld [vmem:[%s9021_s8 + $0x8] sm:$0xff]   ;;  %v7135_v29 = vld [vmem:[%s9021_s8 + $0x80] sm:$0xff]   ;;  %v7138_v37 = vld [vmem:[%s9021_s8 + $0x98] sm:$0xff]  }
 0x878   : > { %v8585_v43 = vadd.f32 %v3741_v31, %v8452_v38  ;;  %v7137_v31 = vld [vmem:[%s9021_s8 + $0x90] sm:$0xff]   ;;  %v7140_v41 = vld [vmem:[%s9021_s8 + $0xa8] sm:$0xff]  }
 0x87c   : > { %v3786_v44 = vpop.f32.mrb[60].mxu0 }
 0x87d   : > { %v3788_v45 = vpop.f32.mrb[61].mxu0  ;;  %v3833_v52 = vpack.c.bf16 %v3786_v44, %v3786_v44  ;;  %v7142_v44 = vld [vmem:[%s9021_s8 + $0xb8] sm:$0xff]  }
 0x87e   : > { %v3834_v47 = vpack.c.bf16 %v3788_v45, %v3788_v45  ;;  %v3790_v50 = vpop.f32.mrb[62].mxu0  ;;  %v7143_v45 = vld [vmem:[%s9021_s8 + $0xc0] sm:$0xff]  }
 0x87f   : > { %v3791_v21 = vpop.f32.mrb[63].mxu0  ;;  %v7145_v50 = vld [vmem:[%s9021_s8 + $0xd0] sm:$0xff]  }
 0x880   : > { %4088 = vmatprep.mubr.bf16.mxu0 %v3834_v47  ;;  %v7144_v47 = vld [vmem:[%s9021_s8 + $0xc8] sm:$0xff]  }
 0x881   : > { %4089 = vmatmul.mubr.bf16.vlgmr.msra.gmra.mrb[68].mxu0 %v3833_v52 }
 0x882   : > { %4536 = vmatpush1.bf16.msra.mxu0 %v7119_v16  ;;  %v7146_v16 = vld [vmem:[%s9021_s8 + $0xd8] sm:$0xff]  }
 0x883   : > { %4537 = vmatprep.subr.bf16.mxu0 %v7264_v36 }
 0x884   : > { %v3827_v38 = vpop.f32.mrb[64].mxu0 }
 0x885   : > { %v3835_v40 = vpack.c.bf16 %v3827_v38, %v3827_v38  ;;  %v6585_v42 = vpop.f32.mrb[65].mxu0 }
 0x886   : > { %v3830_v10 = vpop.f32.mrb[66].mxu0  ;;  %4538 = vmatpush1.bf16.msra.mxu0 %v7120_v35 }
 0x887   : > { %v6586_v24 = vpop.f32.mrb[67].mxu0  ;;  %6078 = vmatmul.mubr.msk.bf16.vlgmr.msra.gmra.mrb[68].mxu1 %vm2610_vm6, %v3835_v40  ;;  %4539 = vmatprep.subr.bf16.mxu0 %v7264_v36 }
 0x888   : > { %4204 = vmatprep.mubr.bf16.mxu1 %v7264_v36 }
 0x88a   : > { %4540 = vmatpush1.bf16.msra.mxu0 %v7121_v33 }
 0x88b   : > { %4541 = vmatprep.subr.bf16.mxu0 %v7264_v36 }
 0x88e   : > { %4542 = vmatpush1.bf16.msra.mxu0 %v7122_v34 }
 0x88f   : > { %4543 = vmatprep.subr.bf16.mxu0 %v7264_v36 }
 0x892   : > { %4544 = vmatpush1.bf16.msra.mxu0 %v7123_v32  ;;  %v6185_v32 = vld [vmem:[%s9020_s7 + $0x3] sm:$0x1] }
 0x893   : > { %4545 = vmatprep.subr.bf16.mxu0 %v7264_v36 }
 0x896   : > { %4546 = vmatpush1.bf16.msra.mxu0 %v7124_v53 }
 0x897   : > { %4547 = vmatprep.subr.bf16.mxu0 %v7264_v36 }
 0x89a   : > { %4548 = vmatpush1.bf16.msra.mxu0 %v7125_v54 }
 0x89b   : > { %4549 = vmatprep.subr.bf16.mxu0 %v7264_v36 }
 0x89e   : > { %4550 = vmatpush1.bf16.msra.mxu0 %v7126_v55  ;;  %v7161_v55 = vld [vmem:[%s9021_s8 + $0x150] sm:$0xff]  }
 0x89f   : > { %4551 = vmatprep.subr.bf16.mxu0 %v7264_v36 }
 0x8a2   : > { %4552 = vmatpush1.bf16.msra.mxu0 %v7127_v56  ;;  %v7162_v56 = vld [vmem:[%s9021_s8 + $0x158] sm:$0xff]  }
 0x8a3   : > { %4553 = vmatprep.subr.bf16.mxu0 %v7264_v36 }
 0x8a6   : > { %4554 = vmatpush1.bf16.msra.mxu0 %v7128_v58  ;;  %v6140_v58 = vld [vmem:[%s9020_s7 + $0x2] sm:$0x1] }
 0x8a7   : > { %4555 = vmatprep.subr.bf16.mxu0 %v7264_v36 }
 0x8aa   : > { %4556 = vmatpush1.bf16.msra.mxu0 %v7129_v59  ;;  %v7147_v59 = vld [vmem:[%s9021_s8 + $0xe0] sm:$0xff]  }
 0x8ab   : > { %4557 = vmatprep.subr.bf16.mxu0 %v7264_v36 }
 0x8ae   : > { %4558 = vmatpush1.bf16.msra.mxu0 %v7130_v57  ;;  %v7163_v57 = vld [vmem:[%s9021_s8 + $0x160] sm:$0xff]  }
 0x8af   : > { %4559 = vmatprep.subr.bf16.mxu0 %v7264_v36 }
 0x8b2   : > { %4560 = vmatpush1.bf16.msra.mxu0 %v7131_v61  ;;  %v7148_v61 = vld [vmem:[%s9021_s8 + $0xe8] sm:$0xff]  }
 0x8b3   : > { %4561 = vmatprep.subr.bf16.mxu0 %v7264_v36 }
 0x8b6   : > { %4562 = vmatpush1.bf16.msra.mxu0 %v7132_v60  ;;  %v7164_v60 = vld [vmem:[%s9021_s8 + $0x168] sm:$0xff]  }
 0x954   : > { %v4090_v63 = vpop.f32.mrb[68].mxu0 }
 0x955   : > { %v4092_v62 = vpop.f32.mrb[69].mxu0 }
 0x956   : > { %v4094_v0 = vpop.f32.mrb[70].mxu0 }
 0x957   : > { %v4095_v1 = vpop.f32.mrb[71].mxu0  ;;  %v7150_v0 = vld [vmem:[%s9021_s8 + $0xf8] sm:$0xff]  }
 0x958   : > { %v7166_v1 = vld [vmem:[%s9021_s8 + $0x178] sm:$0xff]  }
 0x95a   : > { %v4131_v13 = vpop.f32.mrb[68].mxu1 }
 0x95b   : > { %v4132_v3 = vadd.f32 %v4131_v13, %v4090_v63  ;;  %v4133_v14 = vpop.f32.mrb[69].mxu1  ;;  %v7149_v63 = vld [vmem:[%s9021_s8 + $0xf0] sm:$0xff]   ;;  %v7167_v13 = vld [vmem:[%s9021_s8 + $0x180] sm:$0xff]  }
 0x95c   : > { %v4134_v15 = vadd.f32 %v4133_v14, %v4092_v62  ;;  %v4135_v6 = vpop.f32.mrb[70].mxu1  ;;  %v7165_v62 = vld [vmem:[%s9021_s8 + $0x170] sm:$0xff]  }
 0x95d   : > { %v4138_v7 = vadd.f32 %v4132_v3, %v8582_v39  ;;  %v4136_v8 = vpop.f32.mrb[71].mxu1  ;;  %v7139_v39 = vld [vmem:[%s9021_s8 + $0xa0] sm:$0xff]   ;;  %v7152_v3 = vld [vmem:[%s9021_s8 + $0x108] sm:$0xff]   ;;  %v7153_v14 = vld [vmem:[%s9021_s8 + $0x110] sm:$0xff]  }
 0x95e   : > { %v4139_v9 = vadd.f32 %v4134_v15, %v8585_v43  ;;  %v7141_v43 = vld [vmem:[%s9021_s8 + $0xb0] sm:$0xff]   ;;  %v7154_v15 = vld [vmem:[%s9021_s8 + $0x118] sm:$0xff]   ;;  %v7156_v6 = vld [vmem:[%s9021_s8 + $0x128] sm:$0xff]  }
 0x95f   : > { %v4152_v11 = vadd.f32 %v4145_v4, %v4138_v7  ;;  %v7168_v4 = vld [vmem:[%s9021_s8 + $0x188] sm:$0xff]   ;;  %v7157_v7 = vld [vmem:[%s9021_s8 + $0x130] sm:$0xff]   ;;  %v7158_v8 = vld [vmem:[%s9021_s8 + $0x138] sm:$0xff]  }
 0x960   : > { %v4153_v18 = vadd.f32 %v4149_v5, %v4139_v9  ;;  %v7155_v5 = vld [vmem:[%s9021_s8 + $0x120] sm:$0xff]  }
 0x961   : > { %v4154_v19 = vmax.f32 %v4152_v11, 0.0  ;;  %v7159_v9 = vld [vmem:[%s9021_s8 + $0x140] sm:$0xff]   ;;  %v7160_v11 = vld [vmem:[%s9021_s8 + $0x148] sm:$0xff]  }
 0x962   : > { %v4155_v20 = vmax.f32 %v4153_v18, 0.0  ;;  %v7171_v18 = vld [vmem:[%s9021_s8 + $0x1a0] sm:$0xff]  }
 0x963   : > { %v4156_v22 = vpack.c.bf16 %v4154_v19, %v4154_v19  ;;  %v7172_v19 = vld [vmem:[%s9021_s8 + $0x1a8] sm:$0xff]  }
 0x964   : > { %v4157_v23 = vpack.c.bf16 %v4155_v20, %v4155_v20  ;;  %v7173_v20 = vld [vmem:[%s9021_s8 + $0x1b0] sm:$0xff]  }
 0x965   : > { %v8656_v48 = vand.u32 %v4165_v49, %v4156_v22  ;;  %v7174_v22 = vld [vmem:[%s9021_s8 + $0x1b8] sm:$0xff]  }
 0x966   : > { %v8654_v25 = vand.u32 %v4165_v49, %v4157_v23 }
 0x968   : > { %4172 = vmatprep.subr.bf16.mxu1 %v8654_v25  ;;  %4785 = vmatprep.subr.bf16.mxu0 %v8654_v25 }
 0x969   : > { %4173 = vmatpush1.bf16.msra.mxu1 %v8656_v48 }
 0x96a   : > { %4248 = vmatprep.subr.bf16.mxu1 %v8654_v25 }
 0x96c   : > { %6079 = vmatmul.mubr.msk.bf16.vlgmr.msra.gmra.mrb[72].mxu1 %vm4159_vm8, %v4158_v51 }
 0x96d   : > { %4249 = vmatpush1.bf16.msra.mxu1 %v8656_v48  ;;  %4280 = vmatprep.mubr.bf16.mxu1 %v7264_v36 }
 0x96e   : > { %4408 = vmatprep.subr.bf16.mxu1 %v7264_v36 }
 0x974   : > { %6081 = vmatmul.mubr.msk.bf16.vlgmr.msra.gmra.mrb[76].mxu1 %vm4159_vm8, %v6080_v26 }
 0x975   : > { %4409 = vmatpush1.bf16.msra.mxu1 %v7133_v27 }
 0x976   : > { %4410 = vmatprep.subr.bf16.mxu1 %v7264_v36 }
 0x979   : > { %4411 = vmatpush1.bf16.msra.mxu1 %v7134_v28 }
 0x97a   : > { %4412 = vmatprep.subr.bf16.mxu1 %v7264_v36 }
 0x97d   : > { %4413 = vmatpush1.bf16.msra.mxu1 %v7135_v29 }
 0x97e   : > { %4414 = vmatprep.subr.bf16.mxu1 %v7264_v36 }
 0x981   : > { %4415 = vmatpush1.bf16.msra.mxu1 %v7136_v30 }
 0x982   : > { %4416 = vmatprep.subr.bf16.mxu1 %v7264_v36 }
 0x985   : > { %4417 = vmatpush1.bf16.msra.mxu1 %v7137_v31 }
 0x986   : > { %4418 = vmatprep.subr.bf16.mxu1 %v7264_v36 }
 0x989   : > { %4419 = vmatpush1.bf16.msra.mxu1 %v7138_v37 }
 0x98a   : > { %4420 = vmatprep.subr.bf16.mxu1 %v7264_v36 }
 0x98d   : > { %4421 = vmatpush1.bf16.msra.mxu1 %v7139_v39 }
 0x98e   : > { %4422 = vmatprep.subr.bf16.mxu1 %v7264_v36 }
 0x991   : > { %4423 = vmatpush1.bf16.msra.mxu1 %v7140_v41 }
 0x992   : > { %4424 = vmatprep.subr.bf16.mxu1 %v7264_v36 }
 0x995   : > { %4425 = vmatpush1.bf16.msra.mxu1 %v7141_v43 }
 0x996   : > { %4426 = vmatprep.subr.bf16.mxu1 %v7264_v36 }
 0x999   : > { %4427 = vmatpush1.bf16.msra.mxu1 %v7142_v44 }
 0x99a   : > { %4428 = vmatprep.subr.bf16.mxu1 %v7264_v36 }
 0x99d   : > { %4429 = vmatpush1.bf16.msra.mxu1 %v7143_v45 }
 0x99e   : > { %4430 = vmatprep.subr.bf16.mxu1 %v7264_v36 }
 0x9a1   : > { %4431 = vmatpush1.bf16.msra.mxu1 %v7144_v47 }
 0x9a2   : > { %4432 = vmatprep.subr.bf16.mxu1 %v7264_v36 }
 0x9a5   : > { %4433 = vmatpush1.bf16.msra.mxu1 %v7145_v50 }
 0x9a6   : > { %4434 = vmatprep.subr.bf16.mxu1 %v7264_v36 }
 0x9a9   : > { %4435 = vmatpush1.bf16.msra.mxu1 %v7146_v16 }
 0x9aa   : > { %4580 = vmatprep.subr.bf16.mxu1 %v8654_v25 }
 0xa3f   : > { %v4206_v52 = vpop.f32.mrb[72].mxu1 }
 0xa40   : > { %v4208_v21 = vpop.f32.mrb[73].mxu1  ;;  %v4213_v40 = vpack.c.bf16 %v4206_v52, %v4206_v52 }
 0xa41   : > { %v4214_v35 = vpack.c.bf16 %v4208_v21, %v4208_v21  ;;  %v4210_v38 = vpop.f32.mrb[74].mxu1 }
 0xa42   : > { %v4211_v42 = vpop.f32.mrb[75].mxu1  ;;  %v7175_v38 = vld [vmem:[%s9021_s8 + $0x1c0] sm:$0xff]  }
 0xa43   : > { %6139 = vmatprep.mubr.msk.bf16.mxu0 %vm4404_vm9, %v4214_v35  ;;  %v6230_v35 = vld [vmem:[%s9020_s7 + $0x4] sm:$0x1]  ;;  %v7178_v42 = vld [vmem:[%s9021_s8 + $0x1d8] sm:$0xff]  }
 0xa44   : > { %4568 = vmatmul.mubr.bf16.vlgmr.msra.gmra.mrb[72].mxu0 %v4213_v40  ;;  %v7176_v40 = vld [vmem:[%s9021_s8 + $0x1c8] sm:$0xff]  }
 0xa45   : > { %4786 = vmatpush1.bf16.msra.mxu0 %v8656_v48  ;;  %4817 = vmatprep.mubr.bf16.mxu0 %v7264_v36 }
 0xa46   : > { %4944 = vmatprep.subr.bf16.mxu0 %v7264_v36 }
 0xa47   : > { %v4282_v10 = vpop.f32.mrb[76].mxu1 }
 0xa48   : > { %v4284_v33 = vpop.f32.mrb[77].mxu1  ;;  %v4289_v53 = vpack.c.bf16 %v4282_v10, %v4282_v10  ;;  %v7179_v10 = vld [vmem:[%s9021_s8 + $0x1e0] sm:$0xff]  }
 0xa49   : > { %v4290_v24 = vpack.c.bf16 %v4284_v33, %v4284_v33  ;;  %v4286_v34 = vpop.f32.mrb[78].mxu1  ;;  %v7180_v33 = vld [vmem:[%s9021_s8 + $0x1e8] sm:$0xff]  }
 0xa4a   : > { %v4287_v54 = vpop.f32.mrb[79].mxu1  ;;  %v7182_v34 = vld [vmem:[%s9021_s8 + $0x1f8] sm:$0xff]  }
 0xa4b   : > { %6124 = vmatprep.mubr.msk.bf16.mxu1 %vm4404_vm9, %v4290_v24  ;;  %v7181_v24 = vld [vmem:[%s9021_s8 + $0x1f0] sm:$0xff]  }
 0xa4c   : > { %4441 = vmatmul.mubr.bf16.vlgmr.msra.gmra.mrb[80].mxu1 %v4289_v53  ;;  %6186 = vmatmul.mubr.msk.bf16.vlgmr.msra.gmra.mrb[76].mxu0 %vm4159_vm8, %v6185_v32  ;;  %v7183_v32 = vld [vmem:[%s9021_s8 + $0x200] sm:$0xff]   ;;  %v7184_v53 = vld [vmem:[%s9021_s8 + $0x208] sm:$0xff]   ;;  %v7185_v54 = vld [vmem:[%s9021_s8 + $0x210] sm:$0xff]  }
 0xa4d   : > { %4581 = vmatpush1.bf16.msra.mxu1 %v8656_v48  ;;  %4612 = vmatprep.mubr.bf16.mxu1 %v7264_v36 }
 0xa4e   : > { %4739 = vmatprep.subr.bf16.mxu1 %v7264_v36  ;;  %4945 = vmatpush1.bf16.msra.mxu0 %v7161_v55  ;;  %v7186_v55 = vld [vmem:[%s9021_s8 + $0x218] sm:$0xff]  }
 0xa4f   : > { %4946 = vmatprep.subr.bf16.mxu0 %v7264_v36 }
 0xa52   : > { %4947 = vmatpush1.bf16.msra.mxu0 %v7162_v56  ;;  %v7187_v56 = vld [vmem:[%s9021_s8 + $0x220] sm:$0xff]  }
 0xa53   : > { %4948 = vmatprep.subr.bf16.mxu0 %v7264_v36 }
 0xa54   : > { %6141 = vmatmul.mubr.msk.bf16.vlgmr.msra.gmra.mrb[84].mxu1 %vm4159_vm8, %v6140_v58  ;;  %v7188_v58 = vld [vmem:[%s9021_s8 + $0x228] sm:$0xff]  }
 0xa55   : > { %4740 = vmatpush1.bf16.msra.mxu1 %v7147_v59  ;;  %v7189_v59 = vld [vmem:[%s9023_s10 + $0x20] sm:$0xff]  }
 0xa56   : > { %4741 = vmatprep.subr.bf16.mxu1 %v7264_v36  ;;  %4949 = vmatpush1.bf16.msra.mxu0 %v7163_v57  ;;  %v7190_v57 = vld [vmem:[%s9023_s10 + $0x28] sm:$0xff]  }
 0xa57   : > { %4950 = vmatprep.subr.bf16.mxu0 %v7264_v36 }
 0xa59   : > { %4742 = vmatpush1.bf16.msra.mxu1 %v7148_v61 }
 0xa5a   : > { %4743 = vmatprep.subr.bf16.mxu1 %v7264_v36  ;;  %4951 = vmatpush1.bf16.msra.mxu0 %v7164_v60 }
 0xa5b   : > { %4952 = vmatprep.subr.bf16.mxu0 %v7264_v36 }
 0xa5d   : > { %4744 = vmatpush1.bf16.msra.mxu1 %v7149_v63 }
 0xa5e   : > { %4745 = vmatprep.subr.bf16.mxu1 %v7264_v36  ;;  %4953 = vmatpush1.bf16.msra.mxu0 %v7165_v62 }
 0xa5f   : > { %4954 = vmatprep.subr.bf16.mxu0 %v7264_v36 }
 0xa61   : > { %4746 = vmatpush1.bf16.msra.mxu1 %v7150_v0 }
 0xa62   : > { %4747 = vmatprep.subr.bf16.mxu1 %v7264_v36  ;;  %4955 = vmatpush1.bf16.msra.mxu0 %v7166_v1 }
 0xa63   : > { %4956 = vmatprep.subr.bf16.mxu0 %v7264_v36 }
 0xa65   : > { %4748 = vmatpush1.bf16.msra.mxu1 %v7151_v2 }
 0xa66   : > { %4749 = vmatprep.subr.bf16.mxu1 %v7264_v36  ;;  %4957 = vmatpush1.bf16.msra.mxu0 %v7167_v13 }
 0xa67   : > { %4958 = vmatprep.subr.bf16.mxu0 %v7264_v36 }
 0xa69   : > { %4750 = vmatpush1.bf16.msra.mxu1 %v7152_v3 }
 0xa6a   : > { %4751 = vmatprep.subr.bf16.mxu1 %v7264_v36  ;;  %4959 = vmatpush1.bf16.msra.mxu0 %v7168_v4 }
 0xa6b   : > { %4960 = vmatprep.subr.bf16.mxu0 %v7264_v36 }
 0xa6d   : > { %4752 = vmatpush1.bf16.msra.mxu1 %v7153_v14 }
 0xa6e   : > { %4753 = vmatprep.subr.bf16.mxu1 %v7264_v36  ;;  %4961 = vmatpush1.bf16.msra.mxu0 %v7169_v12  ;;  %v6275_v12 = vld [vmem:[%s9022_s9] ss:$0 sm:$0xff] }
 0xa6f   : > { %4962 = vmatprep.subr.bf16.mxu0 %v7264_v36 }
 0xa71   : > { %4754 = vmatpush1.bf16.msra.mxu1 %v7154_v15 }
 0xa72   : > { %4755 = vmatprep.subr.bf16.mxu1 %v7264_v36  ;;  %4963 = vmatpush1.bf16.msra.mxu0 %v7170_v17 }
 0xa73   : > { %4964 = vmatprep.subr.bf16.mxu0 %v7264_v36 }
 0xa75   : > { %4756 = vmatpush1.bf16.msra.mxu1 %v7155_v5 }
 0xa76   : > { %4757 = vmatprep.subr.bf16.mxu1 %v7264_v36  ;;  %4965 = vmatpush1.bf16.msra.mxu0 %v7171_v18 }
 0xa77   : > { %4966 = vmatprep.subr.bf16.mxu0 %v7264_v36 }
 0xa79   : > { %4758 = vmatpush1.bf16.msra.mxu1 %v7156_v6 }
 0xa7a   : > { %4759 = vmatprep.subr.bf16.mxu1 %v7264_v36  ;;  %4967 = vmatpush1.bf16.msra.mxu0 %v7172_v19 }
 0xa7b   : > { %4968 = vmatprep.subr.bf16.mxu0 %v7264_v36 }
 0xa7d   : > { %4760 = vmatpush1.bf16.msra.mxu1 %v7157_v7 }
 0xa7e   : > { %4761 = vmatprep.subr.bf16.mxu1 %v7264_v36  ;;  %4969 = vmatpush1.bf16.msra.mxu0 %v7173_v20 }
 0xa7f   : > { %4970 = vmatprep.subr.bf16.mxu0 %v7264_v36 }
 0xa81   : > { %4762 = vmatpush1.bf16.msra.mxu1 %v7158_v8  ;;  %v7191_v8 = vld [vmem:[%s9023_s10 + $0x30] sm:$0xff]  }
 0xa82   : > { %4763 = vmatprep.subr.bf16.mxu1 %v7264_v36  ;;  %4971 = vmatpush1.bf16.msra.mxu0 %v7174_v22 }
 0xa83   : > { %6587 = vmatprep.subr.bf16.mxu0 %v7265_v46 }
 0xa85   : > { %4764 = vmatpush1.bf16.msra.mxu1 %v7159_v9  ;;  %v7192_v9 = vld [vmem:[%s9023_s10 + $0x38] sm:$0xff]  }
 0xa86   : > { %4765 = vmatprep.subr.bf16.mxu1 %v7264_v36 }
 0xa89   : > { %4766 = vmatpush1.bf16.msra.mxu1 %v7160_v11 }
 0xa8a   : > { %4990 = vmatprep.subr.bf16.mxu1 %v8654_v25 }
 0xb17   : > { %v4569_v49 = vpop.f32.mrb[72].mxu0 }
 0xb18   : > { %v4571_v23 = vpop.f32.mrb[73].mxu0 }
 0xb19   : > { %v4572_v25 = vpop.f32.mrb[74].mxu0 }
 0xb1a   : > { %v4573_v51 = vpop.f32.mrb[75].mxu0  ;;  %v7193_v25 = vld [vmem:[%s9023_s10] sm:$0xff]  }
 0xb1f   : > { %v4442_v26 = vpop.f32.mrb[80].mxu1  ;;  %v4819_v27 = vpop.f32.mrb[76].mxu0 }
 0xb20   : > { %v8857_v28 = vadd.f32 %v4569_v49, %v4442_v26  ;;  %v4444_v29 = vpop.f32.mrb[81].mxu1  ;;  %v4826_v30 = vpack.c.bf16 %v4819_v27, %v4819_v27  ;;  %v4821_v31 = vpop.f32.mrb[77].mxu0  ;;  %v7194_v26 = vld [vmem:[%s9023_s10 + $0x8] sm:$0xff]   ;;  %v7195_v27 = vld [vmem:[%s9023_s10 + $0x10] sm:$0xff]  }
 0xb21   : > { %v4445_v37 = vpop.f32.mrb[82].mxu1  ;;  %v4827_v39 = vpack.c.bf16 %v4821_v31, %v4821_v31  ;;  %v4823_v41 = vpop.f32.mrb[78].mxu0 }
 0xb22   : > { %v4446_v43 = vpop.f32.mrb[83].mxu1  ;;  %v4824_v44 = vpop.f32.mrb[79].mxu0  ;;  %v5354_v41 = vld [vmem:[%s9024_s11] sm:$0x1] }
 0xb23   : > { %6229 = vmatprep.mubr.msk.bf16.mxu0 %vm4404_vm9, %v4827_v39 }
 0xb24   : > { %4977 = vmatmul.mubr.bf16.vlgmr.msra.gmra.mrb[80].mxu0 %v4826_v30 }
 0xb25   : > { %6595 = vmatprep.mubr.msk.bf16.mxu0 %vm7266_vm3, %v7265_v46  ;;  %6588 = vmatpush3.bf16.msra.mxu0 %v7189_v59 }
 0xb26   : > { %6589 = vmatprep.subr.bf16.mxu0 %v7265_v46 }
 0xb27   : > { %v4614_v45 = vpop.f32.mrb[84].mxu1 }
 0xb28   : > { %v4616_v47 = vpop.f32.mrb[85].mxu1  ;;  %v4621_v52 = vpack.c.bf16 %v4614_v45, %v4614_v45 }
 0xb29   : > { %v4622_v50 = vpack.c.bf16 %v4616_v47, %v4616_v47  ;;  %v4618_v16 = vpop.f32.mrb[86].mxu1  ;;  %6590 = vmatpush3.bf16.msra.mxu0 %v7190_v57 }
 0xb2a   : > { %v4619_v21 = vpop.f32.mrb[87].mxu1  ;;  %6591 = vmatprep.subr.bf16.mxu0 %v7265_v46 }
 0xb2b   : > { %6184 = vmatprep.mubr.msk.bf16.mxu1 %vm4404_vm9, %v4622_v50 }
 0xb2c   : > { %4772 = vmatmul.mubr.bf16.vlgmr.msra.gmra.mrb[88].mxu1 %v4621_v52 }
 0xb2d   : > { %4991 = vmatpush1.bf16.msra.mxu1 %v8656_v48  ;;  %5022 = vmatprep.mubr.bf16.mxu1 %v7264_v36  ;;  %v7177_v48 = vld [vmem:[%s9021_s8 + $0x1d0] sm:$0xff]  }
 0xb2e   : > { %5149 = vmatprep.subr.bf16.mxu1 %v7264_v36  ;;  %6592 = vmatpush3.bf16.msra.mxu0 %v7191_v8 }
 0xb2f   : > { %6593 = vmatprep.subr.bf16.mxu0 %v7265_v46 }
 0xb32   : > { %6594 = vmatpush3.bf16.msra.mxu0 %v7192_v9 }
 0xb33   : > { %6599 = vmatprep.subr.bf16.mxu0 %v7265_v46 }
 0xb34   : > { %6231 = vmatmul.mubr.msk.bf16.vlgmr.msra.gmra.mrb[92].mxu1 %vm4159_vm8, %v6230_v35 }
 0xb35   : > { %5150 = vmatpush1.bf16.msra.mxu1 %v7175_v38 }
 0xb36   : > { %5151 = vmatprep.subr.bf16.mxu1 %v7264_v36 }
 0xb39   : > { %5152 = vmatpush1.bf16.msra.mxu1 %v7176_v40 }
 0xb3a   : > { %5153 = vmatprep.subr.bf16.mxu1 %v7264_v36 }
 0xb3d   : > { %5154 = vmatpush1.bf16.msra.mxu1 %v7177_v48 }
 0xb3e   : > { %5155 = vmatprep.subr.bf16.mxu1 %v7264_v36 }
 0xb41   : > { %5156 = vmatpush1.bf16.msra.mxu1 %v7178_v42 }
 0xb42   : > { %5157 = vmatprep.subr.bf16.mxu1 %v7264_v36 }
 0xb45   : > { %5158 = vmatpush1.bf16.msra.mxu1 %v7179_v10 }
 0xb46   : > { %5159 = vmatprep.subr.bf16.mxu1 %v7264_v36 }
 0xb49   : > { %5160 = vmatpush1.bf16.msra.mxu1 %v7180_v33 }
 0xb4a   : > { %5161 = vmatprep.subr.bf16.mxu1 %v7264_v36 }
 0xb4d   : > { %5162 = vmatpush1.bf16.msra.mxu1 %v7181_v24 }
 0xb4e   : > { %5163 = vmatprep.subr.bf16.mxu1 %v7264_v36 }
 0xb51   : > { %5164 = vmatpush1.bf16.msra.mxu1 %v7182_v34 }
 0xb52   : > { %5165 = vmatprep.subr.bf16.mxu1 %v7264_v36 }
 0xb55   : > { %5166 = vmatpush1.bf16.msra.mxu1 %v7183_v32 }
 0xb56   : > { %5167 = vmatprep.subr.bf16.mxu1 %v7264_v36 }
 0xb59   : > { %5168 = vmatpush1.bf16.msra.mxu1 %v7184_v53 }
 0xb5a   : > { %5169 = vmatprep.subr.bf16.mxu1 %v7264_v36 }
 0xb5d   : > { %5170 = vmatpush1.bf16.msra.mxu1 %v7185_v54 }
 0xb5e   : > { %5171 = vmatprep.subr.bf16.mxu1 %v7264_v36 }
 0xb61   : > { %5172 = vmatpush1.bf16.msra.mxu1 %v7186_v55 }
 0xb62   : > { %5173 = vmatprep.subr.bf16.mxu1 %v7264_v36 }
 0xb65   : > { %5174 = vmatpush1.bf16.msra.mxu1 %v7187_v56 }
 0xb66   : > { %5175 = vmatprep.subr.bf16.mxu1 %v7264_v36 }
 0xb69   : > { %5176 = vmatpush1.bf16.msra.mxu1 %v7188_v58 }
 0xbf7   : > { %v4978_v36 = vpop.f32.mrb[80].mxu0 }
 0xbf8   : > { %v4980_v61 = vpop.f32.mrb[81].mxu0 }
 0xbf9   : > { %v4981_v60 = vpop.f32.mrb[82].mxu0 }
 0xbfa   : > { %v4982_v63 = vpop.f32.mrb[83].mxu0 }
 0xbff   : > { %v4773_v62 = vpop.f32.mrb[88].mxu1 }
 0xc00   : > { %v4779_v0 = vadd.f32 %v4773_v62, %v8857_v28  ;;  %v4775_v1 = vpop.f32.mrb[89].mxu1  ;;  %v7196_v28 = vld [vmem:[%s9023_s10 + $0x18] sm:$0xff]  }
 0xc01   : > { %v4776_v2 = vpop.f32.mrb[90].mxu1 }
 0xc02   : > { %v4984_v13 = vadd.f32 %v4978_v36, %v4779_v0  ;;  %v4777_v3 = vpop.f32.mrb[91].mxu1 }
 0xc07   : > { %v5024_v4 = vpop.f32.mrb[92].mxu1 }
 0xc08   : > { %v5026_v14 = vpop.f32.mrb[93].mxu1  ;;  %v5031_v6 = vpack.c.bf16 %v5024_v4, %v5024_v4 }
 0xc09   : > { %v5032_v15 = vpack.c.bf16 %v5026_v14, %v5026_v14  ;;  %v5028_v5 = vpop.f32.mrb[94].mxu1 }
 0xc0a   : > { %v5029_v7 = vpop.f32.mrb[95].mxu1 }
 0xc0b   : > { %6274 = vmatprep.mubr.msk.bf16.mxu1 %vm4404_vm9, %v5032_v15 }
 0xc0c   : > { %5182 = vmatmul.mubr.bf16.vlgmr.msra.gmra.mrb[96].mxu1 %v5031_v6 }
 0xcdf   : > { %v5183_v11 = vpop.f32.mrb[96].mxu1 }
 0xce0   : > { %v5189_v17 = vadd.f32 %v5183_v11, %v4984_v13  ;;  %v5185_v18 = vpop.f32.mrb[97].mxu1 }
 0xce1   : > { %v5186_v19 = vpop.f32.mrb[98].mxu1 }
 0xce2   : > { %v5197_v20 = vadd.f32 %v6275_v12, %v5189_v17  ;;  %v5187_v22 = vpop.f32.mrb[99].mxu1 }
 0xce4   : > { %v5198_v49 = vmax.f32 %v5197_v20, 0.0 }
 0xce6   : > { %v5199_v23 = vpack.c.bf16 %v5198_v49, %v5198_v49 }
 0xce8   : > { %v5218_v51 = vshrl.u32 %v5199_v23, 16 }
 0xcea   : > { %6596 = vmatmul.mubr.msk.bf16.vlgmr.msra.gmra.mrb[84].mxu0 %vm5244_vm10, %v5218_v51 }
 0xceb   : > { %6600 = vmatpush3.bf16.msra.mxu0 %v7193_v25  ;;  %6607 = vmatprep.mubr.msk.bf16.mxu0 %vm7266_vm3, %v7265_v46 }
 0xcec   : > { %6601 = vmatprep.subr.bf16.mxu0 %v7265_v46 }
 0xcef   : > { %6602 = vmatpush3.bf16.msra.mxu0 %v7194_v26 }
 0xcf0   : > { %6603 = vmatprep.subr.bf16.mxu0 %v7265_v46 }
 0xcf3   : > { %6604 = vmatpush3.bf16.msra.mxu0 %v7195_v27 }
 0xcf4   : > { %6605 = vmatprep.subr.bf16.mxu0 %v7265_v46 }
 0xcf7   : > { %6606 = vmatpush3.bf16.msra.mxu0 %v7196_v28 }
 0xcfa   : > { %6608 = vmatmul.mubr.msk.bf16.vlgmr.msra.gmra.mrb[88].mxu0 %vm5244_vm10, %v5199_v23 }
 0xdbd   : > { %v5282_v29 = vpop.f32.mrb[84].mxu0 }
 0xdbe   : > { %v6597_v30 = vpop.f32.mrb[85].mxu0 }
 0xdbf   : > { %v5285_v31 = vpop.f32.mrb[86].mxu0 }
 0xdc0   : > { %v6598_v37 = vpop.f32.mrb[87].mxu0 }
 0xdcd   : > { %v5348_v39 = vpop.f32.mrb[88].mxu0 }
 0xdce   : > { %v5349_v43 = vadd.f32 %v5348_v39, %v5282_v29  ;;  %v6609_v44 = vpop.f32.mrb[89].mxu0 }
 0xdcf   : > { %v5351_v45 = vpop.f32.mrb[90].mxu0 }
 0xdd0   : > { %v5355_v46 = vadd.f32 %v5354_v41, %v5349_v43  ;;  %v6610_v47 = vpop.f32.mrb[91].mxu0 }
 0xdd2   : > { %5357 = vst.msk [vmem:[%s405_s18] sm:$0x1] %vm5356_vm11, %v5355_v46 }
 0xdd3   : > { %7213 = shalt.err (!%p7210_p3)
}
 0xdd4   : > { %s7214_s28 = scalar_lea.hbm %s8971_s0, 16  ;;  %s7218_s20 = scalar_lea.hbm %s9025_s12, 32 }
 0xdd5   : > { %p7215_p4 = scmp.ne.s32.totalorder %s8971_s0, %s7214_s28  ;;  %p7219_p9 = scmp.lt.u32.totalorder %s8971_s0, %s9025_s12 }
 0xdd6   : > { %p7220_p10 = scmp.lt.u32.totalorder %s7218_s20, %s7214_s28  ;;  %p7222_p12 = scmp.lt.u32.totalorder %s7214_s28, %s8971_s0 }
 0xdd7   : > { %p7216_p7 = pnand %p7215_p4, %p7372_p5 }
 0xdd8   : > { %p7221_p11 = por %p7220_p10, %p7219_p9 }
 0xdd9   : > { %p7217_p8 = pneg %p7216_p7 }
 0xdda   : > { %p7223_p13 = por %p7222_p12, %p7221_p11 }
 0xddc   : > { %p7224_p0 = pnand %p7223_p13, %p7217_p8 }
 0xdde   : > { %7227 = shalt.err (!%p7224_p0)
}
 0xddf   : > { %6638 = dma.vmem_to_hbm [thread:$0]  (%p7372_p5), %s8973_s19, 16, %s8971_s0, %s5359_s25  }
 0xde0 PF: > { %p6644_p1 = scmp.ge.s32.totalorder %s7262_s24, 2  ;;  %s5383_s30 = sand.u32 1, %s7250_s21  }
 0xde1   : > { %s5384_s15 = scalar_lea.sflag [#allocation3], %s5383_s30 }
 0xde2   : > { %p6641_p2 = pnand %p6644_p1, %p7376_p6 }
 0xde4   : > { %7245 = dma.done.wait (!%p6641_p2), %s5384_s15, 16  }
 0xde5   : > { %7247 = vsyncadd (!%p6641_p2), %s5384_s15, 4294967280  ;;  %s9031_s16 = sld [smem:[#allocation5_spill]]  ;;  %p22_p3 = scmp.ge.s32.totalorder %s7359_s27, 4  }
 0xde6   : > { %s9032_s21 = smov %s7254_s22  ;;  %s9033_s22 = smov %s7258_s23 }
 0xde7   : > { %s9035_s24 = smov %s7359_s27  ;;  %24 = sbr.rel (!%p22_p3) target bundleno = 5 (0x5), region = 128 }
 0xdeb   : > { %s9034_s23 = smov %s9031_s16 }
 0xdee   :  { %5388 = vsyncpa [#allocation3], 1 }
 0xdef   :  { %5390 = vsyncpa [#allocation3 + $0x1], 1 }

</bundles_post_ra>
